<compile_context>
chip_gen: v6e
topology: v6e:2x2x1
jax: 0.10.0
libtpu: 0.0.40
codegen_flags: <defaults>
</compile_context>

<pallas_src>
import jax
import jax.numpy as jnp
from jax.experimental import pallas as pl
from jax.experimental.pallas import tpu as pltpu

# Module-fixed hyperparameters
K1, S1, C1 = 40, 5, 5     # conv1: in=1,  out=5
K2, S2, C2 = 20, 3, 5     # conv2: in=5,  out=5
K3, S3, C3 = 15, 2, 7     # conv3: in=5,  out=7
L_IN = 1080               # implied by Linear(175, 2)
L1 = (L_IN - K1) // S1 + 1   # 209
L2 = (L1 - K2) // S2 + 1     # 64
L3 = (L2 - K3) // S3 + 1     # 25
N_OUT = 2
XROWS = L_IN // S1           # 216 (input reshaped to (216, 5))


def net_kernel(x_ref, w1_ref, b1_ref, w2_ref, b2_ref, w3_ref, b3_ref,
               wl_ref, bl_ref, out_ref, h1_ref, h2_ref):
    """One batch element per grid step.

    x_ref : (216, 5)        input reshaped so row m holds x[5m : 5m+5]
    w1_ref: (40, 5)         conv1 weight, row = tap index, col = out channel
    w2_ref: (100, 5)        conv2 weight, row = tap*5 + in_ch
    w3_ref: (75, 7)         conv3 weight, row = tap*5 + in_ch
    wl_ref: (2, 25, 7)      linear weight regrouped to [out, pos, ch]
                            (matches torch's channel-major Flatten)
    b*_ref: (1, C)          biases
    out_ref: (1, 2)         output for this batch element
    h1_ref, h2_ref: VMEM scratch (209, 5) / (64, 5) — needed so the strided
                    conv windows can be read back with pl.ds(stride=...)
    """
    # ---- Conv1d(1, 5, 40, stride=5) + ReLU : im2col + one MXU dot ----
    # Window l covers x[5l : 5l+40] = rows l..l+7 of the (216, 5) view, so the
    # im2col matrix is 8 contiguous sublane slices concatenated on lanes.
    x1 = jnp.concatenate(
        [x_ref[j:j + L1, :] for j in range(K1 // S1)], axis=1)          # (209, 40)
    h1 = jnp.dot(x1, w1_ref[...], preferred_element_type=jnp.float32)   # (209, 5)
    h1_ref[...] = jnp.maximum(h1 + b1_ref[...], 0.0)

    # ---- Conv1d(5, 5, 20, stride=3) + ReLU : im2col + one MXU dot ----
    x2 = jnp.concatenate(
        [h1_ref[pl.ds(k, L2, stride=S2), :] for k in range(K2)], axis=1)  # (64, 100)
    h2 = jnp.dot(x2, w2_ref[...], preferred_element_type=jnp.float32)     # (64, 5)
    h2_ref[...] = jnp.maximum(h2 + b2_ref[...], 0.0)

    # ---- Conv1d(5, 7, 15, stride=2) + ReLU : im2col + one MXU dot ----
    x3 = jnp.concatenate(
        [h2_ref[pl.ds(k, L3, stride=S3), :] for k in range(K3)], axis=1)  # (25, 75)
    h3 = jnp.maximum(
        jnp.dot(x3, w3_ref[...], preferred_element_type=jnp.float32)
        + b3_ref[...], 0.0)                                               # (25, 7)

    # ---- Flatten (torch channel-major, baked into wl) + Linear(175, 2) + Sigmoid
    # N_OUT == 2, so a VPU multiply + full reduction beats tiny MXU dots.
    z0 = jnp.sum(jnp.sum(h3 * wl_ref[0], axis=1, keepdims=True),
                 axis=0, keepdims=True)                                   # (1, 1)
    z1 = jnp.sum(jnp.sum(h3 * wl_ref[1], axis=1, keepdims=True),
                 axis=0, keepdims=True)                                   # (1, 1)
    z = jnp.concatenate([z0, z1], axis=1) + bl_ref[...]                   # (1, 2)
    out_ref[...] = 1.0 / (1.0 + jnp.exp(-z))


def prepare_params(params):
    """One-time re-layout of the PyTorch-format weights into kernel layout."""
    w1, b1, w2, b2, w3, b3, wl, bl = params
    # conv1: (C1, 1, K1) -> (K1, C1); im2col column j*5+c is exactly tap 5j+c.
    w1t = jnp.transpose(w1[:, 0, :], (1, 0))                              # (40, 5)
    # conv2/3: (Cout, Cin, K) -> (K, Cin, Cout) -> (K*Cin, Cout), row = k*Cin + c.
    w2r = jnp.transpose(w2, (2, 1, 0)).reshape(K2 * C1, C2)               # (100, 5)
    w3r = jnp.transpose(w3, (2, 1, 0)).reshape(K3 * C2, C3)               # (75, 7)
    # torch Flatten of (C3, L3) is channel-major: flat[c*L3 + t].
    wlr = jnp.transpose(wl.reshape(N_OUT, C3, L3), (0, 2, 1))             # (2, 25, 7)
    return (w1t, b1.reshape(1, C1), w2r, b2.reshape(1, C2),
            w3r, b3.reshape(1, C3), wlr, bl.reshape(1, N_OUT))


def net_forward(x, prep):
    """x: (B, 1, 1080) float32 (PyTorch NCL).  Returns (B, 2) float32."""
    w1t, b1r, w2r, b2r, w3r, b3r, wlr, blr = prep
    B = x.shape[0]

    # Layout plumbing only: (B, 1, 1080) -> (B, 216, 5) so the stride-5 conv1
    # windows become contiguous sublane slices inside the kernel.
    x_rs = x[:, 0, :].reshape(B, XROWS, S1)

    out = pl.pallas_call(
        net_kernel,
        out_shape=jax.ShapeDtypeStruct((B, 1, N_OUT), jnp.float32),
        grid_spec=pltpu.PrefetchScalarGridSpec(
            num_scalar_prefetch=0,
            grid=(B,),
            in_specs=[
                pl.BlockSpec((None, XROWS, S1), lambda b: (b, 0, 0)),   # x tile
                pl.BlockSpec((K1, C1), lambda b: (0, 0)),               # w1
                pl.BlockSpec((1, C1), lambda b: (0, 0)),                # b1
                pl.BlockSpec((K2 * C1, C2), lambda b: (0, 0)),          # w2
                pl.BlockSpec((1, C2), lambda b: (0, 0)),                # b2
                pl.BlockSpec((K3 * C2, C3), lambda b: (0, 0)),          # w3
                pl.BlockSpec((1, C3), lambda b: (0, 0)),                # b3
                pl.BlockSpec((N_OUT, L3, C3), lambda b: (0, 0, 0)),     # wl
                pl.BlockSpec((1, N_OUT), lambda b: (0, 0)),             # bl
            ],
            out_specs=pl.BlockSpec((None, 1, N_OUT), lambda b: (b, 0, 0)),
            scratch_shapes=[
                pltpu.VMEM((L1, C1), jnp.float32),
                pltpu.VMEM((L2, C2), jnp.float32),
            ],
        ),
        compiler_params=pltpu.CompilerParams(
            dimension_semantics=("parallel",)),
    )(x_rs, w1t, b1r, w2r, b2r, w3r, b3r, wlr, blr)
    return out.reshape(B, N_OUT)


def init_params(key):
    """Deterministic synthetic params (PyTorch-default-style uniform init)."""
    ks = jax.random.split(key, 8)

    def u(k, shape, fan_in):
        bound = 1.0 / jnp.sqrt(float(fan_in))
        return jax.random.uniform(k, shape, jnp.float32, -bound, bound)

    w1 = u(ks[0], (C1, 1, K1), 1 * K1)
    b1 = u(ks[1], (C1,), 1 * K1)
    w2 = u(ks[2], (C2, C1, K2), C1 * K2)
    b2 = u(ks[3], (C2,), C1 * K2)
    w3 = u(ks[4], (C3, C2, K3), C2 * K3)
    b3 = u(ks[5], (C3,), C2 * K3)
    wl = u(ks[6], (N_OUT, C3 * L3), C3 * L3)
    bl = u(ks[7], (N_OUT,), C3 * L3)
    return (w1, b1, w2, b2, w3, b3, wl, bl)


def net_reference(x, params):
    """Pure-JAX reference mirroring the PyTorch forward (eval mode)."""
    w1, b1, w2, b2, w3, b3, wl, bl = params
    dn = ("NCH", "OIH", "NCH")
    h = jax.lax.conv_general_dilated(x, w1, (S1,), "VALID", dimension_numbers=dn,
                                     precision=jax.lax.Precision.HIGHEST)
    h = jnp.maximum(h + b1[None, :, None], 0.0)
    h = jax.lax.conv_general_dilated(h, w2, (S2,), "VALID", dimension_numbers=dn,
                                     precision=jax.lax.Precision.HIGHEST)
    h = jnp.maximum(h + b2[None, :, None], 0.0)
    h = jax.lax.conv_general_dilated(h, w3, (S3,), "VALID", dimension_numbers=dn,
                                     precision=jax.lax.Precision.HIGHEST)
    h = jnp.maximum(h + b3[None, :, None], 0.0)
    flat = h.reshape(h.shape[0], -1)                          # (B, 175)
    z = jnp.dot(flat, wl.T, precision=jax.lax.Precision.HIGHEST) + bl
    return jax.nn.sigmoid(z)


if __name__ == "__main__":
    key = jax.random.PRNGKey(0)
    kx, kp = jax.random.split(key)

    B = 2
    x = jax.random.normal(kx, (B, 1, L_IN), jnp.float32)      # (2, 1, 1080)
    params = init_params(kp)

    # Weight re-layout happens once, off the per-forward path.
    prep = prepare_params(params)

    out = jax.jit(net_forward)(x, prep)
    out = jax.block_until_ready(out)

    ref = net_reference(x, params)
    assert out.shape == (B, N_OUT), out.shape
    max_diff = float(jnp.max(jnp.abs(out - ref)))
    if max_diff > 2e-2:
        raise SystemExit(f"Mismatch vs reference: max abs diff = {max_diff:e}")
    print("KERNEL_OK")
</pallas_src>

<mosaic_0001>
module attributes {stable_mosaic.version = 11 : i64} {
  func.func @net_kernel(%arg0: i32, %arg1: memref<1x216x5xf32, #tpu.memory_space<vmem>>, %arg2: memref<40x5xf32, #tpu.memory_space<vmem>>, %arg3: memref<1x5xf32, #tpu.memory_space<vmem>>, %arg4: memref<100x5xf32, #tpu.memory_space<vmem>>, %arg5: memref<1x5xf32, #tpu.memory_space<vmem>>, %arg6: memref<75x7xf32, #tpu.memory_space<vmem>>, %arg7: memref<1x7xf32, #tpu.memory_space<vmem>>, %arg8: memref<2x25x7xf32, #tpu.memory_space<vmem>>, %arg9: memref<1x2xf32, #tpu.memory_space<vmem>>, %arg10: memref<1x1x2xf32, #tpu.memory_space<vmem>>, %arg11: memref<209x5xf32, #tpu.memory_space<vmem>>, %arg12: memref<64x5xf32, #tpu.memory_space<vmem>>) attributes {dimension_semantics = [#tpu.dimension_semantics<parallel>], iteration_bounds = array<i64: 2>, scalar_prefetch = 0 : i64, scratch_operands = 2 : i64, tpu.core_type = #tpu.core_type<tc>, window_params = [{transform_indices = @transform_0, window_bounds = array<i64: 1, 216, 5>}, {pipeline_mode = #tpu.pipeline_mode<synchronous>, transform_indices = @transform_1, window_bounds = array<i64: 40, 5>}, {pipeline_mode = #tpu.pipeline_mode<synchronous>, transform_indices = @transform_2, window_bounds = array<i64: 1, 5>}, {pipeline_mode = #tpu.pipeline_mode<synchronous>, transform_indices = @transform_3, window_bounds = array<i64: 100, 5>}, {pipeline_mode = #tpu.pipeline_mode<synchronous>, transform_indices = @transform_4, window_bounds = array<i64: 1, 5>}, {pipeline_mode = #tpu.pipeline_mode<synchronous>, transform_indices = @transform_5, window_bounds = array<i64: 75, 7>}, {pipeline_mode = #tpu.pipeline_mode<synchronous>, transform_indices = @transform_6, window_bounds = array<i64: 1, 7>}, {pipeline_mode = #tpu.pipeline_mode<synchronous>, transform_indices = @transform_7, window_bounds = array<i64: 2, 25, 7>}, {pipeline_mode = #tpu.pipeline_mode<synchronous>, transform_indices = @transform_8, window_bounds = array<i64: 1, 2>}, {transform_indices = @transform_9, window_bounds = array<i64: 1, 1, 2>}]} {
    %c0 = arith.constant 0 : index
    %c0_0 = arith.constant 0 : index
    %c0_1 = arith.constant 0 : index
    %0 = vector.load %arg1[%c0, %c0_0, %c0_1] : memref<1x216x5xf32, #tpu.memory_space<vmem>>, vector<1x209x5xf32>
    %1 = vector.shape_cast %0 : vector<1x209x5xf32> to vector<209x5xf32>
    %c0_2 = arith.constant 0 : index
    %c1 = arith.constant 1 : index
    %c0_3 = arith.constant 0 : index
    %2 = vector.load %arg1[%c0_2, %c1, %c0_3] : memref<1x216x5xf32, #tpu.memory_space<vmem>>, vector<1x209x5xf32>
    %3 = vector.shape_cast %2 : vector<1x209x5xf32> to vector<209x5xf32>
    %c0_4 = arith.constant 0 : index
    %c2 = arith.constant 2 : index
    %c0_5 = arith.constant 0 : index
    %4 = vector.load %arg1[%c0_4, %c2, %c0_5] : memref<1x216x5xf32, #tpu.memory_space<vmem>>, vector<1x209x5xf32>
    %5 = vector.shape_cast %4 : vector<1x209x5xf32> to vector<209x5xf32>
    %c0_6 = arith.constant 0 : index
    %c3 = arith.constant 3 : index
    %c0_7 = arith.constant 0 : index
    %6 = vector.load %arg1[%c0_6, %c3, %c0_7] : memref<1x216x5xf32, #tpu.memory_space<vmem>>, vector<1x209x5xf32>
    %7 = vector.shape_cast %6 : vector<1x209x5xf32> to vector<209x5xf32>
    %c0_8 = arith.constant 0 : index
    %c4 = arith.constant 4 : index
    %c0_9 = arith.constant 0 : index
    %8 = vector.load %arg1[%c0_8, %c4, %c0_9] : memref<1x216x5xf32, #tpu.memory_space<vmem>>, vector<1x209x5xf32>
    %9 = vector.shape_cast %8 : vector<1x209x5xf32> to vector<209x5xf32>
    %c0_10 = arith.constant 0 : index
    %c5 = arith.constant 5 : index
    %c0_11 = arith.constant 0 : index
    %10 = vector.load %arg1[%c0_10, %c5, %c0_11] : memref<1x216x5xf32, #tpu.memory_space<vmem>>, vector<1x209x5xf32>
    %11 = vector.shape_cast %10 : vector<1x209x5xf32> to vector<209x5xf32>
    %c0_12 = arith.constant 0 : index
    %c6 = arith.constant 6 : index
    %c0_13 = arith.constant 0 : index
    %12 = vector.load %arg1[%c0_12, %c6, %c0_13] : memref<1x216x5xf32, #tpu.memory_space<vmem>>, vector<1x209x5xf32>
    %13 = vector.shape_cast %12 : vector<1x209x5xf32> to vector<209x5xf32>
    %c0_14 = arith.constant 0 : index
    %c7 = arith.constant 7 : index
    %c0_15 = arith.constant 0 : index
    %14 = vector.load %arg1[%c0_14, %c7, %c0_15] : memref<1x216x5xf32, #tpu.memory_space<vmem>>, vector<1x209x5xf32>
    %15 = vector.shape_cast %14 : vector<1x209x5xf32> to vector<209x5xf32>
    %16 = tpu.concatenate %1, %3, %5, %7, %9, %11, %13, %15 in 1 : vector<209x5xf32>, vector<209x5xf32>, vector<209x5xf32>, vector<209x5xf32>, vector<209x5xf32>, vector<209x5xf32>, vector<209x5xf32>, vector<209x5xf32> -> vector<209x40xf32>
    %c0_16 = arith.constant 0 : index
    %c0_17 = arith.constant 0 : index
    %17 = vector.load %arg2[%c0_16, %c0_17] : memref<40x5xf32, #tpu.memory_space<vmem>>, vector<40x5xf32>
    %cst = arith.constant dense<0.000000e+00> : vector<209x5xf32>
    %18 = tpu.matmul %16, %17, %cst {dimension_numbers = #tpu.dot_dimension_numbers<[1], [0], [0], [1], [0, 0, 1, 1], [], []>} : vector<209x40xf32>, vector<40x5xf32>, vector<209x5xf32> -> vector<209x5xf32>
    %c0_18 = arith.constant 0 : index
    %c0_19 = arith.constant 0 : index
    %19 = vector.load %arg3[%c0_18, %c0_19] : memref<1x5xf32, #tpu.memory_space<vmem>>, vector<1x5xf32>
    %20 = vector.broadcast %19 : vector<1x5xf32> to vector<209x5xf32>
    %21 = arith.addf %18, %20 : vector<209x5xf32>
    %cst_20 = arith.constant 0.000000e+00 : f32
    %22 = vector.broadcast %cst_20 : f32 to vector<209x5xf32>
    %23 = arith.maximumf %21, %22 : vector<209x5xf32>
    %c0_21 = arith.constant 0 : index
    %c0_22 = arith.constant 0 : index
    %24 = vector.load %arg11[%c0_21, %c0_22] : memref<209x5xf32, #tpu.memory_space<vmem>>, vector<209x5xf32>
    tpu.vector_store %arg11[%c0_21, %c0_22], %23 {strides = array<i32>} : memref<209x5xf32, #tpu.memory_space<vmem>>, vector<209x5xf32>,
    %c0_23 = arith.constant 0 : index
    %c0_24 = arith.constant 0 : index
    %25 = tpu.strided_load %arg11[%c0_23, %c0_24] {strides = array<i32: 3, 1>} : memref<209x5xf32, #tpu.memory_space<vmem>>, vector<64x5xf32>
    %c1_25 = arith.constant 1 : index
    %c0_26 = arith.constant 0 : index
    %26 = tpu.strided_load %arg11[%c1_25, %c0_26] {strides = array<i32: 3, 1>} : memref<209x5xf32, #tpu.memory_space<vmem>>, vector<64x5xf32>
    %c2_27 = arith.constant 2 : index
    %c0_28 = arith.constant 0 : index
    %27 = tpu.strided_load %arg11[%c2_27, %c0_28] {strides = array<i32: 3, 1>} : memref<209x5xf32, #tpu.memory_space<vmem>>, vector<64x5xf32>
    %c3_29 = arith.constant 3 : index
    %c0_30 = arith.constant 0 : index
    %28 = tpu.strided_load %arg11[%c3_29, %c0_30] {strides = array<i32: 3, 1>} : memref<209x5xf32, #tpu.memory_space<vmem>>, vector<64x5xf32>
    %c4_31 = arith.constant 4 : index
    %c0_32 = arith.constant 0 : index
    %29 = tpu.strided_load %arg11[%c4_31, %c0_32] {strides = array<i32: 3, 1>} : memref<209x5xf32, #tpu.memory_space<vmem>>, vector<64x5xf32>
    %c5_33 = arith.constant 5 : index
    %c0_34 = arith.constant 0 : index
    %30 = tpu.strided_load %arg11[%c5_33, %c0_34] {strides = array<i32: 3, 1>} : memref<209x5xf32, #tpu.memory_space<vmem>>, vector<64x5xf32>
    %c6_35 = arith.constant 6 : index
    %c0_36 = arith.constant 0 : index
    %31 = tpu.strided_load %arg11[%c6_35, %c0_36] {strides = array<i32: 3, 1>} : memref<209x5xf32, #tpu.memory_space<vmem>>, vector<64x5xf32>
    %c7_37 = arith.constant 7 : index
    %c0_38 = arith.constant 0 : index
    %32 = tpu.strided_load %arg11[%c7_37, %c0_38] {strides = array<i32: 3, 1>} : memref<209x5xf32, #tpu.memory_space<vmem>>, vector<64x5xf32>
    %c8 = arith.constant 8 : index
    %c0_39 = arith.constant 0 : index
    %33 = tpu.strided_load %arg11[%c8, %c0_39] {strides = array<i32: 3, 1>} : memref<209x5xf32, #tpu.memory_space<vmem>>, vector<64x5xf32>
    %c9 = arith.constant 9 : index
    %c0_40 = arith.constant 0 : index
    %34 = tpu.strided_load %arg11[%c9, %c0_40] {strides = array<i32: 3, 1>} : memref<209x5xf32, #tpu.memory_space<vmem>>, vector<64x5xf32>
    %c10 = arith.constant 10 : index
    %c0_41 = arith.constant 0 : index
    %35 = tpu.strided_load %arg11[%c10, %c0_41] {strides = array<i32: 3, 1>} : memref<209x5xf32, #tpu.memory_space<vmem>>, vector<64x5xf32>
    %c11 = arith.constant 11 : index
    %c0_42 = arith.constant 0 : index
    %36 = tpu.strided_load %arg11[%c11, %c0_42] {strides = array<i32: 3, 1>} : memref<209x5xf32, #tpu.memory_space<vmem>>, vector<64x5xf32>
    %c12 = arith.constant 12 : index
    %c0_43 = arith.constant 0 : index
    %37 = tpu.strided_load %arg11[%c12, %c0_43] {strides = array<i32: 3, 1>} : memref<209x5xf32, #tpu.memory_space<vmem>>, vector<64x5xf32>
    %c13 = arith.constant 13 : index
    %c0_44 = arith.constant 0 : index
    %38 = tpu.strided_load %arg11[%c13, %c0_44] {strides = array<i32: 3, 1>} : memref<209x5xf32, #tpu.memory_space<vmem>>, vector<64x5xf32>
    %c14 = arith.constant 14 : index
    %c0_45 = arith.constant 0 : index
    %39 = tpu.strided_load %arg11[%c14, %c0_45] {strides = array<i32: 3, 1>} : memref<209x5xf32, #tpu.memory_space<vmem>>, vector<64x5xf32>
    %c15 = arith.constant 15 : index
    %c0_46 = arith.constant 0 : index
    %40 = tpu.strided_load %arg11[%c15, %c0_46] {strides = array<i32: 3, 1>} : memref<209x5xf32, #tpu.memory_space<vmem>>, vector<64x5xf32>
    %c16 = arith.constant 16 : index
    %c0_47 = arith.constant 0 : index
    %41 = tpu.strided_load %arg11[%c16, %c0_47] {strides = array<i32: 3, 1>} : memref<209x5xf32, #tpu.memory_space<vmem>>, vector<64x5xf32>
    %c17 = arith.constant 17 : index
    %c0_48 = arith.constant 0 : index
    %42 = tpu.strided_load %arg11[%c17, %c0_48] {strides = array<i32: 3, 1>} : memref<209x5xf32, #tpu.memory_space<vmem>>, vector<64x5xf32>
    %c18 = arith.constant 18 : index
    %c0_49 = arith.constant 0 : index
    %43 = tpu.strided_load %arg11[%c18, %c0_49] {strides = array<i32: 3, 1>} : memref<209x5xf32, #tpu.memory_space<vmem>>, vector<64x5xf32>
    %c19 = arith.constant 19 : index
    %c0_50 = arith.constant 0 : index
    %44 = tpu.strided_load %arg11[%c19, %c0_50] {strides = array<i32: 3, 1>} : memref<209x5xf32, #tpu.memory_space<vmem>>, vector<64x5xf32>
    %45 = tpu.concatenate %25, %26, %27, %28, %29, %30, %31, %32, %33, %34, %35, %36, %37, %38, %39, %40 in 1 : vector<64x5xf32>, vector<64x5xf32>, vector<64x5xf32>, vector<64x5xf32>, vector<64x5xf32>, vector<64x5xf32>, vector<64x5xf32>, vector<64x5xf32>, vector<64x5xf32>, vector<64x5xf32>, vector<64x5xf32>, vector<64x5xf32>, vector<64x5xf32>, vector<64x5xf32>, vector<64x5xf32>, vector<64x5xf32> -> vector<64x80xf32>
    %46 = tpu.concatenate %41, %42, %43, %44 in 1 : vector<64x5xf32>, vector<64x5xf32>, vector<64x5xf32>, vector<64x5xf32> -> vector<64x20xf32>
    %47 = tpu.concatenate %45, %46 in 1 : vector<64x80xf32>, vector<64x20xf32> -> vector<64x100xf32>
    %c0_51 = arith.constant 0 : index
    %c0_52 = arith.constant 0 : index
    %48 = vector.load %arg4[%c0_51, %c0_52] : memref<100x5xf32, #tpu.memory_space<vmem>>, vector<100x5xf32>
    %cst_53 = arith.constant dense<0.000000e+00> : vector<64x5xf32>
    %49 = tpu.matmul %47, %48, %cst_53 {dimension_numbers = #tpu.dot_dimension_numbers<[1], [0], [0], [1], [0, 0, 1, 1], [], []>} : vector<64x100xf32>, vector<100x5xf32>, vector<64x5xf32> -> vector<64x5xf32>
    %c0_54 = arith.constant 0 : index
    %c0_55 = arith.constant 0 : index
    %50 = vector.load %arg5[%c0_54, %c0_55] : memref<1x5xf32, #tpu.memory_space<vmem>>, vector<1x5xf32>
    %51 = vector.broadcast %50 : vector<1x5xf32> to vector<64x5xf32>
    %52 = arith.addf %49, %51 : vector<64x5xf32>
    %cst_56 = arith.constant 0.000000e+00 : f32
    %53 = vector.broadcast %cst_56 : f32 to vector<64x5xf32>
    %54 = arith.maximumf %52, %53 : vector<64x5xf32>
    %c0_57 = arith.constant 0 : index
    %c0_58 = arith.constant 0 : index
    %55 = vector.load %arg12[%c0_57, %c0_58] : memref<64x5xf32, #tpu.memory_space<vmem>>, vector<64x5xf32>
    tpu.vector_store %arg12[%c0_57, %c0_58], %54 {strides = array<i32>} : memref<64x5xf32, #tpu.memory_space<vmem>>, vector<64x5xf32>,
    %c0_59 = arith.constant 0 : index
    %c0_60 = arith.constant 0 : index
    %56 = tpu.strided_load %arg12[%c0_59, %c0_60] {strides = array<i32: 2, 1>} : memref<64x5xf32, #tpu.memory_space<vmem>>, vector<25x5xf32>
    %c1_61 = arith.constant 1 : index
    %c0_62 = arith.constant 0 : index
    %57 = tpu.strided_load %arg12[%c1_61, %c0_62] {strides = array<i32: 2, 1>} : memref<64x5xf32, #tpu.memory_space<vmem>>, vector<25x5xf32>
    %c2_63 = arith.constant 2 : index
    %c0_64 = arith.constant 0 : index
    %58 = tpu.strided_load %arg12[%c2_63, %c0_64] {strides = array<i32: 2, 1>} : memref<64x5xf32, #tpu.memory_space<vmem>>, vector<25x5xf32>
    %c3_65 = arith.constant 3 : index
    %c0_66 = arith.constant 0 : index
    %59 = tpu.strided_load %arg12[%c3_65, %c0_66] {strides = array<i32: 2, 1>} : memref<64x5xf32, #tpu.memory_space<vmem>>, vector<25x5xf32>
    %c4_67 = arith.constant 4 : index
    %c0_68 = arith.constant 0 : index
    %60 = tpu.strided_load %arg12[%c4_67, %c0_68] {strides = array<i32: 2, 1>} : memref<64x5xf32, #tpu.memory_space<vmem>>, vector<25x5xf32>
    %c5_69 = arith.constant 5 : index
    %c0_70 = arith.constant 0 : index
    %61 = tpu.strided_load %arg12[%c5_69, %c0_70] {strides = array<i32: 2, 1>} : memref<64x5xf32, #tpu.memory_space<vmem>>, vector<25x5xf32>
    %c6_71 = arith.constant 6 : index
    %c0_72 = arith.constant 0 : index
    %62 = tpu.strided_load %arg12[%c6_71, %c0_72] {strides = array<i32: 2, 1>} : memref<64x5xf32, #tpu.memory_space<vmem>>, vector<25x5xf32>
    %c7_73 = arith.constant 7 : index
    %c0_74 = arith.constant 0 : index
    %63 = tpu.strided_load %arg12[%c7_73, %c0_74] {strides = array<i32: 2, 1>} : memref<64x5xf32, #tpu.memory_space<vmem>>, vector<25x5xf32>
    %c8_75 = arith.constant 8 : index
    %c0_76 = arith.constant 0 : index
    %64 = tpu.strided_load %arg12[%c8_75, %c0_76] {strides = array<i32: 2, 1>} : memref<64x5xf32, #tpu.memory_space<vmem>>, vector<25x5xf32>
    %c9_77 = arith.constant 9 : index
    %c0_78 = arith.constant 0 : index
    %65 = tpu.strided_load %arg12[%c9_77, %c0_78] {strides = array<i32: 2, 1>} : memref<64x5xf32, #tpu.memory_space<vmem>>, vector<25x5xf32>
    %c10_79 = arith.constant 10 : index
    %c0_80 = arith.constant 0 : index
    %66 = tpu.strided_load %arg12[%c10_79, %c0_80] {strides = array<i32: 2, 1>} : memref<64x5xf32, #tpu.memory_space<vmem>>, vector<25x5xf32>
    %c11_81 = arith.constant 11 : index
    %c0_82 = arith.constant 0 : index
    %67 = tpu.strided_load %arg12[%c11_81, %c0_82] {strides = array<i32: 2, 1>} : memref<64x5xf32, #tpu.memory_space<vmem>>, vector<25x5xf32>
    %c12_83 = arith.constant 12 : index
    %c0_84 = arith.constant 0 : index
    %68 = tpu.strided_load %arg12[%c12_83, %c0_84] {strides = array<i32: 2, 1>} : memref<64x5xf32, #tpu.memory_space<vmem>>, vector<25x5xf32>
    %c13_85 = arith.constant 13 : index
    %c0_86 = arith.constant 0 : index
    %69 = tpu.strided_load %arg12[%c13_85, %c0_86] {strides = array<i32: 2, 1>} : memref<64x5xf32, #tpu.memory_space<vmem>>, vector<25x5xf32>
    %c14_87 = arith.constant 14 : index
    %c0_88 = arith.constant 0 : index
    %70 = tpu.strided_load %arg12[%c14_87, %c0_88] {strides = array<i32: 2, 1>} : memref<64x5xf32, #tpu.memory_space<vmem>>, vector<25x5xf32>
    %71 = tpu.concatenate %56, %57, %58, %59, %60, %61, %62, %63, %64, %65, %66, %67, %68, %69, %70 in 1 : vector<25x5xf32>, vector<25x5xf32>, vector<25x5xf32>, vector<25x5xf32>, vector<25x5xf32>, vector<25x5xf32>, vector<25x5xf32>, vector<25x5xf32>, vector<25x5xf32>, vector<25x5xf32>, vector<25x5xf32>, vector<25x5xf32>, vector<25x5xf32>, vector<25x5xf32>, vector<25x5xf32> -> vector<25x75xf32>
    %c0_89 = arith.constant 0 : index
    %c0_90 = arith.constant 0 : index
    %72 = vector.load %arg6[%c0_89, %c0_90] : memref<75x7xf32, #tpu.memory_space<vmem>>, vector<75x7xf32>
    %cst_91 = arith.constant dense<0.000000e+00> : vector<25x7xf32>
    %73 = tpu.matmul %71, %72, %cst_91 {dimension_numbers = #tpu.dot_dimension_numbers<[1], [0], [0], [1], [0, 0, 1, 1], [], []>} : vector<25x75xf32>, vector<75x7xf32>, vector<25x7xf32> -> vector<25x7xf32>
    %c0_92 = arith.constant 0 : index
    %c0_93 = arith.constant 0 : index
    %74 = vector.load %arg7[%c0_92, %c0_93] : memref<1x7xf32, #tpu.memory_space<vmem>>, vector<1x7xf32>
    %75 = vector.broadcast %74 : vector<1x7xf32> to vector<25x7xf32>
    %76 = arith.addf %73, %75 : vector<25x7xf32>
    %cst_94 = arith.constant 0.000000e+00 : f32
    %77 = vector.broadcast %cst_94 : f32 to vector<25x7xf32>
    %78 = arith.maximumf %76, %77 : vector<25x7xf32>
    %c0_95 = arith.constant 0 : index
    %c0_96 = arith.constant 0 : index
    %c0_97 = arith.constant 0 : index
    %79 = vector.load %arg8[%c0_95, %c0_96, %c0_97] : memref<2x25x7xf32, #tpu.memory_space<vmem>>, vector<1x25x7xf32>
    %80 = vector.shape_cast %79 : vector<1x25x7xf32> to vector<25x7xf32>
    %81 = arith.mulf %78, %80 : vector<25x7xf32>
    %cst_98 = arith.constant dense<0.000000e+00> : vector<25xf32>
    %82 = vector.multi_reduction <add>, %81, %cst_98 [1] : vector<25x7xf32> to vector<25xf32>
    %83 = vector.shape_cast %82 : vector<25xf32> to vector<25x1xf32>
    %cst_99 = arith.constant dense<0.000000e+00> : vector<1xf32>
    %84 = vector.multi_reduction <add>, %83, %cst_99 [0] : vector<25x1xf32> to vector<1xf32>
    %85 = vector.shape_cast %84 : vector<1xf32> to vector<1x1xf32>
    %c1_100 = arith.constant 1 : index
    %c0_101 = arith.constant 0 : index
    %c0_102 = arith.constant 0 : index
    %86 = vector.load %arg8[%c1_100, %c0_101, %c0_102] : memref<2x25x7xf32, #tpu.memory_space<vmem>>, vector<1x25x7xf32>
    %87 = vector.shape_cast %86 : vector<1x25x7xf32> to vector<25x7xf32>
    %88 = arith.mulf %78, %87 : vector<25x7xf32>
    %cst_103 = arith.constant dense<0.000000e+00> : vector<25xf32>
    %89 = vector.multi_reduction <add>, %88, %cst_103 [1] : vector<25x7xf32> to vector<25xf32>
    %90 = vector.shape_cast %89 : vector<25xf32> to vector<25x1xf32>
    %cst_104 = arith.constant dense<0.000000e+00> : vector<1xf32>
    %91 = vector.multi_reduction <add>, %90, %cst_104 [0] : vector<25x1xf32> to vector<1xf32>
    %92 = vector.shape_cast %91 : vector<1xf32> to vector<1x1xf32>
    %93 = tpu.concatenate %85, %92 in 1 : vector<1x1xf32>, vector<1x1xf32> -> vector<1x2xf32>
    %c0_105 = arith.constant 0 : index
    %c0_106 = arith.constant 0 : index
    %94 = vector.load %arg9[%c0_105, %c0_106] : memref<1x2xf32, #tpu.memory_space<vmem>>, vector<1x2xf32>
    %95 = arith.addf %93, %94 : vector<1x2xf32>
    %cst_107 = arith.constant 0.000000e+00 : f32
    %96 = vector.broadcast %cst_107 : f32 to vector<1x2xf32>
    %97 = arith.subf %96, %95 : vector<1x2xf32>
    %98 = math.exp %97 : vector<1x2xf32>
    %cst_108 = arith.constant 1.000000e+00 : f32
    %99 = vector.broadcast %cst_108 : f32 to vector<1x2xf32>
    %100 = arith.addf %99, %98 : vector<1x2xf32>
    %cst_109 = arith.constant 1.000000e+00 : f32
    %101 = vector.broadcast %cst_109 : f32 to vector<1x2xf32>
    %102 = arith.divf %101, %100 : vector<1x2xf32>
    %c0_110 = arith.constant 0 : index
    %c0_111 = arith.constant 0 : index
    %c0_112 = arith.constant 0 : index
    %103 = vector.load %arg10[%c0_110, %c0_111, %c0_112] : memref<1x1x2xf32, #tpu.memory_space<vmem>>, vector<1x1x2xf32>
    %104 = vector.shape_cast %103 : vector<1x1x2xf32> to vector<1x2xf32>
    %105 = vector.shape_cast %102 : vector<1x2xf32> to vector<1x1x2xf32>
    tpu.vector_store %arg10[%c0_110, %c0_111, %c0_112], %105 {strides = array<i32>} : memref<1x1x2xf32, #tpu.memory_space<vmem>>, vector<1x1x2xf32>,
    return
  }
  func.func @transform_0(%arg0: i32) -> (i32, i32, i32) {
    %c0_i32 = arith.constant 0 : i32
    %c0_i32_0 = arith.constant 0 : i32
    %c0_i32_1 = arith.constant 0 : i32
    return %arg0, %c0_i32, %c0_i32_0 : i32, i32, i32
  }
  func.func @transform_1(%arg0: i32) -> (i32, i32) {
    %c0_i32 = arith.constant 0 : i32
    %c0_i32_0 = arith.constant 0 : i32
    %c0_i32_1 = arith.constant 0 : i32
    return %c0_i32, %c0_i32_0 : i32, i32
  }
  func.func @transform_2(%arg0: i32) -> (i32, i32) {
    %c0_i32 = arith.constant 0 : i32
    %c0_i32_0 = arith.constant 0 : i32
    %c0_i32_1 = arith.constant 0 : i32
    return %c0_i32, %c0_i32_0 : i32, i32
  }
  func.func @transform_3(%arg0: i32) -> (i32, i32) {
    %c0_i32 = arith.constant 0 : i32
    %c0_i32_0 = arith.constant 0 : i32
    %c0_i32_1 = arith.constant 0 : i32
    return %c0_i32, %c0_i32_0 : i32, i32
  }
  func.func @transform_4(%arg0: i32) -> (i32, i32) {
    %c0_i32 = arith.constant 0 : i32
    %c0_i32_0 = arith.constant 0 : i32
    %c0_i32_1 = arith.constant 0 : i32
    return %c0_i32, %c0_i32_0 : i32, i32
  }
  func.func @transform_5(%arg0: i32) -> (i32, i32) {
    %c0_i32 = arith.constant 0 : i32
    %c0_i32_0 = arith.constant 0 : i32
    %c0_i32_1 = arith.constant 0 : i32
    return %c0_i32, %c0_i32_0 : i32, i32
  }
  func.func @transform_6(%arg0: i32) -> (i32, i32) {
    %c0_i32 = arith.constant 0 : i32
    %c0_i32_0 = arith.constant 0 : i32
    %c0_i32_1 = arith.constant 0 : i32
    return %c0_i32, %c0_i32_0 : i32, i32
  }
  func.func @transform_7(%arg0: i32) -> (i32, i32, i32) {
    %c0_i32 = arith.constant 0 : i32
    %c0_i32_0 = arith.constant 0 : i32
    %c0_i32_1 = arith.constant 0 : i32
    %c0_i32_2 = arith.constant 0 : i32
    return %c0_i32, %c0_i32_0, %c0_i32_1 : i32, i32, i32
  }
  func.func @transform_8(%arg0: i32) -> (i32, i32) {
    %c0_i32 = arith.constant 0 : i32
    %c0_i32_0 = arith.constant 0 : i32
    %c0_i32_1 = arith.constant 0 : i32
    return %c0_i32, %c0_i32_0 : i32, i32
  }
  func.func @transform_9(%arg0: i32) -> (i32, i32, i32) {
    %c0_i32 = arith.constant 0 : i32
    %c0_i32_0 = arith.constant 0 : i32
    %c0_i32_1 = arith.constant 0 : i32
    return %arg0, %c0_i32, %c0_i32_0 : i32, i32, i32
  }
}

</mosaic_0001>

<bundles_post_ra>
// kernel: squeeze.1
= control target key start
LH: loop header
LB: loop body
LE: loop exit
PB: predicated region body
PF: predicated region fallthrough
CT: control target
= control target key end

     0   :  { %s55_s20 = smov 3  ;;  %vm60_vm0 = vcmask 1043458   ;;  %s70_s25 = smov 3  ;;  %vm47_vm1 = vcmask 39936   ;;  %vm1582_vm2 = vcmask 1014784   ;;  %vm1612_vm3 = vcmask 1022976   ;;  %s3171_s0 = inlined_call_operand.vmem [shape: f32[2,1080], index: 0, kind: input, shape index: {}]   ;;  %s3172_s1 = inlined_call_operand.vmem [shape: f32[2,216,5], index: 1, kind: output, shape index: {}]  }
   0x1   :  { %v1677_v0 = vld [vmem:[%s3171_s0 + $0x10] sm:$0x3]  ;;  %v1682_v1 = vld [vmem:[%s3171_s0 + $0x6] sm:$0x3]  ;;  %v1681_v2 = vld [vmem:[%s3171_s0 + $0x8] sm:$0x3] }
   0x2   :  { %9 = vst [vmem:[#allocation0 + $0x40] sm:$0x3] %v1677_v0  ;;  %34 = vst [vmem:[#allocation0 + $0x18] sm:$0x3] %v1682_v1  ;;  %v1679_v3 = vld [vmem:[%s3171_s0 + $0xc] sm:$0x3] }
   0x3   :  { %29 = vst [vmem:[#allocation0 + $0x20] sm:$0x3] %v1681_v2  ;;  %v1684_v4 = vld [vmem:[%s3171_s0 + $0x2] sm:$0x3]  ;;  %19 = vst [vmem:[#allocation0 + $0x30] sm:$0x3] %v1679_v3 }
   0x4   :  { %43 = vst [vmem:[#allocation0 + $0x8] sm:$0x3] %v1684_v4  ;;  %v1678_v5 = vld [vmem:[%s3171_s0 + $0xe] sm:$0x3]  ;;  %v1683_v6 = vld [vmem:[%s3171_s0 + $0x4] sm:$0x3] }
   0x5   :  { %14 = vst [vmem:[#allocation0 + $0x38] sm:$0x3] %v1678_v5  ;;  %39 = vst [vmem:[#allocation0 + $0x10] sm:$0x3] %v1683_v6  ;;  %v1680_v7 = vld [vmem:[%s3171_s0 + $0xa] sm:$0x3] }
   0x6   :  { %v44_v8 = vld [vmem:[%s3171_s0] sm:$0x3]  ;;  %s58_s0 = smov 12  ;;  %24 = vst [vmem:[#allocation0 + $0x28] sm:$0x3] %v1680_v7  ;;  %s73_s26 = smov 12 }
   0x7   :  { %45 = vst [vmem:[#allocation0] sm:$0x3] %v44_v8  ;;  %s92_s27 = smov 3  ;;  %s95_s28 = smov 12  ;;  %vm1630_vm4 = vcmask 1031168   ;;  %vm1656_vm5 = vcmask 1039360  }
   0x8   :  { %s119_s29 = smov 3  ;;  %s122_s30 = smov 12  ;;  %vm1586_vm6 = vcmask 31744   ;;  %vm1616_vm7 = vcmask 23552   ;;  %vm1591_vm8 = vcmask 39968   ;;  %vm1621_vm9 = vcmask 39960  }
   0x9   :  { %v56_v9 = vld [vmem:[#allocation0 + $0x19] ss:$-1 sm:%s55_s20]   ;;  %v59_v10 = vld [vmem:[#allocation0 + $0x43] ss:$-1 sm:%s58_s0]   ;;  %s2034_s2 = smov 127   ;;  %s2035_s3 = smov 125  }
   0xa   :  { %v61_v11 = vsel %vm60_vm0, %v59_v10, %v56_v9  ;;  %v85_v12 = vld [vmem:[#allocation0 + $0x20] sm:$0x3]   ;;  %v74_v14 = vld [vmem:[#allocation0 + $0x33] ss:$-1 sm:%s73_s26]   ;;  %s134_s4 = smov 3  ;;  %s137_s5 = smov 12 }
   0xb   :  { %62 = vrot.lane.b32.xlu0 %v61_v11, %s2034_s2  ;;  %86 = vrot.lane.b32.xlu1 %v85_v12, %s2035_s3  ;;  %v71_v13 = vld [vmem:[#allocation0 + $0x9] ss:$-1 sm:%s70_s25]   ;;  %v120_v18 = vld [vmem:[#allocation0 + $0x19] ss:$-1 sm:%s119_s29]   ;;  %s2036_s6 = smov 126   ;;  %s2037_s7 = smov 124  }
   0xc   :  { %v76_v15 = vsel %vm60_vm0, %v74_v14, %v71_v13  ;;  %v93_v16 = vld [vmem:[#allocation0 + $0x11] ss:$-1 sm:%s92_s27]   ;;  %v96_v17 = vld [vmem:[#allocation0 + $0x3b] ss:$-1 sm:%s95_s28]   ;;  %v123_v22 = vld [vmem:[#allocation0 + $0x43] ss:$-1 sm:%s122_s30]  }
   0xd   :  { %v98_v19 = vsel %vm60_vm0, %v96_v17, %v93_v16  ;;  %v108_v21 = vld [vmem:[#allocation0 + $0x26] sm:$0xc]   ;;  %v125_v24 = vsel %vm60_vm0, %v123_v22, %v120_v18  ;;  %s149_s8 = smov 3  ;;  %v138_v26 = vld [vmem:[#allocation0 + $0x33] ss:$-1 sm:%s137_s5]   ;;  %s157_s9 = smov 3 }
   0xe   :  { %v106_v20 = vld [vmem:[#allocation0] sm:$0x3]   ;;  %v135_v25 = vld [vmem:[#allocation0 + $0x9] ss:$-1 sm:%s134_s4]   ;;  %s160_s10 = smov 12  ;;  %s2038_s11 = smov 123  }
   0xf   :  { %77 = vrot.lane.b32.xlu0 %v76_v15, %s2036_s6  ;;  %99 = vrot.lane.b32.xlu1 %v98_v19, %s2037_s7  ;;  %v110_v23 = vsel %vm60_vm0, %v108_v21, %v106_v20  ;;  %s2039_s12 = smov 122   ;;  %v140_v27 = vsel %vm60_vm0, %v138_v26, %v135_v25  ;;  %v150_v28 = vld [vmem:[#allocation0 + $0x21] ss:$-1 sm:%s149_s8]   ;;  %v158_v29 = vld [vmem:[#allocation0 + $0x11] ss:$-1 sm:%s157_s9]   ;;  %s184_s13 = smov 3 }
  0x10   :  { %v161_v30 = vld [vmem:[#allocation0 + $0x3b] ss:$-1 sm:%s160_s10]   ;;  %v171_v31 = vld [vmem:[#allocation0] sm:$0x3]   ;;  %v173_v32 = vld [vmem:[#allocation0 + $0x26] sm:$0xc]  }
  0x11   :  { %s187_s14 = smov 12  ;;  %s199_s15 = smov 3  ;;  %v163_v33 = vsel %vm60_vm0, %v161_v30, %v158_v29  ;;  %v175_v34 = vsel %vm60_vm0, %v173_v32, %v171_v31  ;;  %v185_v35 = vld [vmem:[#allocation0 + $0x19] ss:$-1 sm:%s184_s13]   ;;  %v236_v45 = vld [vmem:[#allocation0] sm:$0x3]  }
  0x12   :  { %s202_s16 = smov 12  ;;  %s2040_s17 = smov 121   ;;  %v188_v36 = vld [vmem:[#allocation0 + $0x43] ss:$-1 sm:%s187_s14]   ;;  %v238_v46 = vld [vmem:[#allocation0 + $0x26] sm:$0xc]  }
  0x13   :  { %111 = vrot.lane.b32.xlu0 %v110_v23, %s2038_s11  ;;  %126 = vrot.lane.b32.xlu1 %v125_v24, %s2039_s12  ;;  %s2041_s18 = smov 120   ;;  %v200_v37 = vld [vmem:[#allocation0 + $0x9] ss:$-1 sm:%s199_s15]   ;;  %v203_v38 = vld [vmem:[#allocation0 + $0x33] ss:$-1 sm:%s202_s16]   ;;  %s222_s19 = smov 3  ;;  %v190_v39 = vsel %vm60_vm0, %v188_v36, %v185_v35  ;;  %v240_v49 = vsel %vm60_vm0, %v238_v46, %v236_v45 }
  0x14   :  { %s225_s20 = smov 12  ;;  %s2042_s21 = smov 119   ;;  %v205_v40 = vsel %vm60_vm0, %v203_v38, %v200_v37  ;;  %v223_v41 = vld [vmem:[#allocation0 + $0x11] ss:$-1 sm:%s222_s19]   ;;  %v301_v53 = vld [vmem:[#allocation0] sm:$0x3]  }
  0x15   :  { %s2043_s22 = smov 118   ;;  %s214_s23 = smov 3  ;;  %v226_v42 = vld [vmem:[#allocation0 + $0x3b] ss:$-1 sm:%s225_s20]   ;;  %v303_v56 = vld [vmem:[#allocation0 + $0x26] sm:$0xc]  }
  0x16   :  { %s249_s24 = smov 3  ;;  %s252_s0 = smov 12  ;;  %v215_v43 = vld [vmem:[#allocation0 + $0x21] ss:$-1 sm:%s214_s23]   ;;  %v228_v44 = vsel %vm60_vm0, %v226_v42, %v223_v41  ;;  %v305_v60 = vsel %vm60_vm0, %v303_v56, %v301_v53  ;;  %v368_v8 = vld [vmem:[#allocation0 + $0x26] sm:$0xc]  }
  0x17   :  { %141 = vrot.lane.b32.xlu0 %v140_v27, %s2040_s17  ;;  %151 = vrot.lane.b32.xlu1 %v150_v28, %s2041_s18  ;;  %s2044_s25 = smov 117   ;;  %s2045_s26 = smov 116   ;;  %v250_v47 = vld [vmem:[#allocation0 + $0x19] ss:$-1 sm:%s249_s24]   ;;  %v253_v48 = vld [vmem:[#allocation0 + $0x43] ss:$-1 sm:%s252_s0]  }
  0x18   :  { %s264_s27 = smov 3  ;;  %s267_s28 = smov 12  ;;  %v255_v50 = vsel %vm60_vm0, %v253_v48, %v250_v47  ;;  %v366_v7 = vld [vmem:[#allocation0] sm:$0x3]   ;;  %v433_v20 = vld [vmem:[#allocation0 + $0x26] sm:$0xc]  }
  0x19   :  { %s2046_s29 = smov 115   ;;  %s2047_s30 = smov 114   ;;  %v265_v51 = vld [vmem:[#allocation0 + $0x9] ss:$-1 sm:%s264_s27]   ;;  %v268_v52 = vld [vmem:[#allocation0 + $0x33] ss:$-1 sm:%s267_s28]   ;;  %v370_v11 = vsel %vm60_vm0, %v368_v8, %v366_v7 }
  0x1a   :  { %s279_s2 = smov 3  ;;  %s287_s3 = smov 3  ;;  %v270_v54 = vsel %vm60_vm0, %v268_v52, %v265_v51  ;;  %v431_v17 = vld [vmem:[#allocation0] sm:$0x3]   ;;  %v459_v23 = vld [vmem:[#allocation0 + $0x8] sm:$0x3]  }
  0x1b   :  { %164 = vrot.lane.b32.xlu0 %v163_v33, %s2042_s21  ;;  %176 = vrot.lane.b32.xlu1 %v175_v34, %s2043_s22  ;;  %s290_s4 = smov 12  ;;  %s2048_s5 = smov 113   ;;  %v280_v55 = vld [vmem:[#allocation0 + $0x21] ss:$-1 sm:%s279_s2]   ;;  %v288_v57 = vld [vmem:[#allocation0 + $0x11] ss:$-1 sm:%s287_s3]   ;;  %v435_v22 = vsel %vm60_vm0, %v433_v20, %v431_v17 }
  0x1c   :  { %s2049_s6 = smov 112   ;;  %v291_v58 = vld [vmem:[#allocation0 + $0x3b] ss:$-1 sm:%s290_s4]   ;;  %s314_s7 = smov 3  ;;  %v461_v26 = vld [vmem:[#allocation0 + $0x2e] sm:$0xc]  }
  0x1d   :  { %s317_s8 = smov 12  ;;  %s329_s9 = smov 3  ;;  %v293_v59 = vsel %vm60_vm0, %v291_v58, %v288_v57  ;;  %v315_v61 = vld [vmem:[#allocation0 + $0x19] ss:$-1 sm:%s314_s7]   ;;  %v463_v28 = vsel %vm60_vm0, %v461_v26, %v459_v23  ;;  %v494_v33 = vld [vmem:[#allocation0] sm:$0x3]  }
  0x1e   :  { %s332_s10 = smov 12  ;;  %s2050_s11 = smov 111   ;;  %v318_v62 = vld [vmem:[#allocation0 + $0x43] ss:$-1 sm:%s317_s8]   ;;  %v496_v34 = vld [vmem:[#allocation0 + $0x26] sm:$0xc]  }
  0x1f   :  { %191 = vrot.lane.b32.xlu0 %v190_v39, %s2044_s25  ;;  %206 = vrot.lane.b32.xlu1 %v205_v40, %s2045_s26  ;;  %s2051_s12 = smov 110   ;;  %v330_v63 = vld [vmem:[#allocation0 + $0x9] ss:$-1 sm:%s329_s9]   ;;  %v333_v0 = vld [vmem:[#allocation0 + $0x33] ss:$-1 sm:%s332_s10]   ;;  %s352_s13 = smov 3  ;;  %v320_v1 = vsel %vm60_vm0, %v318_v62, %v315_v61  ;;  %v498_v37 = vsel %vm60_vm0, %v496_v34, %v494_v33 }
  0x20   :  { %s355_s14 = smov 12  ;;  %s2052_s15 = smov 109   ;;  %v335_v2 = vsel %vm60_vm0, %v333_v0, %v330_v63  ;;  %v353_v3 = vld [vmem:[#allocation0 + $0x11] ss:$-1 sm:%s352_s13]   ;;  %v522_v39 = vld [vmem:[#allocation0 + $0x8] sm:$0x3]  }
  0x21   :  { %s2053_s16 = smov 108   ;;  %s344_s17 = smov 3  ;;  %v356_v4 = vld [vmem:[#allocation0 + $0x3b] ss:$-1 sm:%s355_s14]   ;;  %v524_v40 = vld [vmem:[#allocation0 + $0x2e] sm:$0xc]  }
  0x22   :  { %s379_s18 = smov 3  ;;  %s382_s19 = smov 12  ;;  %v345_v5 = vld [vmem:[#allocation0 + $0x21] ss:$-1 sm:%s344_s17]   ;;  %v358_v6 = vsel %vm60_vm0, %v356_v4, %v353_v3  ;;  %v526_v41 = vsel %vm60_vm0, %v524_v40, %v522_v39  ;;  %v590_v52 = vld [vmem:[#allocation0 + $0x2e] sm:$0xc]  }
  0x23   :  { %216 = vrot.lane.b32.xlu0 %v215_v43, %s2046_s29  ;;  %229 = vrot.lane.b32.xlu1 %v228_v44, %s2047_s30  ;;  %s2054_s20 = smov 107   ;;  %s2055_s21 = smov 106   ;;  %v380_v9 = vld [vmem:[#allocation0 + $0x19] ss:$-1 sm:%s379_s18]   ;;  %v383_v10 = vld [vmem:[#allocation0 + $0x43] ss:$-1 sm:%s382_s19]  }
  0x24   :  { %s394_s22 = smov 3  ;;  %s397_s23 = smov 12  ;;  %v385_v12 = vsel %vm60_vm0, %v383_v10, %v380_v9  ;;  %v781_v26 = vld [vmem:[#allocation0 + $0x2e] sm:$0xc]   ;;  %vm1634_vm10 = vcmask 15360   ;;  %vm1660_vm11 = vcmask 7168  }
  0x25   :  { %s2056_s24 = smov 105   ;;  %s2057_s0 = smov 104   ;;  %v395_v13 = vld [vmem:[#allocation0 + $0x9] ss:$-1 sm:%s394_s22]   ;;  %v398_v14 = vld [vmem:[#allocation0 + $0x33] ss:$-1 sm:%s397_s23]  }
  0x26   :  { %s409_s25 = smov 3  ;;  %s417_s26 = smov 3  ;;  %v400_v15 = vsel %vm60_vm0, %v398_v14, %v395_v13  ;;  %v722_v14 = vld [vmem:[#allocation0 + $0x2e] sm:$0xc]   ;;  %vm1637_vm12 = vcmask 39952   ;;  %vm1665_vm13 = vcmask 39944  }
  0x27   :  { %241 = vrot.lane.b32.xlu0 %v240_v49, %s2048_s5  ;;  %256 = vrot.lane.b32.xlu1 %v255_v50, %s2049_s6  ;;  %s420_s27 = smov 12  ;;  %s2058_s28 = smov 103   ;;  %v410_v16 = vld [vmem:[#allocation0 + $0x21] ss:$-1 sm:%s409_s25]   ;;  %v418_v18 = vld [vmem:[#allocation0 + $0x11] ss:$-1 sm:%s417_s26]  }
  0x28   :  { %s2059_s29 = smov 102   ;;  %v421_v19 = vld [vmem:[#allocation0 + $0x3b] ss:$-1 sm:%s420_s27]   ;;  %s444_s30 = smov 3  ;;  %v588_v49 = vld [vmem:[#allocation0 + $0x8] sm:$0x3]  }
  0x29   :  { %s447_s2 = smov 12  ;;  %s2060_s3 = smov 101   ;;  %v423_v21 = vsel %vm60_vm0, %v421_v19, %v418_v18  ;;  %v445_v24 = vld [vmem:[#allocation0 + $0x19] ss:$-1 sm:%s444_s30]  }
  0x2a   :  { %s2061_s4 = smov 100   ;;  %v448_v25 = vld [vmem:[#allocation0 + $0x43] ss:$-1 sm:%s447_s2]   ;;  %s480_s5 = smov 3 }
  0x2b   :  { %271 = vrot.lane.b32.xlu0 %v270_v54, %s2050_s11  ;;  %281 = vrot.lane.b32.xlu1 %v280_v55, %s2051_s12  ;;  %s483_s6 = smov 12  ;;  %s2062_s7 = smov 99   ;;  %v450_v27 = vsel %vm60_vm0, %v448_v25, %v445_v24  ;;  %v481_v29 = vld [vmem:[#allocation0 + $0x11] ss:$-1 sm:%s480_s5]   ;;  %v592_v54 = vsel %vm60_vm0, %v590_v52, %v588_v49  ;;  %v779_v25 = vld [vmem:[#allocation0 + $0x8] sm:$0x3]  }
  0x2c   :  { %s2063_s8 = smov 98   ;;  %s472_s9 = smov 3  ;;  %v484_v30 = vld [vmem:[#allocation0 + $0x3b] ss:$-1 sm:%s483_s6]  }
  0x2d   :  { %s507_s10 = smov 3  ;;  %s510_s11 = smov 12  ;;  %v473_v31 = vld [vmem:[#allocation0 + $0x21] ss:$-1 sm:%s472_s9]   ;;  %v486_v32 = vsel %vm60_vm0, %v484_v30, %v481_v29 }
  0x2e   :  { %s2064_s12 = smov 97   ;;  %s2065_s13 = smov 96   ;;  %v508_v35 = vld [vmem:[#allocation0 + $0x19] ss:$-1 sm:%s507_s10]   ;;  %v511_v36 = vld [vmem:[#allocation0 + $0x43] ss:$-1 sm:%s510_s11]  }
  0x2f   :  { %294 = vrot.lane.b32.xlu0 %v293_v59, %s2052_s15  ;;  %306 = vrot.lane.b32.xlu1 %v305_v60, %s2053_s16  ;;  %s2066_s14 = smov 95   ;;  %s2067_s15 = smov 94   ;;  %v513_v38 = vsel %vm60_vm0, %v511_v36, %v508_v35 }
  0x30   :  { %s535_s16 = smov 3  ;;  %s543_s17 = smov 3 }
  0x31   :  { %s546_s18 = smov 12  ;;  %s558_s19 = smov 3  ;;  %v536_v42 = vld [vmem:[#allocation0 + $0x21] ss:$-1 sm:%s535_s16]   ;;  %v544_v43 = vld [vmem:[#allocation0 + $0x11] ss:$-1 sm:%s543_s17]  }
  0x32   :  { %s2069_s22 = smov 92   ;;  %v547_v44 = vld [vmem:[#allocation0 + $0x3b] ss:$-1 sm:%s546_s18]   ;;  %s573_s23 = smov 3 }
  0x33   :  { %321 = vrot.lane.b32.xlu0 %v320_v1, %s2054_s20  ;;  %336 = vrot.lane.b32.xlu1 %v335_v2, %s2055_s21  ;;  %s561_s20 = smov 12  ;;  %s2068_s21 = smov 93   ;;  %v559_v45 = vld [vmem:[#allocation0 + $0x1] ss:$-1 sm:%s558_s19]   ;;  %v549_v47 = vsel %vm60_vm0, %v547_v44, %v544_v43  ;;  %v574_v50 = vld [vmem:[#allocation0 + $0x19] ss:$-1 sm:%s573_s23]  }
  0x34   :  { %v562_v46 = vld [vmem:[#allocation0 + $0x2b] ss:$-1 sm:%s561_s20]   ;;  %s2071_s25 = smov 90   ;;  %s609_s26 = smov 3  ;;  %v656_v2 = vld [vmem:[#allocation0 + $0x2e] sm:$0xc]  }
  0x35   :  { %v564_v48 = vsel %vm60_vm0, %v562_v46, %v559_v45  ;;  %s612_s27 = smov 12  ;;  %s601_s30 = smov 3  ;;  %v610_v55 = vld [vmem:[#allocation0 + $0x11] ss:$-1 sm:%s609_s26]   ;;  %v654_v1 = vld [vmem:[#allocation0 + $0x8] sm:$0x3]  }
  0x36   :  { %v613_v56 = vld [vmem:[#allocation0 + $0x3b] ss:$-1 sm:%s612_s27]   ;;  %s624_s2 = smov 3  ;;  %s642_s5 = smov 12  ;;  %v658_v3 = vsel %vm60_vm0, %v656_v2, %v654_v1  ;;  %v859_v43 = vld [vmem:[#allocation0 + $0x10] sm:$0x3]  }
  0x37   :  { %346 = vrot.lane.b32.xlu0 %v345_v5, %s2056_s24  ;;  %359 = vrot.lane.b32.xlu1 %v358_v6, %s2057_s0  ;;  %s576_s24 = smov 12  ;;  %s2070_s0 = smov 91   ;;  %v602_v57 = vld [vmem:[#allocation0 + $0x21] ss:$-1 sm:%s601_s30]   ;;  %v615_v58 = vsel %vm60_vm0, %v613_v56, %v610_v55  ;;  %v861_v44 = vld [vmem:[#allocation0 + $0x36] sm:$0xc]  }
  0x38   :  { %v577_v51 = vld [vmem:[#allocation0 + $0x43] ss:$-1 sm:%s576_s24]   ;;  %s2074_s6 = smov 87   ;;  %s2077_s9 = smov 84   ;;  %v863_v46 = vsel %vm60_vm0, %v861_v44, %v859_v43  ;;  %v895_v55 = vld [vmem:[#allocation0 + $0x8] sm:$0x3]  }
  0x39   :  { %v579_v53 = vsel %vm60_vm0, %v577_v51, %v574_v50  ;;  %v625_v59 = vld [vmem:[#allocation0 + $0x1] ss:$-1 sm:%s624_s2]   ;;  %s667_s10 = smov 3  ;;  %s675_s11 = smov 3  ;;  %v897_v56 = vld [vmem:[#allocation0 + $0x2e] sm:$0xc]  }
  0x3a   :  { %v643_v62 = vld [vmem:[#allocation0 + $0x43] ss:$-1 sm:%s642_s5]   ;;  %s2079_s16 = smov 82   ;;  %v676_v5 = vld [vmem:[#allocation0 + $0x11] ss:$-1 sm:%s675_s11]   ;;  %s705_s17 = smov 3 }
  0x3b   :  { %371 = vrot.lane.b32.xlu0 %v370_v11, %s2058_s28  ;;  %386 = vrot.lane.b32.xlu1 %v385_v12, %s2059_s29  ;;  %s2072_s28 = smov 89   ;;  %s2073_s29 = smov 88   ;;  %v668_v4 = vld [vmem:[#allocation0 + $0x21] ss:$-1 sm:%s667_s10]   ;;  %v720_v11 = vld [vmem:[#allocation0 + $0x8] sm:$0x3]  }
  0x3c   :  { %s708_s18 = smov 12  ;;  %s2080_s19 = smov 81   ;;  %v706_v12 = vld [vmem:[#allocation0 + $0x19] ss:$-1 sm:%s705_s17]   ;;  %v1093_v43 = vld [vmem:[#allocation0 + $0x10] sm:$0x3]  }
  0x3d   :  { %s2081_s20 = smov 80   ;;  %v709_v13 = vld [vmem:[#allocation0 + $0x43] ss:$-1 sm:%s708_s18]   ;;  %s2082_s23 = smov 79   ;;  %v1095_v44 = vld [vmem:[#allocation0 + $0x36] sm:$0xc]  }
  0x3e   :  { %s2083_s24 = smov 78   ;;  %s759_s26 = smov 12 }
  0x3f   :  { %401 = vrot.lane.b32.xlu0 %v400_v15, %s2060_s3  ;;  %411 = vrot.lane.b32.xlu1 %v410_v16, %s2061_s4  ;;  %s627_s3 = smov 12  ;;  %s639_s4 = smov 3  ;;  %v711_v15 = vsel %vm60_vm0, %v709_v13, %v706_v12  ;;  %v724_v16 = vsel %vm60_vm0, %v722_v14, %v720_v11  ;;  %v975_v11 = vld [vmem:[#allocation0 + $0x10] sm:$0x3]   ;;  %v977_v12 = vld [vmem:[#allocation0 + $0x36] sm:$0xc]  }
  0x40   :  { %v628_v60 = vld [vmem:[#allocation0 + $0x2b] ss:$-1 sm:%s627_s3]   ;;  %v640_v61 = vld [vmem:[#allocation0 + $0x19] ss:$-1 sm:%s639_s4]   ;;  %s2084_s27 = smov 77   ;;  %s2086_s30 = smov 75   ;;  %v979_v14 = vsel %vm60_vm0, %v977_v12, %v975_v11 }
  0x41   :  { %v630_v63 = vsel %vm60_vm0, %v628_v60, %v625_v59  ;;  %v645_v0 = vsel %vm60_vm0, %v643_v62, %v640_v61  ;;  %s2087_s2 = smov 74   ;;  %s792_s3 = smov 3  ;;  %v916_v59 = vld [vmem:[#allocation0 + $0x10] sm:$0x3]   ;;  %v918_v62 = vld [vmem:[#allocation0 + $0x36] sm:$0xc]  }
  0x42   :  { %s800_s4 = smov 3  ;;  %s803_s5 = smov 12  ;;  %v920_v1 = vsel %vm60_vm0, %v918_v62, %v916_v59  ;;  %v1152_v59 = vld [vmem:[#allocation0 + $0x10] sm:$0x3]   ;;  %v1154_v62 = vld [vmem:[#allocation0 + $0x36] sm:$0xc]  }
  0x43   :  { %424 = vrot.lane.b32.xlu0 %v423_v21, %s2062_s7  ;;  %436 = vrot.lane.b32.xlu1 %v435_v22, %s2063_s8  ;;  %s2075_s7 = smov 86   ;;  %s2076_s8 = smov 85   ;;  %v760_v22 = vld [vmem:[#allocation0 + $0x2b] ss:$-1 sm:%s759_s26]   ;;  %v804_v30 = vld [vmem:[#allocation0 + $0x3b] ss:$-1 sm:%s803_s5]  }
  0x44   :  { %v801_v29 = vld [vmem:[#allocation0 + $0x11] ss:$-1 sm:%s800_s4]   ;;  %s2090_s10 = smov 71   ;;  %s2091_s11 = smov 70   ;;  %v1213_v12 = vld [vmem:[#allocation0 + $0x36] sm:$0xc]  }
  0x45   :  { %v806_v33 = vsel %vm60_vm0, %v804_v30, %v801_v29  ;;  %s887_s4 = smov 3  ;;  %s955_s5 = smov 12  ;;  %v1036_v30 = vld [vmem:[#allocation0 + $0x36] sm:$0xc]   ;;  %v1211_v11 = vld [vmem:[#allocation0 + $0x10] sm:$0x3]  }
  0x46   :  { %v888_v52 = vld [vmem:[#allocation0 + $0x19] ss:$-1 sm:%s887_s4]   ;;  %s952_s4 = smov 3  ;;  %s2102_s17 = smov 59  }
  0x47   :  { %451 = vrot.lane.b32.xlu0 %v450_v27, %s2064_s12  ;;  %464 = vrot.lane.b32.xlu1 %v463_v28, %s2065_s13  ;;  %s678_s12 = smov 12  ;;  %s690_s13 = smov 3  ;;  %v783_v27 = vsel %vm60_vm0, %v781_v26, %v779_v25  ;;  %v793_v28 = vld [vmem:[#allocation0 + $0x21] ss:$-1 sm:%s792_s3]  }
  0x48   :  { %v679_v6 = vld [vmem:[#allocation0 + $0x3b] ss:$-1 sm:%s678_s12]   ;;  %s830_s12 = smov 3  ;;  %s2095_s3 = smov 66  }
  0x49   :  { %v691_v7 = vld [vmem:[#allocation0 + $0x1] ss:$-1 sm:%s690_s13]   ;;  %v681_v9 = vsel %vm60_vm0, %v679_v6, %v676_v5  ;;  %v831_v39 = vld [vmem:[#allocation0 + $0x19] ss:$-1 sm:%s830_s12]   ;;  %s2096_s13 = smov 65   ;;  %s2103_s18 = smov 58  }
  0x4a   :  { %v953_v5 = vld [vmem:[#allocation0 + $0x9] ss:$-1 sm:%s952_s4]   ;;  %v956_v6 = vld [vmem:[#allocation0 + $0x33] ss:$-1 sm:%s955_s5]   ;;  %s991_s26 = smov 12  ;;  %s2107_s12 = smov 54  }
  0x4b   :  { %474 = vrot.lane.b32.xlu0 %v473_v31, %s2066_s14  ;;  %487 = vrot.lane.b32.xlu1 %v486_v32, %s2067_s15  ;;  %s693_s14 = smov 12  ;;  %s2078_s15 = smov 83  }
  0x4c   :  { %v694_v8 = vld [vmem:[#allocation0 + $0x2b] ss:$-1 sm:%s693_s14]   ;;  %s2097_s14 = smov 64   ;;  %s2110_s4 = smov 51  }
  0x4d   :  { %v696_v10 = vsel %vm60_vm0, %v694_v8, %v691_v7  ;;  %v958_v8 = vsel %vm60_vm0, %v956_v6, %v953_v5  ;;  %s2111_s5 = smov 50  }
  0x4f   :  { %499 = vrot.lane.b32.xlu0 %v498_v37, %s2068_s21  ;;  %514 = vrot.lane.b32.xlu1 %v513_v38, %s2069_s22  ;;  %s741_s21 = smov 3  ;;  %s744_s22 = smov 12  ;;  %v838_v37 = vld [vmem:[#allocation0 + $0x8] sm:$0x3]   ;;  %v840_v38 = vld [vmem:[#allocation0 + $0x2e] sm:$0xc]  }
  0x50   :  { %v742_v17 = vld [vmem:[#allocation0 + $0x11] ss:$-1 sm:%s741_s21]   ;;  %v745_v18 = vld [vmem:[#allocation0 + $0x3b] ss:$-1 sm:%s744_s22]   ;;  %v842_v40 = vsel %vm60_vm0, %v840_v38, %v838_v37  ;;  %s851_s21 = smov 3  ;;  %s929_s22 = smov 3 }
  0x51   :  { %v747_v20 = vsel %vm60_vm0, %v745_v18, %v742_v17  ;;  %v852_v45 = vld [vmem:[#allocation0 + $0x21] ss:$-1 sm:%s851_s21]   ;;  %v992_v18 = vld [vmem:[#allocation0 + $0x2b] ss:$-1 sm:%s991_s26]   ;;  %s1050_s21 = smov 12  ;;  %s2115_s26 = smov 46  }
  0x53   :  { %527 = vrot.lane.b32.xlu0 %v526_v41, %s2070_s0  ;;  %537 = vrot.lane.b32.xlu1 %v536_v42, %s2071_s25  ;;  %s733_s0 = smov 3  ;;  %s756_s25 = smov 3 }
  0x54   :  { %v734_v19 = vld [vmem:[#allocation0 + $0x21] ss:$-1 sm:%s733_s0]   ;;  %s2099_s0 = smov 62  }
  0x55   :  { %v757_v21 = vld [vmem:[#allocation0 + $0x1] ss:$-1 sm:%s756_s25]   ;;  %s988_s25 = smov 3 }
  0x56   :  { %v762_v23 = vsel %vm60_vm0, %v760_v22, %v757_v21  ;;  %v989_v17 = vld [vmem:[#allocation0 + $0x1] ss:$-1 sm:%s988_s25]   ;;  %s2114_s25 = smov 47  }
  0x57   :  { %550 = vrot.lane.b32.xlu0 %v549_v47, %s2072_s28  ;;  %565 = vrot.lane.b32.xlu1 %v564_v48, %s2073_s29  ;;  %s2085_s28 = smov 76   ;;  %s771_s29 = smov 3 }
  0x58   :  { %v772_v24 = vld [vmem:[#allocation0 + $0x19] ss:$-1 sm:%s771_s29]   ;;  %s872_s29 = smov 3 }
  0x59   :  { %v873_v49 = vld [vmem:[#allocation0 + $0x1] ss:$-1 sm:%s872_s29]   ;;  %s1003_s29 = smov 3 }
  0x5b   :  { %580 = vrot.lane.b32.xlu0 %v579_v53, %s2074_s6  ;;  %593 = vrot.lane.b32.xlu1 %v592_v54, %s2075_s7  ;;  %s815_s6 = smov 3  ;;  %s818_s7 = smov 12 }
  0x5c   :  { %v816_v31 = vld [vmem:[#allocation0 + $0x1] ss:$-1 sm:%s815_s6]   ;;  %v819_v32 = vld [vmem:[#allocation0 + $0x2b] ss:$-1 sm:%s818_s7]   ;;  %s2100_s6 = smov 61   ;;  %s2101_s7 = smov 60  }
  0x5d   :  { %v821_v34 = vsel %vm60_vm0, %v819_v32, %v816_v31  ;;  %v1051_v32 = vld [vmem:[#allocation0 + $0x2b] ss:$-1 sm:%s1050_s21]   ;;  %s2119_s21 = smov 42  }
  0x5f   :  { %603 = vrot.lane.b32.xlu0 %v602_v57, %s2076_s8  ;;  %616 = vrot.lane.b32.xlu1 %v615_v58, %s2077_s9  ;;  %s2088_s8 = smov 73   ;;  %s2089_s9 = smov 72   ;;  %v899_v57 = vsel %vm60_vm0, %v897_v56, %v895_v55 }
  0x63   :  { %631 = vrot.lane.b32.xlu0 %v630_v63, %s2078_s15  ;;  %646 = vrot.lane.b32.xlu1 %v645_v0, %s2079_s16  ;;  %s908_s15 = smov 3  ;;  %v930_v63 = vld [vmem:[#allocation0 + $0x1] ss:$-1 sm:%s929_s22]   ;;  %s2108_s22 = smov 53  }
  0x64   :  { %v909_v58 = vld [vmem:[#allocation0 + $0x21] ss:$-1 sm:%s908_s15]   ;;  %s2112_s15 = smov 49   ;;  %s2113_s16 = smov 48  }
  0x67   :  { %659 = vrot.lane.b32.xlu0 %v658_v3, %s2080_s19  ;;  %669 = vrot.lane.b32.xlu1 %v668_v4, %s2081_s20  ;;  %s2092_s19 = smov 69   ;;  %s2093_s20 = smov 68  }
  0x6b   :  { %682 = vrot.lane.b32.xlu0 %v681_v9, %s2082_s23  ;;  %697 = vrot.lane.b32.xlu1 %v696_v10, %s2083_s24  ;;  %s932_s23 = smov 12  ;;  %s2098_s24 = smov 63  }
  0x6c   :  { %v933_v0 = vld [vmem:[#allocation0 + $0x2b] ss:$-1 sm:%s932_s23]   ;;  %s2109_s23 = smov 52  }
  0x6d   :  { %v935_v2 = vsel %vm60_vm0, %v933_v0, %v930_v63 }
  0x6f   :  { %712 = vrot.lane.b32.xlu0 %v711_v15, %s2084_s27  ;;  %725 = vrot.lane.b32.xlu1 %v724_v16, %s2085_s28  ;;  %s2104_s27 = smov 57   ;;  %s2105_s28 = smov 56  }
  0x73   :  { %735 = vrot.lane.b32.xlu0 %v734_v19, %s2086_s30  ;;  %748 = vrot.lane.b32.xlu1 %v747_v20, %s2087_s2  ;;  %s875_s30 = smov 12  ;;  %s2094_s2 = smov 67   ;;  %v994_v19 = vsel %vm60_vm0, %v992_v18, %v989_v17  ;;  %v1004_v20 = vld [vmem:[#allocation0 + $0x19] ss:$-1 sm:%s1003_s29]  }
  0x74   :  { %v876_v50 = vld [vmem:[#allocation0 + $0x2b] ss:$-1 sm:%s875_s30]   ;;  %s1188_s29 = smov 3  ;;  %s1191_s30 = smov 12 }
  0x75   :  { %v878_v51 = vsel %vm60_vm0, %v876_v50, %v873_v49  ;;  %v1189_v5 = vld [vmem:[#allocation0 + $0x9] ss:$-1 sm:%s1188_s29]   ;;  %v1192_v6 = vld [vmem:[#allocation0 + $0x33] ss:$-1 sm:%s1191_s30]   ;;  %s1570_s29 = smov 12  ;;  %s1575_s30 = smov 3 }
  0x77   :  { %763 = vrot.lane.b32.xlu0 %v762_v23, %s2088_s8  ;;  %773 = vrot.lane.b32.xlu1 %v772_v24, %s2089_s9  ;;  %s944_s8 = smov 3  ;;  %s1011_s9 = smov 3 }
  0x78   :  { %v945_v7 = vld [vmem:[#allocation0 + $0x19] ss:$-1 sm:%s944_s8]   ;;  %v1012_v23 = vld [vmem:[#allocation0 + $0x9] ss:$-1 sm:%s1011_s9]   ;;  %s1132_s8 = smov 12  ;;  %s2116_s9 = smov 45  }
  0x79   :  { %v1133_v56 = vld [vmem:[#allocation0 + $0x33] ss:$-1 sm:%s1132_s8]   ;;  %s2131_s8 = smov 30  }
  0x7b   :  { %784 = vrot.lane.b32.xlu0 %v783_v27, %s2090_s10  ;;  %794 = vrot.lane.b32.xlu1 %v793_v28, %s2091_s11  ;;  %s1014_s10 = smov 12  ;;  %s2106_s11 = smov 55   ;;  %v1034_v27 = vld [vmem:[#allocation0 + $0x10] sm:$0x3]  }
  0x7c   :  { %v1015_v24 = vld [vmem:[#allocation0 + $0x33] ss:$-1 sm:%s1014_s10]   ;;  %s2117_s10 = smov 44  }
  0x7d   :  { %v63_v35 = vpop.permute.xlu0 %62   ;;  %v87_v36 = vpop.permute.xlu1 %86   ;;  %v1017_v25 = vsel %vm60_vm0, %v1015_v24, %v1012_v23  ;;  %v1571_v24 = vld [vmem:[#allocation0 + $0x3b] ss:$-1 sm:%s1570_s29]   ;;  %s2135_s29 = smov 1  }
  0x7e   :  { %1686 = vst.msk [vmem:[%s3172_s1 + $0x125] ss:$-216 sm:$0x3] %vm47_vm1, %v63_v35   ;;  %1687 = vst.msk [vmem:[%s3172_s1 + $0x355] ss:$-216 sm:$0xc] %vm47_vm1, %v63_v35  }
  0x7f   :  { %1690 = vst.msk [vmem:[%s3172_s1 + $0x67] ss:$216 sm:$0x3] %vm47_vm1, %v87_v36   ;;  %807 = vrot.lane.b32.xlu0 %v806_v33, %s2092_s19  ;;  %822 = vrot.lane.b32.xlu1 %v821_v34, %s2093_s20  ;;  %s967_s19 = smov 3  ;;  %s1047_s20 = smov 3  ;;  %v1038_v33 = vsel %vm60_vm0, %v1036_v30, %v1034_v27 }
  0x80   :  { %v968_v13 = vld [vmem:[#allocation0 + $0x21] ss:$-1 sm:%s967_s19]   ;;  %s1168_s19 = smov 12 }
  0x81   :  { %v78_v41 = vpop.permute.xlu0 %77   ;;  %v100_v42 = vpop.permute.xlu1 %99   ;;  %v1048_v31 = vld [vmem:[#allocation0 + $0x1] ss:$-1 sm:%s1047_s20]   ;;  %s2118_s20 = smov 43   ;;  %v1169_v0 = vld [vmem:[#allocation0 + $0x2b] ss:$-1 sm:%s1168_s19]   ;;  %s2132_s19 = smov 4  }
  0x82   :  { %1688 = vst.msk [vmem:[%s3172_s1 + $0xf2] ss:$-216 sm:$0x3] %vm47_vm1, %v78_v41   ;;  %1689 = vst.msk [vmem:[%s3172_s1 + $0x322] ss:$-216 sm:$0xc] %vm47_vm1, %v78_v41   ;;  %v1053_v34 = vsel %vm60_vm0, %v1051_v32, %v1048_v31 }
  0x83   :  { %1691 = vst.msk [vmem:[%s3172_s1 + $0x10c] ss:$-216 sm:$0x3] %vm47_vm1, %v100_v42   ;;  %1692 = vst.msk [vmem:[%s3172_s1 + $0x33c] ss:$-216 sm:$0xc] %vm47_vm1, %v100_v42   ;;  %832 = vrot.lane.b32.xlu0 %v831_v39, %s2094_s2  ;;  %843 = vrot.lane.b32.xlu1 %v842_v40, %s2095_s3 }
  0x84   :  { %s1070_s2 = smov 3  ;;  %s1073_s3 = smov 12 }
  0x85   :  { %v112_v47 = vpop.permute.xlu0 %111   ;;  %v127_v48 = vpop.permute.xlu1 %126   ;;  %v1071_v37 = vld [vmem:[#allocation0 + $0x9] ss:$-1 sm:%s1070_s2]   ;;  %v1074_v38 = vld [vmem:[#allocation0 + $0x33] ss:$-1 sm:%s1073_s3]   ;;  %s2120_s2 = smov 41   ;;  %s2121_s3 = smov 40  }
  0x86   :  { %1693 = vst.msk [vmem:[%s3172_s1 + $0x1] ss:$216 sm:$0x3] %vm47_vm1, %v112_v47   ;;  %1694 = vst.msk [vmem:[%s3172_s1 - $0x12f] ss:$216 sm:$0xc] %vm47_vm1, %v112_v47   ;;  %v1076_v40 = vsel %vm60_vm0, %v1074_v38, %v1071_v37 }
  0x87   :  { %1695 = vst.msk [vmem:[%s3172_s1 + $0x126] ss:$-216 sm:$0x3] %vm47_vm1, %v127_v48   ;;  %1696 = vst.msk [vmem:[%s3172_s1 + $0x356] ss:$-216 sm:$0xc] %vm47_vm1, %v127_v48   ;;  %853 = vrot.lane.b32.xlu0 %v852_v45, %s2096_s13  ;;  %864 = vrot.lane.b32.xlu1 %v863_v46, %s2097_s14  ;;  %v1097_v46 = vsel %vm60_vm0, %v1095_v44, %v1093_v43 }
  0x88   :  { %s1026_s13 = smov 3  ;;  %s2123_s14 = smov 38  }
  0x89   :  { %v142_v53 = vpop.permute.xlu0 %141   ;;  %v152_v54 = vpop.permute.xlu1 %151   ;;  %v1027_v26 = vld [vmem:[#allocation0 + $0x21] ss:$-1 sm:%s1026_s13]   ;;  %s2122_s13 = smov 39  }
  0x8a   :  { %1697 = vst.msk [vmem:[%s3172_s1 + $0xf3] ss:$-216 sm:$0x3] %vm47_vm1, %v142_v53   ;;  %1698 = vst.msk [vmem:[%s3172_s1 + $0x323] ss:$-216 sm:$0xc] %vm47_vm1, %v142_v53  }
  0x8b   :  { %1699 = vst.msk [vmem:[%s3172_s1 + $0x140] ss:$-216 sm:$0x3] %vm47_vm1, %v152_v54   ;;  %879 = vrot.lane.b32.xlu0 %v878_v51, %s2098_s24  ;;  %889 = vrot.lane.b32.xlu1 %v888_v52, %s2099_s0  ;;  %s1106_s24 = smov 3  ;;  %s1109_s0 = smov 12 }
  0x8c   :  { %v1107_v49 = vld [vmem:[#allocation0 + $0x1] ss:$-1 sm:%s1106_s24]   ;;  %v1110_v50 = vld [vmem:[#allocation0 + $0x2b] ss:$-1 sm:%s1109_s0]   ;;  %s1246_s24 = smov 3  ;;  %s2124_s0 = smov 37  }
  0x8d   :  { %v165_v60 = vpop.permute.xlu0 %164   ;;  %v177_v61 = vpop.permute.xlu1 %176   ;;  %v1112_v51 = vsel %vm60_vm0, %v1110_v50, %v1107_v49  ;;  %v1627_v49 = vld [vmem:[#allocation0 + $0x18] sm:$0x3]   ;;  %v1629_v50 = vld [vmem:[#allocation0 + $0x20] sm:$0x3]  }
  0x8e   :  { %1700 = vst.msk [vmem:[%s3172_s1 + $0x10d] ss:$-216 sm:$0x3] %vm47_vm1, %v165_v60   ;;  %1701 = vst.msk [vmem:[%s3172_s1 + $0x33d] ss:$-216 sm:$0xc] %vm47_vm1, %v165_v60  }
  0x8f   :  { %1702 = vst.msk [vmem:[%s3172_s1 + $0x2] ss:$216 sm:$0x3] %vm47_vm1, %v177_v61   ;;  %1703 = vst.msk [vmem:[%s3172_s1 - $0x12e] ss:$216 sm:$0xc] %vm47_vm1, %v177_v61   ;;  %900 = vrot.lane.b32.xlu0 %v899_v57, %s2100_s6  ;;  %910 = vrot.lane.b32.xlu1 %v909_v58, %s2101_s7 }
  0x90   :  { %s1062_s6 = smov 3  ;;  %s1129_s7 = smov 3 }
  0x91   :  { %v192_v3 = vpop.permute.xlu0 %191   ;;  %v207_v4 = vpop.permute.xlu1 %206   ;;  %v1063_v39 = vld [vmem:[#allocation0 + $0x19] ss:$-1 sm:%s1062_s6]   ;;  %v1130_v55 = vld [vmem:[#allocation0 + $0x9] ss:$-1 sm:%s1129_s7]   ;;  %s2130_s7 = smov 31   ;;  %s1379_s6 = smov 3 }
  0x92   :  { %1704 = vst.msk [vmem:[%s3172_s1 + $0x127] ss:$-216 sm:$0x3] %vm47_vm1, %v192_v3   ;;  %1705 = vst.msk [vmem:[%s3172_s1 + $0x357] ss:$-216 sm:$0xc] %vm47_vm1, %v192_v3   ;;  %v1135_v57 = vsel %vm60_vm0, %v1133_v56, %v1130_v55 }
  0x93   :  { %1706 = vst.msk [vmem:[%s3172_s1 + $0xf4] ss:$-216 sm:$0x3] %vm47_vm1, %v207_v4   ;;  %1707 = vst.msk [vmem:[%s3172_s1 + $0x324] ss:$-216 sm:$0xc] %vm47_vm1, %v207_v4   ;;  %921 = vrot.lane.b32.xlu0 %v920_v1, %s2102_s17  ;;  %936 = vrot.lane.b32.xlu1 %v935_v2, %s2103_s18  ;;  %v1156_v1 = vsel %vm60_vm0, %v1154_v62, %v1152_v59 }
  0x94   :  { %s1085_s17 = smov 3  ;;  %s1165_s18 = smov 3  ;;  %v1269_v55 = vld [vmem:[#allocation0 + $0x10] sm:$0x3]  }
  0x95   :  { %v217_v9 = vpop.permute.xlu0 %216   ;;  %v230_v10 = vpop.permute.xlu1 %229   ;;  %v1086_v45 = vld [vmem:[#allocation0 + $0x21] ss:$-1 sm:%s1085_s17]   ;;  %s1227_s17 = smov 12 }
  0x96   :  { %1708 = vst.msk [vmem:[%s3172_s1 + $0x141] ss:$-216 sm:$0x3] %vm47_vm1, %v217_v9   ;;  %1709 = vst.msk [vmem:[%s3172_s1 + $0x10e] ss:$-216 sm:$0x3] %vm47_vm1, %v230_v10  }
  0x97   :  { %1710 = vst.msk [vmem:[%s3172_s1 + $0x33e] ss:$-216 sm:$0xc] %vm47_vm1, %v230_v10   ;;  %946 = vrot.lane.b32.xlu0 %v945_v7, %s2104_s27  ;;  %959 = vrot.lane.b32.xlu1 %v958_v8, %s2105_s28  ;;  %s1121_s27 = smov 3  ;;  %v1166_v63 = vld [vmem:[#allocation0 + $0x1] ss:$-1 sm:%s1165_s18]   ;;  %v1194_v8 = vsel %vm60_vm0, %v1192_v6, %v1189_v5 }
  0x98   :  { %v1122_v52 = vld [vmem:[#allocation0 + $0x19] ss:$-1 sm:%s1121_s27]   ;;  %v1171_v2 = vsel %vm60_vm0, %v1169_v0, %v1166_v63  ;;  %s2508_s27 = smov 3  ;;  %s1567_s28 = smov 3  ;;  %v1228_v18 = vld [vmem:[#allocation0 + $0x2b] ss:$-1 sm:%s1227_s17]  }
  0x99   :  { %v242_v15 = vpop.permute.xlu0 %241   ;;  %v257_v16 = vpop.permute.xlu1 %256   ;;  %v1568_v23 = vld [vmem:[#allocation0 + $0x11] ss:$-1 sm:%s1567_s28]   ;;  %s1652_s28 = smov 12  ;;  %s1282_s17 = smov 3 }
  0x9a   :  { %1711 = vst.msk [vmem:[%s3172_s1 + $0x3] ss:$216 sm:$0x3] %vm47_vm1, %v242_v15   ;;  %1712 = vst.msk [vmem:[%s3172_s1 - $0x12d] ss:$216 sm:$0xc] %vm47_vm1, %v242_v15   ;;  %v1573_v37 = vsel %vm60_vm0, %v1571_v24, %v1568_v23 }
  0x9b   :  { %1713 = vst.msk [vmem:[%s3172_s1 + $0x128] ss:$-216 sm:$0x3] %vm47_vm1, %v257_v16   ;;  %1714 = vst.msk [vmem:[%s3172_s1 + $0x358] ss:$-216 sm:$0xc] %vm47_vm1, %v257_v16   ;;  %969 = vrot.lane.b32.xlu0 %v968_v13, %s2106_s11  ;;  %980 = vrot.lane.b32.xlu1 %v979_v14, %s2107_s12  ;;  %v1215_v14 = vsel %vm60_vm0, %v1213_v12, %v1211_v11 }
  0x9c   :  { %s1144_s11 = smov 3  ;;  %s1600_s12 = smov 12  ;;  %v1653_v44 = vld [vmem:[#allocation0 + $0x3b] ss:$-1 sm:%s1652_s28]  }
  0x9d   :  { %v272_v21 = vpop.permute.xlu0 %271   ;;  %v282_v22 = vpop.permute.xlu1 %281   ;;  %v1145_v58 = vld [vmem:[#allocation0 + $0x21] ss:$-1 sm:%s1144_s11]   ;;  %s1597_s11 = smov 3  ;;  %v1601_v30 = vld [vmem:[#allocation0 + $0x2b] ss:$-1 sm:%s1600_s12]   ;;  %s1285_s18 = smov 12 }
  0x9e   :  { %1715 = vst.msk [vmem:[%s3172_s1 + $0xf5] ss:$-216 sm:$0x3] %vm47_vm1, %v272_v21   ;;  %1716 = vst.msk [vmem:[%s3172_s1 + $0x325] ss:$-216 sm:$0xc] %vm47_vm1, %v272_v21  }
  0x9f   :  { %1717 = vst.msk [vmem:[%s3172_s1 + $0x142] ss:$-216 sm:$0x3] %vm47_vm1, %v282_v22   ;;  %995 = vrot.lane.b32.xlu0 %v994_v19, %s2108_s22  ;;  %1005 = vrot.lane.b32.xlu1 %v1004_v20, %s2109_s23  ;;  %v1239_v19 = vld [vmem:[#allocation0 + $0x18] sm:$0x3]   ;;  %s1641_s23 = smov 3 }
  0xa0   :  { %v1247_v20 = vld [vmem:[#allocation0 + $0x9] ss:$-1 sm:%s1246_s24]   ;;  %s1644_s24 = smov 12  ;;  %v1283_v59 = vld [vmem:[#allocation0 + $0x1] ss:$-1 sm:%s1282_s17]   ;;  %s1307_s28 = smov 12 }
  0xa1   :  { %v295_v28 = vpop.permute.xlu0 %294   ;;  %v307_v29 = vpop.permute.xlu1 %306   ;;  %s2137_s12 = smov 28   ;;  %s2138_s22 = smov 27  }
  0xa2   :  { %1718 = vst.msk [vmem:[%s3172_s1 + $0x10f] ss:$-216 sm:$0x3] %vm47_vm1, %v295_v28   ;;  %1719 = vst.msk [vmem:[%s3172_s1 + $0x33f] ss:$-216 sm:$0xc] %vm47_vm1, %v295_v28  }
  0xa3   :  { %1720 = vst.msk [vmem:[%s3172_s1 + $0x4] ss:$216 sm:$0x3] %vm47_vm1, %v307_v29   ;;  %1721 = vst.msk [vmem:[%s3172_s1 - $0x12c] ss:$216 sm:$0xc] %vm47_vm1, %v307_v29   ;;  %1018 = vrot.lane.b32.xlu0 %v1017_v25, %s2110_s4  ;;  %1028 = vrot.lane.b32.xlu1 %v1027_v26, %s2111_s5 }
  0xa4   :  { %s1180_s4 = smov 3  ;;  %v1576_v25 = vld [vmem:[#allocation0 + $0x19] ss:$-1 sm:%s1575_s30]   ;;  %v1598_v29 = vld [vmem:[#allocation0 + $0x1] ss:$-1 sm:%s1597_s11]   ;;  %s2136_s11 = smov 29  }
  0xa5   :  { %v322_v35 = vpop.permute.xlu0 %321   ;;  %v337_v36 = vpop.permute.xlu1 %336   ;;  %v1181_v7 = vld [vmem:[#allocation0 + $0x19] ss:$-1 sm:%s1180_s4]   ;;  %s2140_s4 = smov 25   ;;  %s2141_s5 = smov 24  }
  0xa6   :  { %1722 = vst.msk [vmem:[%s3172_s1 + $0x129] ss:$-216 sm:$0x3] %vm47_vm1, %v322_v35   ;;  %1723 = vst.msk [vmem:[%s3172_s1 + $0x359] ss:$-216 sm:$0xc] %vm47_vm1, %v322_v35  }
  0xa7   :  { %1724 = vst.msk [vmem:[%s3172_s1 + $0xf6] ss:$-216 sm:$0x3] %vm47_vm1, %v337_v36   ;;  %1725 = vst.msk [vmem:[%s3172_s1 + $0x326] ss:$-216 sm:$0xc] %vm47_vm1, %v337_v36   ;;  %1039 = vrot.lane.b32.xlu0 %v1038_v33, %s2112_s15  ;;  %1054 = vrot.lane.b32.xlu1 %v1053_v34, %s2113_s16 }
  0xa8   :  { %s1203_s15 = smov 3  ;;  %s1224_s16 = smov 3  ;;  %v1262_v34 = vld [vmem:[#allocation0 + $0x21] ss:$-1 sm:%s2508_s27]  }
  0xa9   :  { %v347_v41 = vpop.permute.xlu0 %346   ;;  %v360_v42 = vpop.permute.xlu1 %359   ;;  %v1204_v13 = vld [vmem:[#allocation0 + $0x21] ss:$-1 sm:%s1203_s15]   ;;  %s1605_s15 = smov 3  ;;  %s2134_s27 = smov 2  }
  0xaa   :  { %1726 = vst.msk [vmem:[%s3172_s1 + $0x143] ss:$-216 sm:$0x3] %vm47_vm1, %v347_v41   ;;  %1727 = vst.msk [vmem:[%s3172_s1 + $0x110] ss:$-216 sm:$0x3] %vm47_vm1, %v360_v42  }
  0xab   :  { %1728 = vst.msk [vmem:[%s3172_s1 + $0x340] ss:$-216 sm:$0xc] %vm47_vm1, %v360_v42   ;;  %1064 = vrot.lane.b32.xlu0 %v1063_v39, %s2114_s25  ;;  %1077 = vrot.lane.b32.xlu1 %v1076_v40, %s2115_s26  ;;  %s2125_s25 = smov 36   ;;  %s1249_s26 = smov 12  ;;  %v1603_v39 = vsel %vm60_vm0, %v1601_v30, %v1598_v29 }
  0xac   :  { %v1225_v17 = vld [vmem:[#allocation0 + $0x1] ss:$-1 sm:%s1224_s16]   ;;  %v1250_v21 = vld [vmem:[#allocation0 + $0x33] ss:$-1 sm:%s1249_s26]   ;;  %s1608_s16 = smov 12  ;;  %s1649_s26 = smov 3 }
  0xad   :  { %v372_v47 = vpop.permute.xlu0 %371   ;;  %v387_v48 = vpop.permute.xlu1 %386   ;;  %v1230_v22 = vsel %vm60_vm0, %v1228_v18, %v1225_v17  ;;  %v1606_v31 = vld [vmem:[#allocation0 + $0x9] ss:$-1 sm:%s1605_s15]   ;;  %v1609_v32 = vld [vmem:[#allocation0 + $0x33] ss:$-1 sm:%s1608_s16]   ;;  %v1252_v33 = vsel %vm60_vm0, %v1250_v21, %v1247_v20  ;;  %s1402_s17 = smov 3  ;;  %s1487_s30 = smov 12 }
  0xae   :  { %1729 = vst.msk [vmem:[%s3172_s1 + $0x5] ss:$216 sm:$0x3] %vm47_vm1, %v372_v47   ;;  %1730 = vst.msk [vmem:[%s3172_s1 - $0x12b] ss:$216 sm:$0xc] %vm47_vm1, %v372_v47   ;;  %v1611_v40 = vsel %vm60_vm0, %v1609_v32, %v1606_v31 }
  0xaf   :  { %1731 = vst.msk [vmem:[%s3172_s1 + $0x12a] ss:$-216 sm:$0x3] %vm47_vm1, %v387_v48   ;;  %1732 = vst.msk [vmem:[%s3172_s1 + $0x35a] ss:$-216 sm:$0xc] %vm47_vm1, %v387_v48   ;;  %1087 = vrot.lane.b32.xlu0 %v1086_v45, %s2116_s9  ;;  %1098 = vrot.lane.b32.xlu1 %v1097_v46, %s2117_s10  ;;  %v1613_v46 = vsel %vm1612_vm3, %v1611_v40, %v1603_v39 }
  0xb0   :  { %v1642_v41 = vld [vmem:[#allocation0 + $0x9] ss:$-1 sm:%s1641_s23]   ;;  %v1645_v42 = vld [vmem:[#allocation0 + $0x33] ss:$-1 sm:%s1644_s24]   ;;  %s1327_s9 = smov 3  ;;  %s1330_s10 = smov 12 }
  0xb1   :  { %v402_v53 = vpop.permute.xlu0 %401   ;;  %v412_v54 = vpop.permute.xlu1 %411   ;;  %v1650_v43 = vld [vmem:[#allocation0 + $0x11] ss:$-1 sm:%s1649_s26]   ;;  %s1304_s26 = smov 3  ;;  %s2139_s23 = smov 26  }
  0xb2   :  { %1733 = vst.msk [vmem:[%s3172_s1 + $0xf7] ss:$-216 sm:$0x3] %vm47_vm1, %v402_v53   ;;  %1734 = vst.msk [vmem:[%s3172_s1 + $0x327] ss:$-216 sm:$0xc] %vm47_vm1, %v402_v53   ;;  %v1631_v53 = vsel %vm1630_vm4, %v1629_v50, %v1627_v49 }
  0xb3   :  { %1735 = vst.msk [vmem:[%s3172_s1 + $0x144] ss:$-216 sm:$0x3] %vm47_vm1, %v412_v54   ;;  %1113 = vrot.lane.b32.xlu0 %v1112_v51, %s2118_s20  ;;  %1123 = vrot.lane.b32.xlu1 %v1122_v52, %s2119_s21  ;;  %v1647_v51 = vsel %vm60_vm0, %v1645_v42, %v1642_v41  ;;  %v1655_v52 = vsel %vm60_vm0, %v1653_v44, %v1650_v43  ;;  %s2133_s20 = smov 3   ;;  %s1345_s21 = smov 12 }
  0xb4   :  { %v1657_v54 = vsel %vm1656_vm5, %v1655_v52, %v1647_v51  ;;  %v1488_v52 = vld [vmem:[#allocation0 + $0x33] ss:$-1 sm:%s1487_s30]   ;;  %s2152_s15 = smov 13   ;;  %s2153_s16 = smov 12  }
  0xb5   :  { %v425_v60 = vpop.permute.xlu0 %424   ;;  %v437_v61 = vpop.permute.xlu1 %436   ;;  %s1547_s24 = smov 12 }
  0xb6   :  { %1736 = vst.msk [vmem:[%s3172_s1 + $0x111] ss:$-216 sm:$0x3] %vm47_vm1, %v425_v60   ;;  %1737 = vst.msk [vmem:[%s3172_s1 + $0x341] ss:$-216 sm:$0xc] %vm47_vm1, %v425_v60  }
  0xb7   :  { %1738 = vst.msk [vmem:[%s3172_s1 + $0x6] ss:$216 sm:$0x3] %vm47_vm1, %v437_v61   ;;  %1739 = vst.msk [vmem:[%s3172_s1 - $0x12a] ss:$216 sm:$0xc] %vm47_vm1, %v437_v61   ;;  %1136 = vrot.lane.b32.xlu0 %v1135_v57, %s2120_s2  ;;  %1146 = vrot.lane.b32.xlu1 %v1145_v58, %s2121_s3 }
  0xb8   :  { %s1578_s2 = smov 12  ;;  %v1271_v58 = vld [vmem:[#allocation0 + $0x36] sm:$0xc]   ;;  %v1286_v60 = vld [vmem:[#allocation0 + $0x2b] ss:$-1 sm:%s1285_s18]   ;;  %s1367_s3 = smov 12 }
  0xb9   :  { %v452_v3 = vpop.permute.xlu0 %451   ;;  %v465_v4 = vpop.permute.xlu1 %464   ;;  %v1579_v28 = vld [vmem:[#allocation0 + $0x43] ss:$-1 sm:%s1578_s2]   ;;  %v1273_v61 = vsel %vm60_vm0, %v1271_v58, %v1269_v55  ;;  %v1288_v62 = vsel %vm60_vm0, %v1286_v60, %v1283_v59  ;;  %s1364_s2 = smov 3  ;;  %v1368_v20 = vld [vmem:[#allocation0 + $0x33] ss:$-1 sm:%s1367_s3]   ;;  %s1405_s18 = smov 12 }
  0xba   :  { %1740 = vst.msk [vmem:[%s3172_s1 + $0x12b] ss:$-216 sm:$0x3] %vm47_vm1, %v452_v3   ;;  %1741 = vst.msk [vmem:[%s3172_s1 + $0x35b] ss:$-216 sm:$0xc] %vm47_vm1, %v452_v3   ;;  %v1581_v38 = vsel %vm60_vm0, %v1579_v28, %v1576_v25 }
  0xbb   :  { %1742 = vst.msk [vmem:[%s3172_s1 + $0x20] ss:$216 sm:$0x3] %vm47_vm1, %v465_v4   ;;  %1743 = vst.msk [vmem:[%s3172_s1 - $0x110] ss:$216 sm:$0xc] %vm47_vm1, %v465_v4   ;;  %1157 = vrot.lane.b32.xlu0 %v1156_v1, %s2122_s13  ;;  %1172 = vrot.lane.b32.xlu1 %v1171_v2, %s2123_s14  ;;  %v1583_v45 = vsel %vm1582_vm2, %v1581_v38, %v1573_v37 }
  0xbc   :  { %s2126_s13 = smov 35   ;;  %s2127_s14 = smov 34   ;;  %v1305_v1 = vld [vmem:[#allocation0 + $0x9] ss:$-1 sm:%s1304_s26]   ;;  %v1308_v2 = vld [vmem:[#allocation0 + $0x33] ss:$-1 sm:%s1307_s28]  }
  0xbd   :  { %v475_v9 = vpop.permute.xlu0 %474   ;;  %v488_v10 = vpop.permute.xlu1 %487   ;;  %v1297_v3 = vld [vmem:[#allocation0 + $0x18] sm:$0x3]   ;;  %v1310_v4 = vsel %vm60_vm0, %v1308_v2, %v1305_v1  ;;  %v1406_v28 = vld [vmem:[#allocation0 + $0x2b] ss:$-1 sm:%s1405_s18]   ;;  %s1424_s26 = smov 3  ;;  %s1427_s28 = smov 12 }
  0xbe   :  { %1744 = vst.msk [vmem:[%s3172_s1 + $0x145] ss:$-216 sm:$0x3] %vm47_vm1, %v475_v9   ;;  %1745 = vst.msk [vmem:[%s3172_s1 + $0x112] ss:$-216 sm:$0x3] %vm47_vm1, %v488_v10  }
  0xbf   :  { %1746 = vst.msk [vmem:[%s3172_s1 + $0x342] ss:$-216 sm:$0xc] %vm47_vm1, %v488_v10   ;;  %1182 = vrot.lane.b32.xlu0 %v1181_v7, %s2124_s0  ;;  %1195 = vrot.lane.b32.xlu1 %v1194_v8, %s2125_s25  ;;  %s2128_s0 = smov 33   ;;  %s2129_s25 = smov 32  }
  0xc0   :  { %v1328_v7 = vld [vmem:[#allocation0 + $0x11] ss:$-1 sm:%s1327_s9]   ;;  %v1331_v8 = vld [vmem:[#allocation0 + $0x3b] ss:$-1 sm:%s1330_s10]   ;;  %s2146_s9 = smov 19   ;;  %s2147_s10 = smov 18  }
  0xc1   :  { %v500_v15 = vpop.permute.xlu0 %499   ;;  %v515_v16 = vpop.permute.xlu1 %514   ;;  %v1333_v10 = vsel %vm60_vm0, %v1331_v8, %v1328_v7  ;;  %s1462_s18 = smov 3  ;;  %s2151_s3 = smov 14  }
  0xc2   :  { %1747 = vst.msk [vmem:[%s3172_s1 + $0x7] ss:$216 sm:$0x3] %vm47_vm1, %v500_v15   ;;  %1748 = vst.msk [vmem:[%s3172_s1 - $0x129] ss:$216 sm:$0xc] %vm47_vm1, %v500_v15  }
  0xc3   :  { %1749 = vst.msk [vmem:[%s3172_s1 + $0x12c] ss:$-216 sm:$0x3] %vm47_vm1, %v515_v16   ;;  %1750 = vst.msk [vmem:[%s3172_s1 + $0x35c] ss:$-216 sm:$0xc] %vm47_vm1, %v515_v16   ;;  %1205 = vrot.lane.b32.xlu0 %v1204_v13, %s2126_s13  ;;  %1216 = vrot.lane.b32.xlu1 %v1215_v14, %s2127_s14 }
  0xc4   :  { %s1319_s13 = smov 3  ;;  %v1346_v14 = vld [vmem:[#allocation0 + $0x2b] ss:$-1 sm:%s1345_s21]   ;;  %v1357_v16 = vld [vmem:[#allocation0 + $0x18] sm:$0x3]   ;;  %s2149_s21 = smov 16  }
  0xc5   :  { %v528_v26 = vpop.permute.xlu0 %527   ;;  %v538_v27 = vpop.permute.xlu1 %537   ;;  %v1320_v9 = vld [vmem:[#allocation0 + $0x21] ss:$-1 sm:%s1319_s13]   ;;  %s1525_s14 = smov 12 }
  0xc6   :  { %1751 = vst.msk [vmem:[%s3172_s1 + $0x21] ss:$216 sm:$0x3] %vm47_vm1, %v528_v26   ;;  %1752 = vst.msk [vmem:[%s3172_s1 - $0x10f] ss:$216 sm:$0xc] %vm47_vm1, %v528_v26  }
  0xc7   :  { %1753 = vst.msk [vmem:[%s3172_s1 + $0x146] ss:$-216 sm:$0x3] %vm47_vm1, %v538_v27   ;;  %1231 = vrot.lane.b32.xlu0 %v1230_v22, %s2128_s0  ;;  %1240 = vrot.lane.b32.xlu1 %v1239_v19, %s2129_s25  ;;  %v1365_v19 = vld [vmem:[#allocation0 + $0x9] ss:$-1 sm:%s1364_s2]   ;;  %s2150_s2 = smov 15  }
  0xc8   :  { %v1370_v21 = vsel %vm60_vm0, %v1368_v20, %v1365_v19  ;;  %v1380_v22 = vld [vmem:[#allocation0 + $0x21] ss:$-1 sm:%s1379_s6]   ;;  %s1510_s6 = smov 12  ;;  %v1526_v60 = vld [vmem:[#allocation0 + $0x2b] ss:$-1 sm:%s1525_s14]   ;;  %s2160_s25 = smov 5  }
  0xc9   :  { %v551_v35 = vpop.permute.xlu0 %550   ;;  %v566_v36 = vpop.permute.xlu1 %565   ;;  %v1403_v27 = vld [vmem:[#allocation0 + $0x1] ss:$-1 sm:%s1402_s17]   ;;  %s2159_s17 = smov 6  }
  0xca   :  { %1754 = vst.msk [vmem:[%s3172_s1 + $0x113] ss:$-216 sm:$0x3] %vm47_vm1, %v551_v35   ;;  %1755 = vst.msk [vmem:[%s3172_s1 + $0x343] ss:$-216 sm:$0xc] %vm47_vm1, %v551_v35   ;;  %v1408_v30 = vsel %vm60_vm0, %v1406_v28, %v1403_v27 }
  0xcb   :  { %1756 = vst.msk [vmem:[%s3172_s1 + $0xe0] ss:$-216 sm:$0x3] %vm47_vm1, %v566_v36   ;;  %1757 = vst.msk [vmem:[%s3172_s1 + $0x310] ss:$-216 sm:$0xc] %vm47_vm1, %v566_v36   ;;  %1253 = vrot.lane.b32.xlu0 %v1252_v33, %s2130_s7  ;;  %1263 = vrot.lane.b32.xlu1 %v1262_v34, %s2131_s8 }
  0xcc   :  { %s1387_s7 = smov 3  ;;  %s1390_s8 = smov 12  ;;  %v1425_v33 = vld [vmem:[#allocation0 + $0x9] ss:$-1 sm:%s1424_s26]   ;;  %v1428_v34 = vld [vmem:[#allocation0 + $0x33] ss:$-1 sm:%s1427_s28]  }
  0xcd   :  { %v581_v47 = vpop.permute.xlu0 %580   ;;  %v594_v48 = vpop.permute.xlu1 %593   ;;  %v1388_v23 = vld [vmem:[#allocation0 + $0x11] ss:$-1 sm:%s1387_s7]   ;;  %v1391_v26 = vld [vmem:[#allocation0 + $0x3b] ss:$-1 sm:%s1390_s8]   ;;  %s1447_s7 = smov 3  ;;  %s1450_s8 = smov 12  ;;  %v1430_v36 = vsel %vm60_vm0, %v1428_v34, %v1425_v33 }
  0xce   :  { %1758 = vst.msk [vmem:[%s3172_s1 + $0x12d] ss:$-216 sm:$0x3] %vm47_vm1, %v581_v47   ;;  %1759 = vst.msk [vmem:[%s3172_s1 + $0x35d] ss:$-216 sm:$0xc] %vm47_vm1, %v581_v47   ;;  %v1393_v29 = vsel %vm60_vm0, %v1391_v26, %v1388_v23 }
  0xcf   :  { %1760 = vst.msk [vmem:[%s3172_s1 + $0x22] ss:$216 sm:$0x3] %vm47_vm1, %v594_v48   ;;  %1761 = vst.msk [vmem:[%s3172_s1 - $0x10e] ss:$216 sm:$0xc] %vm47_vm1, %v594_v48   ;;  %1584 = vrot.lane.b32.xlu0 %v1583_v45, %s2132_s19  ;;  %1614 = vrot.lane.b32.xlu1 %v1613_v46, %s2133_s20 }
  0xd0   :  { %s1342_s20 = smov 3  ;;  %s2142_s19 = smov 23   ;;  %v1417_v35 = vld [vmem:[#allocation0 + $0x18] sm:$0x3]   ;;  %v1448_v39 = vld [vmem:[#allocation0 + $0x11] ss:$-1 sm:%s1447_s7]  }
  0xd1   :  { %v604_v56 = vpop.permute.xlu0 %603   ;;  %v617_v57 = vpop.permute.xlu1 %616   ;;  %v1343_v13 = vld [vmem:[#allocation0 + $0x1] ss:$-1 sm:%s1342_s20]   ;;  %s2143_s20 = smov 22   ;;  %v1477_v48 = vld [vmem:[#allocation0 + $0x18] sm:$0x3]   ;;  %s1522_s7 = smov 3 }
  0xd2   :  { %1762 = vst.msk [vmem:[%s3172_s1 + $0x147] ss:$-216 sm:$0x3] %vm47_vm1, %v604_v56   ;;  %1763 = vst.msk [vmem:[%s3172_s1 + $0x114] ss:$-216 sm:$0x3] %vm47_vm1, %v617_v57   ;;  %v1348_v15 = vsel %vm60_vm0, %v1346_v14, %v1343_v13 }
  0xd3   :  { %1764 = vst.msk [vmem:[%s3172_s1 + $0x344] ss:$-216 sm:$0xc] %vm47_vm1, %v617_v57   ;;  %1632 = vrot.lane.b32.xlu0 %v1631_v53, %s2134_s27  ;;  %1658 = vrot.lane.b32.xlu1 %v1657_v54, %s2135_s29  ;;  %s2144_s27 = smov 21   ;;  %s2145_s29 = smov 20  }
  0xd4   :  { %v1451_v40 = vld [vmem:[#allocation0 + $0x3b] ss:$-1 sm:%s1450_s8]   ;;  %s2157_s8 = smov 8  }
  0xd5   :  { %v632_v63 = vpop.permute.xlu0 %631   ;;  %v647_v0 = vpop.permute.xlu1 %646   ;;  %v1453_v42 = vsel %vm60_vm0, %v1451_v40, %v1448_v39  ;;  %v1463_v45 = vld [vmem:[#allocation0 + $0x1] ss:$-1 sm:%s1462_s18]  }
  0xd6   :  { %1765 = vst.msk [vmem:[%s3172_s1 + $0xe1] ss:$-216 sm:$0x3] %vm47_vm1, %v632_v63   ;;  %1766 = vst.msk [vmem:[%s3172_s1 + $0x311] ss:$-216 sm:$0xc] %vm47_vm1, %v632_v63  }
  0xd7   :  { %1767 = vst.msk [vmem:[%s3172_s1 + $0x12e] ss:$-216 sm:$0x3] %vm47_vm1, %v647_v0   ;;  %1768 = vst.msk [vmem:[%s3172_s1 + $0x35e] ss:$-216 sm:$0xc] %vm47_vm1, %v647_v0   ;;  %1274 = vrot.lane.b32.xlu0 %v1273_v61, %s2136_s11  ;;  %1289 = vrot.lane.b32.xlu1 %v1288_v62, %s2137_s12 }
  0xd8   :  { %s1439_s11 = smov 3  ;;  %v1511_v56 = vld [vmem:[#allocation0 + $0x3b] ss:$-1 sm:%s1510_s6]   ;;  %v46_v61 = vld [vmem:[#allocation0] sm:$0x3]  }
  0xd9   :  { %v660_v5 = vpop.permute.xlu0 %659   ;;  %v670_v6 = vpop.permute.xlu1 %669   ;;  %v1440_v41 = vld [vmem:[#allocation0 + $0x21] ss:$-1 sm:%s1439_s11]   ;;  %v50_v62 = vld [vmem:[#allocation0 + $0x28] sm:$0x3]  }
  0xda   :  { %1769 = vst.msk [vmem:[%s3172_s1 + $0x23] ss:$216 sm:$0x3] %vm47_vm1, %v660_v5   ;;  %1770 = vst.msk [vmem:[%s3172_s1 - $0x10d] ss:$216 sm:$0xc] %vm47_vm1, %v660_v5  }
  0xdb   :  { %1771 = vst.msk [vmem:[%s3172_s1 + $0x148] ss:$-216 sm:$0x3] %vm47_vm1, %v670_v6   ;;  %1298 = vrot.lane.b32.xlu0 %v1297_v3, %s2138_s22  ;;  %1311 = vrot.lane.b32.xlu1 %v1310_v4, %s2139_s23  ;;  %v1523_v57 = vld [vmem:[#allocation0 + $0x1] ss:$-1 sm:%s1522_s7]   ;;  %s1544_s23 = smov 3 }
  0xdc   :  { %48 = vst.msk [vmem:[%s3172_s1] ss:$216 sm:$0x3] %vm47_vm1, %v46_v61   ;;  %1685 = vst.msk [vmem:[%s3172_s1 + $0x80] ss:$216 sm:$0x3] %vm47_vm1, %v50_v62   ;;  %v1528_v0 = vsel %vm60_vm0, %v1526_v60, %v1523_v57 }
  0xdd   :  { %v683_v11 = vpop.permute.xlu0 %682   ;;  %v698_v12 = vpop.permute.xlu1 %697   ;;  %v1545_v3 = vld [vmem:[#allocation0 + $0x9] ss:$-1 sm:%s1544_s23]   ;;  %v1548_v4 = vld [vmem:[#allocation0 + $0x33] ss:$-1 sm:%s1547_s24]   ;;  %s2156_s7 = smov 9  }
  0xde   :  { %1772 = vst.msk [vmem:[%s3172_s1 + $0x115] ss:$-216 sm:$0x3] %vm47_vm1, %v683_v11   ;;  %1773 = vst.msk [vmem:[%s3172_s1 + $0x345] ss:$-216 sm:$0xc] %vm47_vm1, %v683_v11   ;;  %v1550_v6 = vsel %vm60_vm0, %v1548_v4, %v1545_v3 }
  0xdf   :  { %1774 = vst.msk [vmem:[%s3172_s1 + $0xe2] ss:$-216 sm:$0x3] %vm47_vm1, %v698_v12   ;;  %1775 = vst.msk [vmem:[%s3172_s1 + $0x312] ss:$-216 sm:$0xc] %vm47_vm1, %v698_v12   ;;  %1321 = vrot.lane.b32.xlu0 %v1320_v9, %s2140_s4  ;;  %1334 = vrot.lane.b32.xlu1 %v1333_v10, %s2141_s5 }
  0xe0   :  { %s1499_s4 = smov 3  ;;  %s1507_s5 = smov 3  ;;  %v1537_v5 = vld [vmem:[#allocation0 + $0x18] sm:$0x3]  }
  0xe1   :  { %v713_v17 = vpop.permute.xlu0 %712   ;;  %v726_v18 = vpop.permute.xlu1 %725   ;;  %v1500_v53 = vld [vmem:[#allocation0 + $0x21] ss:$-1 sm:%s1499_s4]   ;;  %v1508_v55 = vld [vmem:[#allocation0 + $0x11] ss:$-1 sm:%s1507_s5]  }
  0xe2   :  { %1776 = vst.msk [vmem:[%s3172_s1 + $0x12f] ss:$-216 sm:$0x3] %vm47_vm1, %v713_v17   ;;  %1777 = vst.msk [vmem:[%s3172_s1 + $0x35f] ss:$-216 sm:$0xc] %vm47_vm1, %v713_v17   ;;  %v1513_v63 = vsel %vm60_vm0, %v1511_v56, %v1508_v55 }
  0xe3   :  { %1778 = vst.msk [vmem:[%s3172_s1 + $0x24] ss:$216 sm:$0x3] %vm47_vm1, %v726_v18   ;;  %1779 = vst.msk [vmem:[%s3172_s1 - $0x10c] ss:$216 sm:$0xc] %vm47_vm1, %v726_v18   ;;  %1349 = vrot.lane.b32.xlu0 %v1348_v15, %s2142_s19  ;;  %1358 = vrot.lane.b32.xlu1 %v1357_v16, %s2143_s20 }
  0xe4   :  { %s1465_s19 = smov 12  ;;  %s2148_s20 = smov 17  }
  0xe5   :  { %v736_v24 = vpop.permute.xlu0 %735   ;;  %v749_v25 = vpop.permute.xlu1 %748   ;;  %v1466_v46 = vld [vmem:[#allocation0 + $0x2b] ss:$-1 sm:%s1465_s19]  }
  0xe6   :  { %1780 = vst.msk [vmem:[%s3172_s1 + $0x149] ss:$-216 sm:$0x3] %vm47_vm1, %v736_v24   ;;  %1781 = vst.msk [vmem:[%s3172_s1 + $0x116] ss:$-216 sm:$0x3] %vm47_vm1, %v749_v25   ;;  %v1468_v47 = vsel %vm60_vm0, %v1466_v46, %v1463_v45 }
  0xe7   :  { %1782 = vst.msk [vmem:[%s3172_s1 + $0x346] ss:$-216 sm:$0xc] %vm47_vm1, %v749_v25   ;;  %1371 = vrot.lane.b32.xlu0 %v1370_v21, %s2144_s27  ;;  %1381 = vrot.lane.b32.xlu1 %v1380_v22, %s2145_s29  ;;  %s1484_s29 = smov 3  ;;  %s2154_s27 = smov 11  }
  0xe8   :  { %v1485_v51 = vld [vmem:[#allocation0 + $0x9] ss:$-1 sm:%s1484_s29]   ;;  %s2155_s29 = smov 10  }
  0xe9   :  { %v764_v31 = vpop.permute.xlu0 %763   ;;  %v774_v32 = vpop.permute.xlu1 %773   ;;  %v1490_v54 = vsel %vm60_vm0, %v1488_v52, %v1485_v51 }
  0xea   :  { %1783 = vst.msk [vmem:[%s3172_s1 + $0xe3] ss:$-216 sm:$0x3] %vm47_vm1, %v764_v31   ;;  %1784 = vst.msk [vmem:[%s3172_s1 + $0x313] ss:$-216 sm:$0xc] %vm47_vm1, %v764_v31  }
  0xeb   :  { %1785 = vst.msk [vmem:[%s3172_s1 + $0x130] ss:$-216 sm:$0x3] %vm47_vm1, %v774_v32   ;;  %1394 = vrot.lane.b32.xlu0 %v1393_v29, %s2146_s9  ;;  %1409 = vrot.lane.b32.xlu1 %v1408_v30, %s2147_s10  ;;  %s1559_s9 = smov 3 }
  0xec   :  { %v1560_v9 = vld [vmem:[#allocation0 + $0x21] ss:$-1 sm:%s1559_s9]  }
  0xed   :  { %v785_v37 = vpop.permute.xlu0 %784   ;;  %v795_v38 = vpop.permute.xlu1 %794  }
  0xee   :  { %1786 = vst.msk [vmem:[%s3172_s1 + $0x25] ss:$216 sm:$0x3] %vm47_vm1, %v785_v37   ;;  %1787 = vst.msk [vmem:[%s3172_s1 - $0x10b] ss:$216 sm:$0xc] %vm47_vm1, %v785_v37  }
  0xef   :  { %1788 = vst.msk [vmem:[%s3172_s1 + $0x14a] ss:$-216 sm:$0x3] %vm47_vm1, %v795_v38   ;;  %1418 = vrot.lane.b32.xlu0 %v1417_v35, %s2148_s20  ;;  %1431 = vrot.lane.b32.xlu1 %v1430_v36, %s2149_s21 }
  0xf1   :  { %v808_v43 = vpop.permute.xlu0 %807   ;;  %v823_v44 = vpop.permute.xlu1 %822  }
  0xf2   :  { %1789 = vst.msk [vmem:[%s3172_s1 + $0x117] ss:$-216 sm:$0x3] %vm47_vm1, %v808_v43   ;;  %1790 = vst.msk [vmem:[%s3172_s1 + $0x347] ss:$-216 sm:$0xc] %vm47_vm1, %v808_v43  }
  0xf3   :  { %1791 = vst.msk [vmem:[%s3172_s1 + $0xe4] ss:$-216 sm:$0x3] %vm47_vm1, %v823_v44   ;;  %1792 = vst.msk [vmem:[%s3172_s1 + $0x314] ss:$-216 sm:$0xc] %vm47_vm1, %v823_v44   ;;  %1441 = vrot.lane.b32.xlu0 %v1440_v41, %s2150_s2  ;;  %1454 = vrot.lane.b32.xlu1 %v1453_v42, %s2151_s3 }
  0xf5   :  { %v833_v49 = vpop.permute.xlu0 %832   ;;  %v844_v50 = vpop.permute.xlu1 %843  }
  0xf6   :  { %1793 = vst.msk [vmem:[%s3172_s1 + $0x131] ss:$-216 sm:$0x3] %vm47_vm1, %v833_v49   ;;  %1794 = vst.msk [vmem:[%s3172_s1 + $0x26] ss:$216 sm:$0x3] %vm47_vm1, %v844_v50  }
  0xf7   :  { %1795 = vst.msk [vmem:[%s3172_s1 - $0x10a] ss:$216 sm:$0xc] %vm47_vm1, %v844_v50   ;;  %1469 = vrot.lane.b32.xlu0 %v1468_v47, %s2152_s15  ;;  %1478 = vrot.lane.b32.xlu1 %v1477_v48, %s2153_s16  ;;  %s2158_s16 = smov 7  }
  0xf9   :  { %v854_v58 = vpop.permute.xlu0 %853   ;;  %v865_v59 = vpop.permute.xlu1 %864  }
  0xfa   :  { %1796 = vst.msk [vmem:[%s3172_s1 + $0x14b] ss:$-216 sm:$0x3] %vm47_vm1, %v854_v58   ;;  %1797 = vst.msk [vmem:[%s3172_s1 + $0x40] ss:$216 sm:$0x3] %vm47_vm1, %v865_v59  }
  0xfb   :  { %1798 = vst.msk [vmem:[%s3172_s1 - $0xf0] ss:$216 sm:$0xc] %vm47_vm1, %v865_v59   ;;  %1491 = vrot.lane.b32.xlu0 %v1490_v54, %s2154_s27  ;;  %1501 = vrot.lane.b32.xlu1 %v1500_v53, %s2155_s29 }
  0xfd   :  { %v880_v1 = vpop.permute.xlu0 %879   ;;  %v890_v2 = vpop.permute.xlu1 %889  }
  0xfe   :  { %1799 = vst.msk [vmem:[%s3172_s1 + $0xe5] ss:$-216 sm:$0x3] %vm47_vm1, %v880_v1   ;;  %1800 = vst.msk [vmem:[%s3172_s1 + $0x315] ss:$-216 sm:$0xc] %vm47_vm1, %v880_v1  }
  0xff   :  { %1801 = vst.msk [vmem:[%s3172_s1 + $0x132] ss:$-216 sm:$0x3] %vm47_vm1, %v890_v2   ;;  %1514 = vrot.lane.b32.xlu0 %v1513_v63, %s2156_s7  ;;  %1529 = vrot.lane.b32.xlu1 %v1528_v0, %s2157_s8 }
 0x101   :  { %v901_v7 = vpop.permute.xlu0 %900   ;;  %v911_v8 = vpop.permute.xlu1 %910  }
 0x102   :  { %1802 = vst.msk [vmem:[%s3172_s1 + $0x27] ss:$216 sm:$0x3] %vm47_vm1, %v901_v7   ;;  %1803 = vst.msk [vmem:[%s3172_s1 - $0x109] ss:$216 sm:$0xc] %vm47_vm1, %v901_v7  }
 0x103   :  { %1804 = vst.msk [vmem:[%s3172_s1 + $0x14c] ss:$-216 sm:$0x3] %vm47_vm1, %v911_v8   ;;  %1538 = vrot.lane.b32.xlu0 %v1537_v5, %s2158_s16  ;;  %1551 = vrot.lane.b32.xlu1 %v1550_v6, %s2159_s17 }
 0x105   :  { %v922_v10 = vpop.permute.xlu0 %921   ;;  %v937_v11 = vpop.permute.xlu1 %936  }
 0x106   :  { %1805 = vst.msk [vmem:[%s3172_s1 + $0x41] ss:$216 sm:$0x3] %vm47_vm1, %v922_v10   ;;  %1806 = vst.msk [vmem:[%s3172_s1 - $0xef] ss:$216 sm:$0xc] %vm47_vm1, %v922_v10  }
 0x107   :  { %1807 = vst.msk [vmem:[%s3172_s1 + $0xe6] ss:$-216 sm:$0x3] %vm47_vm1, %v937_v11   ;;  %1808 = vst.msk [vmem:[%s3172_s1 + $0x316] ss:$-216 sm:$0xc] %vm47_vm1, %v937_v11   ;;  %1561 = vrot.lane.b32.xlu0 %v1560_v9, %s2160_s25 }
 0x109   :  { %v947_v12 = vpop.permute.xlu0 %946   ;;  %v960_v13 = vpop.permute.xlu1 %959  }
 0x10a   :  { %1809 = vst.msk [vmem:[%s3172_s1 + $0x133] ss:$-216 sm:$0x3] %vm47_vm1, %v947_v12   ;;  %1810 = vst.msk [vmem:[%s3172_s1 + $0x100] ss:$-216 sm:$0x3] %vm47_vm1, %v960_v13  }
 0x10b   :  { %1811 = vst.msk [vmem:[%s3172_s1 + $0x330] ss:$-216 sm:$0xc] %vm47_vm1, %v960_v13  }
 0x10d   :  { %v970_v14 = vpop.permute.xlu0 %969   ;;  %v981_v15 = vpop.permute.xlu1 %980  }
 0x10e   :  { %1812 = vst.msk [vmem:[%s3172_s1 + $0x14d] ss:$-216 sm:$0x3] %vm47_vm1, %v970_v14   ;;  %1813 = vst.msk [vmem:[%s3172_s1 + $0x42] ss:$216 sm:$0x3] %vm47_vm1, %v981_v15  }
 0x10f   :  { %1814 = vst.msk [vmem:[%s3172_s1 - $0xee] ss:$216 sm:$0xc] %vm47_vm1, %v981_v15  }
 0x111   :  { %v996_v16 = vpop.permute.xlu0 %995   ;;  %v1006_v17 = vpop.permute.xlu1 %1005  }
 0x112   :  { %1815 = vst.msk [vmem:[%s3172_s1 + $0xe7] ss:$-216 sm:$0x3] %vm47_vm1, %v996_v16   ;;  %1816 = vst.msk [vmem:[%s3172_s1 + $0x317] ss:$-216 sm:$0xc] %vm47_vm1, %v996_v16  }
 0x113   :  { %1817 = vst.msk [vmem:[%s3172_s1 + $0x134] ss:$-216 sm:$0x3] %vm47_vm1, %v1006_v17  }
 0x115   :  { %v1019_v18 = vpop.permute.xlu0 %1018   ;;  %v1029_v19 = vpop.permute.xlu1 %1028  }
 0x116   :  { %1818 = vst.msk [vmem:[%s3172_s1 + $0x101] ss:$-216 sm:$0x3] %vm47_vm1, %v1019_v18   ;;  %1819 = vst.msk [vmem:[%s3172_s1 + $0x331] ss:$-216 sm:$0xc] %vm47_vm1, %v1019_v18  }
 0x117   :  { %1820 = vst.msk [vmem:[%s3172_s1 + $0x14e] ss:$-216 sm:$0x3] %vm47_vm1, %v1029_v19  }
 0x119   :  { %v1040_v20 = vpop.permute.xlu0 %1039   ;;  %v1055_v21 = vpop.permute.xlu1 %1054  }
 0x11a   :  { %1821 = vst.msk [vmem:[%s3172_s1 + $0x43] ss:$216 sm:$0x3] %vm47_vm1, %v1040_v20   ;;  %1822 = vst.msk [vmem:[%s3172_s1 - $0xed] ss:$216 sm:$0xc] %vm47_vm1, %v1040_v20  }
 0x11b   :  { %1823 = vst.msk [vmem:[%s3172_s1 + $0xe8] ss:$-216 sm:$0x3] %vm47_vm1, %v1055_v21   ;;  %1824 = vst.msk [vmem:[%s3172_s1 + $0x318] ss:$-216 sm:$0xc] %vm47_vm1, %v1055_v21  }
 0x11d   :  { %v1065_v22 = vpop.permute.xlu0 %1064   ;;  %v1078_v23 = vpop.permute.xlu1 %1077  }
 0x11e   :  { %1825 = vst.msk [vmem:[%s3172_s1 + $0x135] ss:$-216 sm:$0x3] %vm47_vm1, %v1065_v22   ;;  %1826 = vst.msk [vmem:[%s3172_s1 + $0x102] ss:$-216 sm:$0x3] %vm47_vm1, %v1078_v23  }
 0x11f   :  { %1827 = vst.msk [vmem:[%s3172_s1 + $0x332] ss:$-216 sm:$0xc] %vm47_vm1, %v1078_v23  }
 0x121   :  { %v1088_v24 = vpop.permute.xlu0 %1087   ;;  %v1099_v25 = vpop.permute.xlu1 %1098  }
 0x122   :  { %1828 = vst.msk [vmem:[%s3172_s1 + $0x14f] ss:$-216 sm:$0x3] %vm47_vm1, %v1088_v24   ;;  %1829 = vst.msk [vmem:[%s3172_s1 + $0x44] ss:$216 sm:$0x3] %vm47_vm1, %v1099_v25  }
 0x123   :  { %1830 = vst.msk [vmem:[%s3172_s1 - $0xec] ss:$216 sm:$0xc] %vm47_vm1, %v1099_v25  }
 0x125   :  { %v1114_v26 = vpop.permute.xlu0 %1113   ;;  %v1124_v27 = vpop.permute.xlu1 %1123  }
 0x126   :  { %1831 = vst.msk [vmem:[%s3172_s1 + $0xe9] ss:$-216 sm:$0x3] %vm47_vm1, %v1114_v26   ;;  %1832 = vst.msk [vmem:[%s3172_s1 + $0x319] ss:$-216 sm:$0xc] %vm47_vm1, %v1114_v26  }
 0x127   :  { %1833 = vst.msk [vmem:[%s3172_s1 + $0x136] ss:$-216 sm:$0x3] %vm47_vm1, %v1124_v27  }
 0x129   :  { %v1137_v28 = vpop.permute.xlu0 %1136   ;;  %v1147_v29 = vpop.permute.xlu1 %1146  }
 0x12a   :  { %1834 = vst.msk [vmem:[%s3172_s1 + $0x103] ss:$-216 sm:$0x3] %vm47_vm1, %v1137_v28   ;;  %1835 = vst.msk [vmem:[%s3172_s1 + $0x333] ss:$-216 sm:$0xc] %vm47_vm1, %v1137_v28  }
 0x12b   :  { %1836 = vst.msk [vmem:[%s3172_s1 + $0x150] ss:$-216 sm:$0x3] %vm47_vm1, %v1147_v29  }
 0x12d   :  { %v1158_v30 = vpop.permute.xlu0 %1157   ;;  %v1173_v31 = vpop.permute.xlu1 %1172  }
 0x12e   :  { %1837 = vst.msk [vmem:[%s3172_s1 + $0x45] ss:$216 sm:$0x3] %vm47_vm1, %v1158_v30   ;;  %1838 = vst.msk [vmem:[%s3172_s1 - $0xeb] ss:$216 sm:$0xc] %vm47_vm1, %v1158_v30  }
 0x12f   :  { %1839 = vst.msk [vmem:[%s3172_s1 + $0xea] ss:$-216 sm:$0x3] %vm47_vm1, %v1173_v31   ;;  %1840 = vst.msk [vmem:[%s3172_s1 + $0x31a] ss:$-216 sm:$0xc] %vm47_vm1, %v1173_v31  }
 0x131   :  { %v1183_v32 = vpop.permute.xlu0 %1182   ;;  %v1196_v33 = vpop.permute.xlu1 %1195  }
 0x132   :  { %1841 = vst.msk [vmem:[%s3172_s1 + $0x137] ss:$-216 sm:$0x3] %vm47_vm1, %v1183_v32   ;;  %1842 = vst.msk [vmem:[%s3172_s1 + $0x104] ss:$-216 sm:$0x3] %vm47_vm1, %v1196_v33  }
 0x133   :  { %1843 = vst.msk [vmem:[%s3172_s1 + $0x334] ss:$-216 sm:$0xc] %vm47_vm1, %v1196_v33  }
 0x135   :  { %v1206_v34 = vpop.permute.xlu0 %1205   ;;  %v1217_v35 = vpop.permute.xlu1 %1216  }
 0x136   :  { %1844 = vst.msk [vmem:[%s3172_s1 + $0x151] ss:$-216 sm:$0x3] %vm47_vm1, %v1206_v34   ;;  %1845 = vst.msk [vmem:[%s3172_s1 + $0x46] ss:$216 sm:$0x3] %vm47_vm1, %v1217_v35  }
 0x137   :  { %1846 = vst.msk [vmem:[%s3172_s1 - $0xea] ss:$216 sm:$0xc] %vm47_vm1, %v1217_v35  }
 0x139   :  { %v1232_v36 = vpop.permute.xlu0 %1231   ;;  %v1241_v37 = vpop.permute.xlu1 %1240  }
 0x13a   :  { %1847 = vst.msk [vmem:[%s3172_s1 + $0xeb] ss:$-216 sm:$0x3] %vm47_vm1, %v1232_v36   ;;  %1848 = vst.msk [vmem:[%s3172_s1 + $0x31b] ss:$-216 sm:$0xc] %vm47_vm1, %v1232_v36  }
 0x13b   :  { %1849 = vst.msk [vmem:[%s3172_s1 + $0x60] ss:$216 sm:$0x3] %vm47_vm1, %v1241_v37  }
 0x13d   :  { %v1254_v38 = vpop.permute.xlu0 %1253   ;;  %v1264_v39 = vpop.permute.xlu1 %1263  }
 0x13e   :  { %1850 = vst.msk [vmem:[%s3172_s1 + $0x105] ss:$-216 sm:$0x3] %vm47_vm1, %v1254_v38   ;;  %1851 = vst.msk [vmem:[%s3172_s1 + $0x335] ss:$-216 sm:$0xc] %vm47_vm1, %v1254_v38  }
 0x13f   :  { %1852 = vst.msk [vmem:[%s3172_s1 + $0x152] ss:$-216 sm:$0x3] %vm47_vm1, %v1264_v39  }
 0x141   :  { %v1585_v40 = vpop.permute.xlu0 %1584   ;;  %v1615_v41 = vpop.permute.xlu1 %1614  }
 0x142   :  { %1893 = vst.msk [vmem:[%s3172_s1 + $0x124] ss:$-216 sm:$0x3] %vm1586_vm6, %v1585_v40   ;;  %1894 = vst.msk [vmem:[%s3172_s1 + $0x354] ss:$-216 sm:$0xc] %vm1586_vm6, %v1585_v40  }
 0x143   :  { %1897 = vst.msk [vmem:[%s3172_s1 + $0xf1] ss:$-216 sm:$0x3] %vm1616_vm7, %v1615_v41   ;;  %1898 = vst.msk [vmem:[%s3172_s1 + $0x321] ss:$-216 sm:$0xc] %vm1616_vm7, %v1615_v41  }
 0x144   :  { %1895 = vst.msk [vmem:[%s3172_s1 + $0x124] ss:$-216 sm:$0x3] %vm1591_vm8, %v1585_v40   ;;  %1896 = vst.msk [vmem:[%s3172_s1 + $0x354] ss:$-216 sm:$0xc] %vm1591_vm8, %v1585_v40  }
 0x145   :  { %1899 = vst.msk [vmem:[%s3172_s1 + $0xf1] ss:$-216 sm:$0x3] %vm1621_vm9, %v1615_v41   ;;  %1900 = vst.msk [vmem:[%s3172_s1 + $0x321] ss:$-216 sm:$0xc] %vm1621_vm9, %v1615_v41   ;;  %v1633_v42 = vpop.permute.xlu0 %1632   ;;  %v1659_v43 = vpop.permute.xlu1 %1658  }
 0x146   :  { %1901 = vst.msk [vmem:[%s3172_s1 + $0x66] ss:$216 sm:$0x3] %vm1634_vm10, %v1633_v42  }
 0x147   :  { %1903 = vst.msk [vmem:[%s3172_s1 + $0x10b] ss:$-216 sm:$0x3] %vm1660_vm11, %v1659_v43   ;;  %1904 = vst.msk [vmem:[%s3172_s1 + $0x33b] ss:$-216 sm:$0xc] %vm1660_vm11, %v1659_v43  }
 0x148   :  { %1902 = vst.msk [vmem:[%s3172_s1 + $0x66] ss:$216 sm:$0x3] %vm1637_vm12, %v1633_v42  }
 0x149   :  { %1905 = vst.msk [vmem:[%s3172_s1 + $0x10b] ss:$-216 sm:$0x3] %vm1665_vm13, %v1659_v43   ;;  %1906 = vst.msk [vmem:[%s3172_s1 + $0x33b] ss:$-216 sm:$0xc] %vm1665_vm13, %v1659_v43   ;;  %v1275_v44 = vpop.permute.xlu0 %1274   ;;  %v1290_v45 = vpop.permute.xlu1 %1289  }
 0x14a   :  { %1853 = vst.msk [vmem:[%s3172_s1 + $0x47] ss:$216 sm:$0x3] %vm47_vm1, %v1275_v44   ;;  %1854 = vst.msk [vmem:[%s3172_s1 - $0xe9] ss:$216 sm:$0xc] %vm47_vm1, %v1275_v44  }
 0x14b   :  { %1855 = vst.msk [vmem:[%s3172_s1 + $0xec] ss:$-216 sm:$0x3] %vm47_vm1, %v1290_v45   ;;  %1856 = vst.msk [vmem:[%s3172_s1 + $0x31c] ss:$-216 sm:$0xc] %vm47_vm1, %v1290_v45  }
 0x14d   :  { %v1299_v46 = vpop.permute.xlu0 %1298   ;;  %v1312_v47 = vpop.permute.xlu1 %1311  }
 0x14e   :  { %1857 = vst.msk [vmem:[%s3172_s1 + $0x61] ss:$216 sm:$0x3] %vm47_vm1, %v1299_v46   ;;  %1858 = vst.msk [vmem:[%s3172_s1 + $0x106] ss:$-216 sm:$0x3] %vm47_vm1, %v1312_v47  }
 0x14f   :  { %1859 = vst.msk [vmem:[%s3172_s1 + $0x336] ss:$-216 sm:$0xc] %vm47_vm1, %v1312_v47  }
 0x151   :  { %v1322_v48 = vpop.permute.xlu0 %1321   ;;  %v1335_v49 = vpop.permute.xlu1 %1334  }
 0x152   :  { %1860 = vst.msk [vmem:[%s3172_s1 + $0x153] ss:$-216 sm:$0x3] %vm47_vm1, %v1322_v48   ;;  %1861 = vst.msk [vmem:[%s3172_s1 + $0x120] ss:$-216 sm:$0x3] %vm47_vm1, %v1335_v49  }
 0x153   :  { %1862 = vst.msk [vmem:[%s3172_s1 + $0x350] ss:$-216 sm:$0xc] %vm47_vm1, %v1335_v49  }
 0x155   :  { %v1350_v50 = vpop.permute.xlu0 %1349   ;;  %v1359_v51 = vpop.permute.xlu1 %1358  }
 0x156   :  { %1863 = vst.msk [vmem:[%s3172_s1 + $0xed] ss:$-216 sm:$0x3] %vm47_vm1, %v1350_v50   ;;  %1864 = vst.msk [vmem:[%s3172_s1 + $0x31d] ss:$-216 sm:$0xc] %vm47_vm1, %v1350_v50  }
 0x157   :  { %1865 = vst.msk [vmem:[%s3172_s1 + $0x62] ss:$216 sm:$0x3] %vm47_vm1, %v1359_v51  }
 0x159   :  { %v1372_v52 = vpop.permute.xlu0 %1371   ;;  %v1382_v53 = vpop.permute.xlu1 %1381  }
 0x15a   :  { %1866 = vst.msk [vmem:[%s3172_s1 + $0x107] ss:$-216 sm:$0x3] %vm47_vm1, %v1372_v52   ;;  %1867 = vst.msk [vmem:[%s3172_s1 + $0x337] ss:$-216 sm:$0xc] %vm47_vm1, %v1372_v52  }
 0x15b   :  { %1868 = vst.msk [vmem:[%s3172_s1 + $0x154] ss:$-216 sm:$0x3] %vm47_vm1, %v1382_v53  }
 0x15d   :  { %v1395_v54 = vpop.permute.xlu0 %1394   ;;  %v1410_v55 = vpop.permute.xlu1 %1409  }
 0x15e   :  { %1869 = vst.msk [vmem:[%s3172_s1 + $0x121] ss:$-216 sm:$0x3] %vm47_vm1, %v1395_v54   ;;  %1870 = vst.msk [vmem:[%s3172_s1 + $0x351] ss:$-216 sm:$0xc] %vm47_vm1, %v1395_v54  }
 0x15f   :  { %1871 = vst.msk [vmem:[%s3172_s1 + $0xee] ss:$-216 sm:$0x3] %vm47_vm1, %v1410_v55   ;;  %1872 = vst.msk [vmem:[%s3172_s1 + $0x31e] ss:$-216 sm:$0xc] %vm47_vm1, %v1410_v55  }
 0x161   :  { %v1419_v56 = vpop.permute.xlu0 %1418   ;;  %v1432_v57 = vpop.permute.xlu1 %1431  }
 0x162   :  { %1873 = vst.msk [vmem:[%s3172_s1 + $0x63] ss:$216 sm:$0x3] %vm47_vm1, %v1419_v56   ;;  %1874 = vst.msk [vmem:[%s3172_s1 + $0x108] ss:$-216 sm:$0x3] %vm47_vm1, %v1432_v57  }
 0x163   :  { %1875 = vst.msk [vmem:[%s3172_s1 + $0x338] ss:$-216 sm:$0xc] %vm47_vm1, %v1432_v57  }
 0x165   :  { %v1442_v58 = vpop.permute.xlu0 %1441   ;;  %v1455_v59 = vpop.permute.xlu1 %1454  }
 0x166   :  { %1876 = vst.msk [vmem:[%s3172_s1 + $0x155] ss:$-216 sm:$0x3] %vm47_vm1, %v1442_v58   ;;  %1877 = vst.msk [vmem:[%s3172_s1 + $0x122] ss:$-216 sm:$0x3] %vm47_vm1, %v1455_v59  }
 0x167   :  { %1878 = vst.msk [vmem:[%s3172_s1 + $0x352] ss:$-216 sm:$0xc] %vm47_vm1, %v1455_v59  }
 0x169   :  { %v1470_v60 = vpop.permute.xlu0 %1469   ;;  %v1479_v61 = vpop.permute.xlu1 %1478  }
 0x16a   :  { %1879 = vst.msk [vmem:[%s3172_s1 + $0xef] ss:$-216 sm:$0x3] %vm47_vm1, %v1470_v60   ;;  %1880 = vst.msk [vmem:[%s3172_s1 + $0x31f] ss:$-216 sm:$0xc] %vm47_vm1, %v1470_v60  }
 0x16b   :  { %1881 = vst.msk [vmem:[%s3172_s1 + $0x64] ss:$216 sm:$0x3] %vm47_vm1, %v1479_v61  }
 0x16d   :  { %v1492_v62 = vpop.permute.xlu0 %1491   ;;  %v1502_v63 = vpop.permute.xlu1 %1501  }
 0x16e   :  { %1882 = vst.msk [vmem:[%s3172_s1 + $0x109] ss:$-216 sm:$0x3] %vm47_vm1, %v1492_v62   ;;  %1883 = vst.msk [vmem:[%s3172_s1 + $0x339] ss:$-216 sm:$0xc] %vm47_vm1, %v1492_v62  }
 0x16f   :  { %1884 = vst.msk [vmem:[%s3172_s1 + $0x156] ss:$-216 sm:$0x3] %vm47_vm1, %v1502_v63  }
 0x171   :  { %v1515_v0 = vpop.permute.xlu0 %1514   ;;  %v1530_v1 = vpop.permute.xlu1 %1529  }
 0x172   :  { %1885 = vst.msk [vmem:[%s3172_s1 + $0x123] ss:$-216 sm:$0x3] %vm47_vm1, %v1515_v0   ;;  %1886 = vst.msk [vmem:[%s3172_s1 + $0x353] ss:$-216 sm:$0xc] %vm47_vm1, %v1515_v0  }
 0x173   :  { %1887 = vst.msk [vmem:[%s3172_s1 + $0xf0] ss:$-216 sm:$0x3] %vm47_vm1, %v1530_v1   ;;  %1888 = vst.msk [vmem:[%s3172_s1 + $0x320] ss:$-216 sm:$0xc] %vm47_vm1, %v1530_v1  }
 0x175   :  { %v1539_v2 = vpop.permute.xlu0 %1538   ;;  %v1552_v3 = vpop.permute.xlu1 %1551  }
 0x176   :  { %1889 = vst.msk [vmem:[%s3172_s1 + $0x65] ss:$216 sm:$0x3] %vm47_vm1, %v1539_v2   ;;  %1890 = vst.msk [vmem:[%s3172_s1 + $0x10a] ss:$-216 sm:$0x3] %vm47_vm1, %v1552_v3  }
 0x177   :  { %1891 = vst.msk [vmem:[%s3172_s1 + $0x33a] ss:$-216 sm:$0xc] %vm47_vm1, %v1552_v3  }
 0x179   :  { %v1562_v4 = vpop.permute.xlu0 %1561  }
 0x17a   :  { %1892 = vst.msk [vmem:[%s3172_s1 + $0x157] ss:$-216 sm:$0x3] %vm47_vm1, %v1562_v4  }

// kernel: net_forward.1
= control target key start
LH: loop header
LB: loop body
LE: loop exit
PB: predicated region body
PF: predicated region fallthrough
CT: control target
= control target key end

     0   :  { %s6097_s0 = inlined_call_operand.vmem [shape: f32[2,216,5], index: 0, kind: input, shape index: {}]   ;;  %s6098_s1 = inlined_call_operand.vmem [shape: f32[40,5], index: 1, kind: input, shape index: {}]   ;;  %s6099_s2 = inlined_call_operand.vmem [shape: f32[1,5], index: 2, kind: input, shape index: {}]   ;;  %s6100_s3 = inlined_call_operand.vmem [shape: f32[100,5], index: 3, kind: input, shape index: {}]   ;;  %s6101_s4 = inlined_call_operand.vmem [shape: f32[1,5], index: 4, kind: input, shape index: {}]   ;;  %s6102_s5 = inlined_call_operand.vmem [shape: f32[75,7], index: 5, kind: input, shape index: {}]   ;;  %s6103_s6 = inlined_call_operand.vmem [shape: f32[1,7], index: 6, kind: input, shape index: {}]   ;;  %s6104_s7 = inlined_call_operand.vmem [shape: f32[2,25,7], index: 7, kind: input, shape index: {}]   ;;  %s6105_s8 = inlined_call_operand.vmem [shape: f32[1,2], index: 8, kind: input, shape index: {}]   ;;  %s6106_s9 = inlined_call_operand.hbm [shape: f32[2,1,2], index: 9, kind: output, shape index: {}]  }
   0x1   :  { %6144 = sst [smem:[#allocation31_spill]] %s6097_s0 }
   0x2   :  { %6145 = sst [smem:[#allocation32_spill]] %s6098_s1 }
   0x3   :  { %6146 = sst [smem:[#allocation33_spill]] %s6099_s2 }
   0x4   :  { %6147 = sst [smem:[#allocation34_spill]] %s6100_s3 }
   0x5   :  { %6148 = sst [smem:[#allocation35_spill]] %s6101_s4 }
   0x6   :  { %14 = vsyncpa [#allocation5], 0 }
   0x7   :  { %16 = vsyncpa [#allocation5 + $0x1], 0  ;;  %s4250_s30 = smov 0   ;;  %s4252_s10 = smov 0  }
   0x8   :  { %s4254_s11 = smov 0   ;;  %s4256_s12 = smov 0  }
   0x9 LB: > { %6149 = sst [smem:[#allocation7_spill]] %s4175_s11  ;;  %s4271_s13 = sadd.s32 4294967295, %s4179_s12   ;;  %s4179_s12 = sphi %s4256_s12, %s6244_s12   ;;  %s4175_s11 = sphi %s4254_s11, %s6246_s11   ;;  %s4171_s10 = sphi %s4252_s10, %s6248_s10   ;;  %s4167_s30 = sphi %s4250_s30, %s6247_s30  }
   0xa   : > { %s3769_s14 = sadd.s32 4294967294, %s4179_s12   ;;  %s4275_s15 = sadd.s32 1, %s4179_s12  }
   0xb   : > { %6150 = sst [smem:[#allocation8_spill]] %s4275_s15  ;;  %s223_s16 = sadd.s32 1, %s4175_s11 }
   0xc   : > { %s220_s17 = ssub.s32 %s4179_s12, %s4275_s15  ;;  %p233_p0 = scmp.ne.s32.totalorder %s4175_s11, %s4171_s10 }
   0xd   : > { %p221_p1 = scmp.eq.s32.totalorder %s220_s17, 0  ;;  %p234_p2 = scmp.eq.s32.totalorder %s4271_s13, 1 }
   0xe   : > { %p239_p3 = scmp.ne.s32.totalorder %s4171_s10, %s4167_s30  ;;  %p240_p4 = scmp.eq.s32.totalorder %s3769_s14, 1 }
   0xf   : > { %s4286_s18 = scalar_select %p221_p1, %s4175_s11, %s223_s16  }
  0x10   : > { %p4288_p5 = por %p234_p2, %p233_p0  ;;  %p4292_p6 = por %p240_p4, %p239_p3 }
  0x11   : > { %6151 = sst [smem:[#allocation9_spill]] %s4286_s18  ;;  %p3772_p7 = scmp.ge.s32.totalorder %s4179_s12, 1 }
  0x12   : > { %p290_p8 = scmp.lt.s32.totalorder %s4179_s12, 3 }
  0x14   : > { %p291_p9 = pnand %p3772_p7, %p290_p8 }
  0x16   : > { %294 = sbr.rel (%p291_p9) target bundleno = 1921 (0x781), region = 56 }
  0x1b   : > { %p325_p10 = scmp.lt.s32.totalorder %s4271_s13, 1  ;;  %v4181_v0 = vmov 0.0   ;;  %s6154_s1 = sld [smem:[#allocation32_spill]]  ;;  %vm4184_vm0 = vmmov 0   ;;  %vm1302_vm1 = vcmask 39936   ;;  %vm6134_vm2 = vcmask 80896  }
  0x1c   : > { %3892 = vmatprep.subr.mxu0 %v4181_v0  ;;  %4047 = vmatprep.subr.mxu1 %v4181_v0  ;;  %s6155_s0 = sld [smem:[#allocation31_spill]]  ;;  %s6123_s17 = smov 15   ;;  %vm1358_vm3 = vcmask 121856   ;;  %vm6132_vm4 = vcmask 162816   ;;  %vm1414_vm5 = vcmask 203776   ;;  %vm1442_vm6 = vcmask 244736  }
  0x1d   : > { %s326_s21 = scalar_select %p325_p10, %s4271_s13, 1  ;;  %3902 = vmatprep.mubr.msk.f32.mxu0 %vm4184_vm0, %v4181_v0  ;;  %3953 = vmatprep.mubr.msk.f32.mxu1 %vm4184_vm0, %v4181_v0  ;;  %vm1470_vm7 = vcmask 285696   ;;  %vm1510_vm8 = vcmask 326656   ;;  %vm1845_vm9 = vcmask 32768   ;;  %vm2979_vm10 = vcmask 1043456  }
  0x1e   : > { %s6129_s22 = smov 20   ;;  %s6115_s23 = smov 10   ;;  %vm2710_vm11 = vcmask 367616   ;;  %vm6131_vm12 = vcmask 408576   ;;  %vm2728_vm13 = vcmask 449536   ;;  %vm2737_vm14 = vcmask 490496  }
  0x1f   : > { %s4057_s24 = smul.u32 216, %s326_s21  ;;  %s6109_s21 = smov 5   ;;  %vm2746_vm15 = vcmask 531456  }
  0x20   : > { %s6119_s25 = smov 30   ;;  %s6125_s26 = smov 35  }
  0x21   : > { %v1502_v1 = vld [vmem:[%s6154_s1 + $0x20] sm:$0xff]  ;;  %v1501_v2 = vld [vmem:[%s6154_s1 + $0x18] sm:$0xff]  ;;  %v1500_v3 = vld [vmem:[%s6154_s1 + $0x10] sm:$0xff]  ;;  %s6156_s2 = sld [smem:[#allocation33_spill]]  ;;  %s6113_s14 = smov 45  }
  0x22   : > { %3893 = vmatpush3.msra.mxu0 %v1502_v1  ;;  %4052 = vmatpush3.msra.mxu1 %v1502_v1  ;;  %s4313_s29 = scalar_lea.vmem %s6155_s0, %s4057_s24  ;;  %s6117_s24 = smov 25   ;;  %v1499_v18 = vld [vmem:[%s6154_s1 + $0x8] sm:$0xff]  ;;  %v1498_v19 = vld [vmem:[%s6154_s1] sm:$0xff] }
  0x23   : > { %3894 = vmatprep.subr.mxu0 %v4181_v0  ;;  %4048 = vmatprep.subr.mxu1 %v4181_v0  ;;  %v411_v4 = vld [vmem:[%s4313_s29 + $0x3] sm:$0xff]  ;;  %v412_v13 = vld [vmem:[%s4313_s29 + $0xb] sm:$0xff]  ;;  %v413_v20 = vld [vmem:[%s4313_s29 + $0x13] sm:$0xff]  ;;  %s6137_s16 = smov 50   ;;  %s6107_s27 = smov 55  }
  0x24   : > { %3895 = vmatpush3.msra.mxu0 %v1501_v2  ;;  %4053 = vmatpush3.msra.mxu1 %v1501_v2  ;;  %v357_v5 = vld [vmem:[%s4313_s29 + $0x1] sm:$0xff]  ;;  %v358_v9 = vld [vmem:[%s4313_s29 + $0x9] sm:$0xff]  ;;  %v359_v14 = vld [vmem:[%s4313_s29 + $0x11] sm:$0xff]  ;;  %s6121_s28 = smov 60   ;;  %s6157_s3 = sld [smem:[#allocation34_spill]] }
  0x25   : > { %3896 = vmatprep.subr.mxu0 %v4181_v0  ;;  %4049 = vmatprep.subr.mxu1 %v4181_v0  ;;  %v438_v6 = vld [vmem:[%s4313_s29 + $0x4] sm:$0xff]  ;;  %v439_v15 = vld [vmem:[%s4313_s29 + $0xc] sm:$0xff]  ;;  %v440_v22 = vld [vmem:[%s4313_s29 + $0x14] sm:$0xff]  ;;  %s6224_s4 = sld [smem:[#allocation35_spill]]  ;;  %s6229_s0 = smov 50  }
  0x26   : > { %3897 = vmatpush3.msra.mxu0 %v1500_v3  ;;  %4054 = vmatpush3.msra.mxu1 %v1500_v3  ;;  %v384_v7 = vld [vmem:[%s4313_s29 + $0x2] sm:$0xff]  ;;  %v385_v11 = vld [vmem:[%s4313_s29 + $0xa] sm:$0xff]  ;;  %v386_v16 = vld [vmem:[%s4313_s29 + $0x12] sm:$0xff] }
  0x27   : > { %789 = vrot.lane.b32.xlu1 %v411_v4, %s6123_s17  ;;  %573 = vrot.lane.b32.xlu0 %v357_v5, %s6109_s21  ;;  %v465_v8 = vld [vmem:[%s4313_s29 + $0x5] sm:$0xff]  ;;  %v466_v17 = vld [vmem:[%s4313_s29 + $0xd] sm:$0xff] }
  0x28   : > { %3898 = vmatprep.subr.mxu0 %v4181_v0  ;;  %4050 = vmatprep.subr.mxu1 %v4181_v0  ;;  %v492_v10 = vld [vmem:[%s4313_s29 + $0x6] sm:$0xff]  ;;  %v493_v21 = vld [vmem:[%s4313_s29 + $0xe] sm:$0xff]  ;;  %v360_v25 = vld [vmem:[%s4313_s29 + $0x19] sm:$0xff] }
  0x29   : > { %v519_v12 = vld [vmem:[%s4313_s29 + $0x7] sm:$0xff]  ;;  %3899 = vmatpush3.msra.mxu0 %v1499_v18  ;;  %4055 = vmatpush3.msra.mxu1 %v1499_v18  ;;  %v520_v23 = vld [vmem:[%s4313_s29 + $0xf] sm:$0xff]  ;;  %v387_v27 = vld [vmem:[%s4313_s29 + $0x1a] sm:$0xff] }
  0x2a   : > { %3900 = vmatprep.subr.mxu0 %v4181_v0  ;;  %4051 = vmatprep.subr.mxu1 %v4181_v0  ;;  %v467_v24 = vld [vmem:[%s4313_s29 + $0x15] sm:$0xff]  ;;  %v361_v30 = vld [vmem:[%s4313_s29 + $0x21] sm:$0xff]  ;;  %v362_v39 = vld [vmem:[%s4313_s29 + $0x29] sm:$0xff] }
  0x2b   : > { %897 = vrot.lane.b32.xlu1 %v438_v6, %s6129_s22  ;;  %681 = vrot.lane.b32.xlu0 %v384_v7, %s6115_s23  ;;  %v494_v26 = vld [vmem:[%s4313_s29 + $0x16] sm:$0xff]  ;;  %v388_v32 = vld [vmem:[%s4313_s29 + $0x22] sm:$0xff] }
  0x2c   : > { %3901 = vmatpush3.msra.mxu0 %v1498_v19  ;;  %4056 = vmatpush3.msra.mxu1 %v1498_v19  ;;  %v521_v28 = vld [vmem:[%s4313_s29 + $0x17] sm:$0xff]  ;;  %v415_v34 = vld [vmem:[%s4313_s29 + $0x23] sm:$0xff]  ;;  %v416_v43 = vld [vmem:[%s4313_s29 + $0x2b] sm:$0xff] }
  0x2d   : > { %v414_v29 = vld [vmem:[%s4313_s29 + $0x1b] sm:$0xff]  ;;  %v442_v36 = vld [vmem:[%s4313_s29 + $0x24] sm:$0xff]  ;;  %v363_v44 = vld [vmem:[%s4313_s29 + $0x31] sm:$0xff] }
  0x2e   : > { %v441_v31 = vld [vmem:[%s4313_s29 + $0x1c] sm:$0xff]  ;;  %v469_v38 = vld [vmem:[%s4313_s29 + $0x25] sm:$0xff]  ;;  %v390_v46 = vld [vmem:[%s4313_s29 + $0x32] sm:$0xff] }
  0x2f   : > { %1005 = vrot.lane.b32.xlu1 %v465_v8, %s6117_s24  ;;  %575 = vrot.lane.b32.xlu0 %v358_v9, %s6109_s21  ;;  %v468_v33 = vld [vmem:[%s4313_s29 + $0x1d] sm:$0xff]  ;;  %v496_v40 = vld [vmem:[%s4313_s29 + $0x26] sm:$0xff] }
  0x30   : > { %v495_v35 = vld [vmem:[%s4313_s29 + $0x1e] sm:$0xff]  ;;  %v389_v41 = vld [vmem:[%s4313_s29 + $0x2a] sm:$0xff]  ;;  %v417_v48 = vld [vmem:[%s4313_s29 + $0x33] sm:$0xff] }
  0x31   : > { %v522_v37 = vld [vmem:[%s4313_s29 + $0x1f] sm:$0xff]  ;;  %v523_v42 = vld [vmem:[%s4313_s29 + $0x27] sm:$0xff]  ;;  %v444_v50 = vld [vmem:[%s4313_s29 + $0x34] sm:$0xff] }
  0x32   : > { %v443_v45 = vld [vmem:[%s4313_s29 + $0x2c] sm:$0xff]  ;;  %v471_v52 = vld [vmem:[%s4313_s29 + $0x35] sm:$0xff]  ;;  %v365_v58 = vld [vmem:[%s4313_s29 + $0x41] sm:$0xff] }
  0x33   : > { %1113 = vrot.lane.b32.xlu1 %v492_v10, %s6119_s25  ;;  %683 = vrot.lane.b32.xlu0 %v385_v11, %s6115_s23  ;;  %v470_v47 = vld [vmem:[%s4313_s29 + $0x2d] sm:$0xff]  ;;  %v364_v53 = vld [vmem:[%s4313_s29 + $0x39] sm:$0xff] }
  0x34   : > { %v497_v49 = vld [vmem:[%s4313_s29 + $0x2e] sm:$0xff]  ;;  %v498_v54 = vld [vmem:[%s4313_s29 + $0x36] sm:$0xff]  ;;  %v392_v60 = vld [vmem:[%s4313_s29 + $0x42] sm:$0xff] }
  0x35   : > { %v524_v51 = vld [vmem:[%s4313_s29 + $0x2f] sm:$0xff]  ;;  %v391_v55 = vld [vmem:[%s4313_s29 + $0x3a] sm:$0xff]  ;;  %v419_v62 = vld [vmem:[%s4313_s29 + $0x43] sm:$0xff] }
  0x36   : > { %v525_v56 = vld [vmem:[%s4313_s29 + $0x37] sm:$0xff]  ;;  %v374_v1 = vld [vmem:[%s4313_s29 + $0x89] sm:$0xff]  ;;  %v526_v2 = vld [vmem:[%s4313_s29 + $0x3f] sm:$0xff] }
  0x37   : > { %1221 = vrot.lane.b32.xlu1 %v519_v12, %s6125_s26  ;;  %791 = vrot.lane.b32.xlu0 %v412_v13, %s6123_s17  ;;  %v418_v57 = vld [vmem:[%s4313_s29 + $0x3b] sm:$0xff]  ;;  %v366_v6 = vld [vmem:[%s4313_s29 + $0x49] sm:$0xff] }
  0x38   : > { %v445_v59 = vld [vmem:[%s4313_s29 + $0x3c] sm:$0xff]  ;;  %v446_v7 = vld [vmem:[%s4313_s29 + $0x44] sm:$0xff] }
  0x39   : > { %v472_v61 = vld [vmem:[%s4313_s29 + $0x3d] sm:$0xff]  ;;  %v473_v12 = vld [vmem:[%s4313_s29 + $0x45] sm:$0xff] }
  0x3a   : > { %v499_v63 = vld [vmem:[%s4313_s29 + $0x3e] sm:$0xff]  ;;  %v401_v13 = vld [vmem:[%s4313_s29 + $0x8a] sm:$0xff] }
  0x3b   : > { %577 = vrot.lane.b32.xlu1 %v359_v14, %s6109_s21  ;;  %899 = vrot.lane.b32.xlu0 %v439_v15, %s6129_s22  ;;  %v330_v5 = vld [vmem:[%s4313_s29] sm:$0xff]  ;;  %v393_v18 = vld [vmem:[%s4313_s29 + $0x4a] sm:$0xff] }
  0x3f   : > { %685 = vrot.lane.b32.xlu1 %v386_v16, %s6115_s23  ;;  %1007 = vrot.lane.b32.xlu0 %v466_v17, %s6117_s24  ;;  %v428_v17 = vld [vmem:[%s4313_s29 + $0x8b] sm:$0xff] }
  0x43   : > { %793 = vrot.lane.b32.xlu1 %v413_v20, %s6123_s17  ;;  %1115 = vrot.lane.b32.xlu0 %v493_v21, %s6119_s25 }
  0x47   : > { %901 = vrot.lane.b32.xlu1 %v440_v22, %s6129_s22  ;;  %1223 = vrot.lane.b32.xlu0 %v520_v23, %s6125_s26  ;;  %v420_v23 = vld [vmem:[%s4313_s29 + $0x4b] sm:$0xff] }
  0x4b   : > { %1009 = vrot.lane.b32.xlu1 %v467_v24, %s6117_s24  ;;  %579 = vrot.lane.b32.xlu0 %v360_v25, %s6109_s21  ;;  %v500_v24 = vld [vmem:[%s4313_s29 + $0x46] sm:$0xff] }
  0x4f   : > { %1117 = vrot.lane.b32.xlu1 %v494_v26, %s6119_s25  ;;  %687 = vrot.lane.b32.xlu0 %v387_v27, %s6115_s23 }
  0x53   : > { %1225 = vrot.lane.b32.xlu1 %v521_v28, %s6125_s26  ;;  %795 = vrot.lane.b32.xlu0 %v414_v29, %s6123_s17  ;;  %v527_v29 = vld [vmem:[%s4313_s29 + $0x47] sm:$0xff] }
  0x57   : > { %581 = vrot.lane.b32.xlu1 %v361_v30, %s6109_s21  ;;  %903 = vrot.lane.b32.xlu0 %v441_v31, %s6129_s22  ;;  %v455_v30 = vld [vmem:[%s4313_s29 + $0x8c] sm:$0xff] }
  0x5b   : > { %689 = vrot.lane.b32.xlu1 %v388_v32, %s6115_s23  ;;  %1011 = vrot.lane.b32.xlu0 %v468_v33, %s6117_s24  ;;  %v447_v33 = vld [vmem:[%s4313_s29 + $0x4c] sm:$0xff] }
  0x5f   : > { %797 = vrot.lane.b32.xlu1 %v415_v34, %s6123_s17  ;;  %1119 = vrot.lane.b32.xlu0 %v495_v35, %s6119_s25  ;;  %v375_v34 = vld [vmem:[%s4313_s29 + $0x91] sm:$0xff]  ;;  %v331_v35 = vld [vmem:[%s4313_s29 + $0x8] sm:$0xff] }
  0x63   : > { %905 = vrot.lane.b32.xlu1 %v442_v36, %s6129_s22  ;;  %1227 = vrot.lane.b32.xlu0 %v522_v37, %s6125_s26 }
  0x67   : > { %1013 = vrot.lane.b32.xlu1 %v469_v38, %s6117_s24  ;;  %583 = vrot.lane.b32.xlu0 %v362_v39, %s6109_s21  ;;  %v367_v39 = vld [vmem:[%s4313_s29 + $0x51] sm:$0xff] }
  0x6b   : > { %1121 = vrot.lane.b32.xlu1 %v496_v40, %s6119_s25  ;;  %691 = vrot.lane.b32.xlu0 %v389_v41, %s6115_s23  ;;  %v482_v40 = vld [vmem:[%s4313_s29 + $0x8d] sm:$0xff] }
  0x6f   : > { %1229 = vrot.lane.b32.xlu1 %v523_v42, %s6125_s26  ;;  %799 = vrot.lane.b32.xlu0 %v416_v43, %s6123_s17 }
  0x73   : > { %585 = vrot.lane.b32.xlu1 %v363_v44, %s6109_s21  ;;  %907 = vrot.lane.b32.xlu0 %v443_v45, %s6129_s22 }
  0x77   : > { %693 = vrot.lane.b32.xlu1 %v390_v46, %s6115_s23  ;;  %1015 = vrot.lane.b32.xlu0 %v470_v47, %s6117_s24  ;;  %v474_v47 = vld [vmem:[%s4313_s29 + $0x4d] sm:$0xff] }
  0x7b   : > { %801 = vrot.lane.b32.xlu1 %v417_v48, %s6123_s17  ;;  %1123 = vrot.lane.b32.xlu0 %v497_v49, %s6119_s25  ;;  %v402_v48 = vld [vmem:[%s4313_s29 + $0x92] sm:$0xff] }
  0x7c   : > { %v332_v49 = vld [vmem:[%s4313_s29 + $0x10] sm:$0xff] }
  0x7f   : > { %909 = vrot.lane.b32.xlu1 %v444_v50, %s6129_s22  ;;  %1231 = vrot.lane.b32.xlu0 %v524_v51, %s6125_s26 }
  0x83   : > { %1017 = vrot.lane.b32.xlu1 %v471_v52, %s6117_s24  ;;  %587 = vrot.lane.b32.xlu0 %v364_v53, %s6109_s21 }
  0x87   : > { %1125 = vrot.lane.b32.xlu1 %v498_v54, %s6119_s25  ;;  %695 = vrot.lane.b32.xlu0 %v391_v55, %s6115_s23  ;;  %v394_v55 = vld [vmem:[%s4313_s29 + $0x52] sm:$0xff] }
  0x8b   : > { %1233 = vrot.lane.b32.xlu1 %v525_v56, %s6125_s26  ;;  %803 = vrot.lane.b32.xlu0 %v418_v57, %s6123_s17  ;;  %v509_v56 = vld [vmem:[%s4313_s29 + $0x8e] sm:$0xff] }
  0x8f   : > { %589 = vrot.lane.b32.xlu1 %v365_v58, %s6109_s21  ;;  %911 = vrot.lane.b32.xlu0 %v445_v59, %s6129_s22 }
  0x93   : > { %697 = vrot.lane.b32.xlu1 %v392_v60, %s6115_s23  ;;  %1019 = vrot.lane.b32.xlu0 %v472_v61, %s6117_s24  ;;  %v501_v60 = vld [vmem:[%s4313_s29 + $0x4e] sm:$0xff] }
  0x94   : > { %v429_v61 = vld [vmem:[%s4313_s29 + $0x93] sm:$0xff] }
  0x97   : > { %805 = vrot.lane.b32.xlu1 %v419_v62, %s6123_s17  ;;  %1127 = vrot.lane.b32.xlu0 %v499_v63, %s6119_s25 }
  0x99   : > { %v790_v3 = vpop.permute.xlu1 %789  ;;  %v574_v4 = vpop.permute.xlu0 %573 }
  0x9a   : > { %v1303_v10 = vsel %vm1302_vm1, %v330_v5, %v574_v4  ;;  %v421_v4 = vld [vmem:[%s4313_s29 + $0x53] sm:$0xff] }
  0x9b   : > { %607 = vrot.lane.b32.xlu1 %v374_v1, %s6109_s21  ;;  %1235 = vrot.lane.b32.xlu0 %v526_v2, %s6125_s26  ;;  %v536_v5 = vld [vmem:[%s4313_s29 + $0x8f] sm:$0xff] }
  0x9d   : > { %v898_v8 = vpop.permute.xlu1 %897  ;;  %v682_v9 = vpop.permute.xlu0 %681 }
  0x9e   : > { %v1331_v11 = vsel %vm6134_vm2, %v1303_v10, %v682_v9  ;;  %v528_v10 = vld [vmem:[%s4313_s29 + $0x4f] sm:$0xff] }
  0x9f   : > { %591 = vrot.lane.b32.xlu1 %v366_v6, %s6109_s21  ;;  %913 = vrot.lane.b32.xlu0 %v446_v7, %s6129_s22  ;;  %v1359_v16 = vsel %vm1358_vm3, %v1331_v11, %v790_v3  ;;  %v456_v11 = vld [vmem:[%s4313_s29 + $0x94] sm:$0xff] }
  0xa0   : > { %v1387_v19 = vsel %vm6132_vm4, %v1359_v16, %v898_v8  ;;  %v333_v16 = vld [vmem:[%s4313_s29 + $0x18] sm:$0xff] }
  0xa1   : > { %v1006_v14 = vpop.permute.xlu1 %1005  ;;  %v576_v15 = vpop.permute.xlu0 %575 }
  0xa2   : > { %v1415_v22 = vsel %vm1414_vm5, %v1387_v19, %v1006_v14  ;;  %v1304_v38 = vsel %vm1302_vm1, %v331_v35, %v576_v15  ;;  %v448_v14 = vld [vmem:[%s4313_s29 + $0x54] sm:$0xff] }
  0xa3   : > { %1021 = vrot.lane.b32.xlu1 %v473_v12, %s6117_s24  ;;  %715 = vrot.lane.b32.xlu0 %v401_v13, %s6115_s23  ;;  %v376_v15 = vld [vmem:[%s4313_s29 + $0x99] sm:$0xff] }
  0xa5   : > { %v1114_v20 = vpop.permute.xlu1 %1113  ;;  %v684_v21 = vpop.permute.xlu0 %683 }
  0xa6   : > { %v1443_v25 = vsel %vm1442_vm6, %v1415_v22, %v1114_v20  ;;  %v1332_v41 = vsel %vm6134_vm2, %v1304_v38, %v684_v21  ;;  %v368_v20 = vld [vmem:[%s4313_s29 + $0x59] sm:$0xff] }
  0xa7   : > { %823 = vrot.lane.b32.xlu1 %v428_v17, %s6123_s17  ;;  %699 = vrot.lane.b32.xlu0 %v393_v18, %s6115_s23  ;;  %v483_v21 = vld [vmem:[%s4313_s29 + $0x95] sm:$0xff] }
  0xa9   : > { %v1222_v26 = vpop.permute.xlu1 %1221  ;;  %v792_v27 = vpop.permute.xlu0 %791 }
  0xaa   : > { %v1471_v28 = vsel %vm1470_vm7, %v1443_v25, %v1222_v26  ;;  %v1360_v44 = vsel %vm1358_vm3, %v1332_v41, %v792_v27  ;;  %v502_v41 = vld [vmem:[%s4313_s29 + $0x56] sm:$0xff] }
  0xab   : > { %807 = vrot.lane.b32.xlu1 %v420_v23, %s6123_s17  ;;  %1129 = vrot.lane.b32.xlu0 %v500_v24, %s6119_s25 }
  0xac   : > { %3903 = vmatmul.mubr.msk.f32.vlgmr.msra.gmra.mxu0 %vm1510_vm8, %v1471_v28  ;;  %v475_v28 = vld [vmem:[%s4313_s29 + $0x55] sm:$0xff] }
  0xad   : > { %v578_v31 = vpop.permute.xlu1 %577  ;;  %v900_v32 = vpop.permute.xlu0 %899  ;;  %3905 = vmatprep.mubr.msk.f32.mxu0 %vm4184_vm0, %v4181_v0 }
  0xae   : > { %v1388_v45 = vsel %vm6132_vm4, %v1360_v44, %v900_v32  ;;  %v1305_v54 = vsel %vm1302_vm1, %v332_v49, %v578_v31  ;;  %v537_v49 = vld [vmem:[%s4313_s29 + $0x97] sm:$0xff] }
  0xaf   : > { %1237 = vrot.lane.b32.xlu1 %v527_v29, %s6125_s26  ;;  %931 = vrot.lane.b32.xlu0 %v455_v30, %s6129_s22  ;;  %v403_v29 = vld [vmem:[%s4313_s29 + $0x9a] sm:$0xff] }
  0xb0   : > { %v334_v30 = vld [vmem:[%s4313_s29 + $0x20] sm:$0xff] }
  0xb1   : > { %v686_v36 = vpop.permute.xlu1 %685  ;;  %v1008_v37 = vpop.permute.xlu0 %1007 }
  0xb2   : > { %v1416_v46 = vsel %vm1414_vm5, %v1388_v45, %v1008_v37  ;;  %v1333_v59 = vsel %vm6134_vm2, %v1305_v54, %v686_v36  ;;  %v395_v36 = vld [vmem:[%s4313_s29 + $0x5a] sm:$0xff] }
  0xb3   : > { %915 = vrot.lane.b32.xlu1 %v447_v33, %s6129_s22  ;;  %609 = vrot.lane.b32.xlu0 %v375_v34, %s6109_s21  ;;  %v510_v37 = vld [vmem:[%s4313_s29 + $0x96] sm:$0xff] }
  0xb4   : > { %v529_v54 = vld [vmem:[%s4313_s29 + $0x57] sm:$0xff] }
  0xb5   : > { %v794_v42 = vpop.permute.xlu1 %793  ;;  %v1116_v43 = vpop.permute.xlu0 %1115 }
  0xb6   : > { %v1444_v50 = vsel %vm1442_vm6, %v1416_v46, %v1116_v43  ;;  %v1361_v1 = vsel %vm1358_vm3, %v1333_v59, %v794_v42  ;;  %v430_v42 = vld [vmem:[%s4313_s29 + $0x9b] sm:$0xff] }
  0xb7   : > { %593 = vrot.lane.b32.xlu1 %v367_v39, %s6109_s21  ;;  %1039 = vrot.lane.b32.xlu0 %v482_v40, %s6117_s24  ;;  %v377_v59 = vld [vmem:[%s4313_s29 + $0xa1] sm:$0xff] }
  0xb9   : > { %v902_v51 = vpop.permute.xlu1 %901  ;;  %v1224_v52 = vpop.permute.xlu0 %1223 }
  0xba   : > { %v1472_v53 = vsel %vm1470_vm7, %v1444_v50, %v1224_v52  ;;  %v1389_v2 = vsel %vm6132_vm4, %v1361_v1, %v902_v51  ;;  %v369_v1 = vld [vmem:[%s4313_s29 + $0x61] sm:$0xff] }
  0xbb   : > { %1023 = vrot.lane.b32.xlu1 %v474_v47, %s6117_s24  ;;  %717 = vrot.lane.b32.xlu0 %v402_v48, %s6115_s23  ;;  %v422_v48 = vld [vmem:[%s4313_s29 + $0x5b] sm:$0xff] }
  0xbc   : > { %3906 = vmatmul.mubr.msk.f32.gmra.mxu0 %vm1510_vm8, %v1472_v53 }
  0xbd   : > { %v1010_v57 = vpop.permute.xlu1 %1009  ;;  %v580_v58 = vpop.permute.xlu0 %579  ;;  %3908 = vmatprep.mubr.msk.f32.mxu0 %vm4184_vm0, %v4181_v0 }
  0xbe   : > { %v1417_v3 = vsel %vm1414_vm5, %v1389_v2, %v1010_v57  ;;  %v1306_v19 = vsel %vm1302_vm1, %v333_v16, %v580_v58  ;;  %v449_v58 = vld [vmem:[%s4313_s29 + $0x5c] sm:$0xff] }
  0xbf   : > { %701 = vrot.lane.b32.xlu1 %v394_v55, %s6115_s23  ;;  %1147 = vrot.lane.b32.xlu0 %v509_v56, %s6119_s25  ;;  %v457_v55 = vld [vmem:[%s4313_s29 + $0x9c] sm:$0xff] }
  0xc0   : > { %v484_v2 = vld [vmem:[%s4313_s29 + $0x9d] sm:$0xff] }
  0xc1   : > { %v1118_v62 = vpop.permute.xlu1 %1117  ;;  %v688_v63 = vpop.permute.xlu0 %687 }
  0xc2   : > { %v1445_v6 = vsel %vm1442_vm6, %v1417_v3, %v1118_v62  ;;  %v1334_v22 = vsel %vm6134_vm2, %v1306_v19, %v688_v63 }
  0xc3   : > { %1131 = vrot.lane.b32.xlu1 %v501_v60, %s6119_s25  ;;  %825 = vrot.lane.b32.xlu0 %v429_v61, %s6123_s17  ;;  %v335_v60 = vld [vmem:[%s4313_s29 + $0x28] sm:$0xff] }
  0xc5   : > { %v1226_v7 = vpop.permute.xlu1 %1225  ;;  %v796_v8 = vpop.permute.xlu0 %795 }
  0xc6   : > { %v1473_v9 = vsel %vm1470_vm7, %v1445_v6, %v1226_v7  ;;  %v1362_v25 = vsel %vm1358_vm3, %v1334_v22, %v796_v8  ;;  %v503_v22 = vld [vmem:[%s4313_s29 + $0x5e] sm:$0xff] }
  0xc7   : > { %809 = vrot.lane.b32.xlu1 %v421_v4, %s6123_s17  ;;  %1255 = vrot.lane.b32.xlu0 %v536_v5, %s6125_s26 }
  0xc8   : > { %3909 = vmatmul.mubr.msk.f32.gmra.mxu0 %vm1510_vm8, %v1473_v9  ;;  %v476_v9 = vld [vmem:[%s4313_s29 + $0x5d] sm:$0xff] }
  0xc9   : > { %v582_v12 = vpop.permute.xlu1 %581  ;;  %v904_v13 = vpop.permute.xlu0 %903  ;;  %3911 = vmatprep.mubr.msk.f32.mxu0 %vm4184_vm0, %v4181_v0 }
  0xca   : > { %v1390_v26 = vsel %vm6132_vm4, %v1362_v25, %v904_v13  ;;  %v1307_v35 = vsel %vm1302_vm1, %v334_v30, %v582_v12  ;;  %v538_v30 = vld [vmem:[%s4313_s29 + $0x9f] sm:$0xff] }
  0xcb   : > { %1239 = vrot.lane.b32.xlu1 %v528_v10, %s6125_s26  ;;  %933 = vrot.lane.b32.xlu0 %v456_v11, %s6129_s22  ;;  %v404_v10 = vld [vmem:[%s4313_s29 + $0xa2] sm:$0xff]  ;;  %v336_v11 = vld [vmem:[%s4313_s29 + $0x30] sm:$0xff] }
  0xcd   : > { %v690_v17 = vpop.permute.xlu1 %689  ;;  %v1012_v18 = vpop.permute.xlu0 %1011 }
  0xce   : > { %v1418_v27 = vsel %vm1414_vm5, %v1390_v26, %v1012_v18  ;;  %v1335_v40 = vsel %vm6134_vm2, %v1307_v35, %v690_v17  ;;  %v396_v17 = vld [vmem:[%s4313_s29 + $0x62] sm:$0xff] }
  0xcf   : > { %917 = vrot.lane.b32.xlu1 %v448_v14, %s6129_s22  ;;  %611 = vrot.lane.b32.xlu0 %v376_v15, %s6109_s21  ;;  %v511_v18 = vld [vmem:[%s4313_s29 + $0x9e] sm:$0xff] }
  0xd0   : > { %v530_v35 = vld [vmem:[%s4313_s29 + $0x5f] sm:$0xff] }
  0xd1   : > { %v798_v23 = vpop.permute.xlu1 %797  ;;  %v1120_v24 = vpop.permute.xlu0 %1119 }
  0xd2   : > { %v1446_v31 = vsel %vm1442_vm6, %v1418_v27, %v1120_v24  ;;  %v1363_v45 = vsel %vm1358_vm3, %v1335_v40, %v798_v23  ;;  %v431_v23 = vld [vmem:[%s4313_s29 + $0xa3] sm:$0xff] }
  0xd3   : > { %595 = vrot.lane.b32.xlu1 %v368_v20, %s6109_s21  ;;  %1041 = vrot.lane.b32.xlu0 %v483_v21, %s6117_s24  ;;  %v378_v40 = vld [vmem:[%s4313_s29 + $0xa9] sm:$0xff] }
  0xd5   : > { %v906_v32 = vpop.permute.xlu1 %905  ;;  %v1228_v33 = vpop.permute.xlu0 %1227 }
  0xd6   : > { %v1474_v34 = vsel %vm1470_vm7, %v1446_v31, %v1228_v33  ;;  %v1391_v46 = vsel %vm6132_vm4, %v1363_v45, %v906_v32  ;;  %v370_v45 = vld [vmem:[%s4313_s29 + $0x69] sm:$0xff] }
  0xd7   : > { %1025 = vrot.lane.b32.xlu1 %v475_v28, %s6117_s24  ;;  %719 = vrot.lane.b32.xlu0 %v403_v29, %s6115_s23  ;;  %v423_v29 = vld [vmem:[%s4313_s29 + $0x63] sm:$0xff] }
  0xd8   : > { %3912 = vmatmul.mubr.msk.f32.gmra.mxu0 %vm1510_vm8, %v1474_v34 }
  0xd9   : > { %v1014_v38 = vpop.permute.xlu1 %1013  ;;  %v584_v39 = vpop.permute.xlu0 %583  ;;  %3914 = vmatprep.mubr.msk.f32.mxu0 %vm4184_vm0, %v4181_v0 }
  0xda   : > { %v1419_v47 = vsel %vm1414_vm5, %v1391_v46, %v1014_v38  ;;  %v1308_v63 = vsel %vm1302_vm1, %v335_v60, %v584_v39  ;;  %v450_v39 = vld [vmem:[%s4313_s29 + $0x64] sm:$0xff] }
  0xdb   : > { %703 = vrot.lane.b32.xlu1 %v395_v36, %s6115_s23  ;;  %1149 = vrot.lane.b32.xlu0 %v510_v37, %s6119_s25  ;;  %v458_v36 = vld [vmem:[%s4313_s29 + $0xa4] sm:$0xff] }
  0xdc   : > { %v485_v46 = vld [vmem:[%s4313_s29 + $0xa5] sm:$0xff] }
  0xdd   : > { %v1122_v43 = vpop.permute.xlu1 %1121  ;;  %v692_v44 = vpop.permute.xlu0 %691  ;;  %v512_v60 = vld [vmem:[%s4313_s29 + $0xa6] sm:$0xff] }
  0xde   : > { %v1447_v50 = vsel %vm1442_vm6, %v1419_v47, %v1122_v43  ;;  %v1336_v3 = vsel %vm6134_vm2, %v1308_v63, %v692_v44  ;;  %v504_v63 = vld [vmem:[%s4313_s29 + $0x66] sm:$0xff] }
  0xdf   : > { %1133 = vrot.lane.b32.xlu1 %v502_v41, %s6119_s25  ;;  %827 = vrot.lane.b32.xlu0 %v430_v42, %s6123_s17  ;;  %v337_v41 = vld [vmem:[%s4313_s29 + $0x38] sm:$0xff] }
  0xe1   : > { %v1230_v51 = vpop.permute.xlu1 %1229  ;;  %v800_v52 = vpop.permute.xlu0 %799 }
  0xe2   : > { %v1475_v53 = vsel %vm1470_vm7, %v1447_v50, %v1230_v51  ;;  %v1364_v6 = vsel %vm1358_vm3, %v1336_v3, %v800_v52 }
  0xe3   : > { %811 = vrot.lane.b32.xlu1 %v422_v48, %s6123_s17  ;;  %1257 = vrot.lane.b32.xlu0 %v537_v49, %s6125_s26 }
  0xe4   : > { %3915 = vmatmul.mubr.msk.f32.gmra.mxu0 %vm1510_vm8, %v1475_v53  ;;  %v477_v53 = vld [vmem:[%s4313_s29 + $0x65] sm:$0xff] }
  0xe5   : > { %v586_v56 = vpop.permute.xlu1 %585  ;;  %v908_v57 = vpop.permute.xlu0 %907  ;;  %3917 = vmatprep.mubr.msk.f32.mxu0 %vm4184_vm0, %v4181_v0 }
  0xe6   : > { %v1392_v7 = vsel %vm6132_vm4, %v1364_v6, %v908_v57  ;;  %v1309_v16 = vsel %vm1302_vm1, %v336_v11, %v586_v56  ;;  %v424_v6 = vld [vmem:[%s4313_s29 + $0x6b] sm:$0xff] }
  0xe7   : > { %1241 = vrot.lane.b32.xlu1 %v529_v54, %s6125_s26  ;;  %935 = vrot.lane.b32.xlu0 %v457_v55, %s6129_s22  ;;  %v405_v54 = vld [vmem:[%s4313_s29 + $0xaa] sm:$0xff] }
  0xe8   : > { %v531_v11 = vld [vmem:[%s4313_s29 + $0x67] sm:$0xff] }
  0xe9   : > { %v694_v61 = vpop.permute.xlu1 %693  ;;  %v1016_v62 = vpop.permute.xlu0 %1015 }
  0xea   : > { %v1420_v8 = vsel %vm1414_vm5, %v1392_v7, %v1016_v62  ;;  %v1337_v21 = vsel %vm6134_vm2, %v1309_v16, %v694_v61  ;;  %v539_v7 = vld [vmem:[%s4313_s29 + $0xa7] sm:$0xff] }
  0xeb   : > { %919 = vrot.lane.b32.xlu1 %v449_v58, %s6129_s22  ;;  %613 = vrot.lane.b32.xlu0 %v377_v59, %s6109_s21  ;;  %v397_v59 = vld [vmem:[%s4313_s29 + $0x6a] sm:$0xff] }
  0xed   : > { %v802_v4 = vpop.permute.xlu1 %801  ;;  %v1124_v5 = vpop.permute.xlu0 %1123 }
  0xee   : > { %v1448_v12 = vsel %vm1442_vm6, %v1420_v8, %v1124_v5  ;;  %v1365_v26 = vsel %vm1358_vm3, %v1337_v21, %v802_v4 }
  0xef   : > { %597 = vrot.lane.b32.xlu1 %v369_v1, %s6109_s21  ;;  %1043 = vrot.lane.b32.xlu0 %v484_v2, %s6117_s24  ;;  %v432_v1 = vld [vmem:[%s4313_s29 + $0xab] sm:$0xff]  ;;  %v338_v2 = vld [vmem:[%s4313_s29 + $0x40] sm:$0xff] }
  0xf1   : > { %v910_v13 = vpop.permute.xlu1 %909  ;;  %v1232_v14 = vpop.permute.xlu0 %1231 }
  0xf2   : > { %v1476_v15 = vsel %vm1470_vm7, %v1448_v12, %v1232_v14  ;;  %v1393_v27 = vsel %vm6132_vm4, %v1365_v26, %v910_v13  ;;  %v459_v12 = vld [vmem:[%s4313_s29 + $0xac] sm:$0xff] }
  0xf3   : > { %1027 = vrot.lane.b32.xlu1 %v476_v9, %s6117_s24  ;;  %721 = vrot.lane.b32.xlu0 %v404_v10, %s6115_s23 }
  0xf4   : > { %3918 = vmatmul.mubr.msk.f32.gmra.mxu0 %vm1510_vm8, %v1476_v15 }
  0xf5   : > { %v1018_v19 = vpop.permute.xlu1 %1017  ;;  %v588_v20 = vpop.permute.xlu0 %587  ;;  %3920 = vmatprep.mubr.msk.f32.mxu0 %vm4184_vm0, %v4181_v0 }
  0xf6   : > { %v1421_v28 = vsel %vm1414_vm5, %v1393_v27, %v1018_v19  ;;  %v1310_v44 = vsel %vm1302_vm1, %v337_v41, %v588_v20  ;;  %v379_v19 = vld [vmem:[%s4313_s29 + $0xb1] sm:$0xff] }
  0xf7   : > { %705 = vrot.lane.b32.xlu1 %v396_v17, %s6115_s23  ;;  %1151 = vrot.lane.b32.xlu0 %v511_v18, %s6119_s25  ;;  %v451_v18 = vld [vmem:[%s4313_s29 + $0x6c] sm:$0xff] }
  0xf9   : > { %v1126_v24 = vpop.permute.xlu1 %1125  ;;  %v696_v25 = vpop.permute.xlu0 %695 }
  0xfa   : > { %v1449_v31 = vsel %vm1442_vm6, %v1421_v28, %v1126_v24  ;;  %v1338_v47 = vsel %vm6134_vm2, %v1310_v44, %v696_v25  ;;  %v371_v24 = vld [vmem:[%s4313_s29 + $0x71] sm:$0xff] }
  0xfb   : > { %1135 = vrot.lane.b32.xlu1 %v503_v22, %s6119_s25  ;;  %829 = vrot.lane.b32.xlu0 %v431_v23, %s6123_s17  ;;  %v486_v25 = vld [vmem:[%s4313_s29 + $0xad] sm:$0xff] }
  0xfc   : > { %v478_v28 = vld [vmem:[%s4313_s29 + $0x6d] sm:$0xff] }
  0xfd   : > { %v1234_v32 = vpop.permute.xlu1 %1233  ;;  %v804_v33 = vpop.permute.xlu0 %803  ;;  %v540_v44 = vld [vmem:[%s4313_s29 + $0xaf] sm:$0xff] }
  0xfe   : > { %v1477_v34 = vsel %vm1470_vm7, %v1449_v31, %v1234_v32  ;;  %v1366_v50 = vsel %vm1358_vm3, %v1338_v47, %v804_v33  ;;  %v398_v32 = vld [vmem:[%s4313_s29 + $0x72] sm:$0xff] }
  0xff   : > { %813 = vrot.lane.b32.xlu1 %v423_v29, %s6123_s17  ;;  %1259 = vrot.lane.b32.xlu0 %v538_v30, %s6125_s26  ;;  %v406_v29 = vld [vmem:[%s4313_s29 + $0xb2] sm:$0xff] }
 0x100   : > { %3921 = vmatmul.mubr.msk.f32.gmra.mxu0 %vm1510_vm8, %v1477_v34  ;;  %v513_v33 = vld [vmem:[%s4313_s29 + $0xae] sm:$0xff] }
 0x101   : > { %v590_v37 = vpop.permute.xlu1 %589  ;;  %v912_v38 = vpop.permute.xlu0 %911  ;;  %3923 = vmatprep.mubr.msk.f32.mxu0 %vm4184_vm0, %v4181_v0 }
 0x102   : > { %v1394_v51 = vsel %vm6132_vm4, %v1366_v50, %v912_v38  ;;  %v1311_v5 = vsel %vm1302_vm1, %v338_v2, %v590_v37  ;;  %v505_v37 = vld [vmem:[%s4313_s29 + $0x6e] sm:$0xff] }
 0x103   : > { %1243 = vrot.lane.b32.xlu1 %v530_v35, %s6125_s26  ;;  %937 = vrot.lane.b32.xlu0 %v458_v36, %s6129_s22  ;;  %v347_v36 = vld [vmem:[%s4313_s29 + $0x88] sm:$0xff]  ;;  %v433_v38 = vld [vmem:[%s4313_s29 + $0xb3] sm:$0xff] }
 0x105   : > { %v698_v42 = vpop.permute.xlu1 %697  ;;  %v1020_v43 = vpop.permute.xlu0 %1019 }
 0x106   : > { %v1422_v52 = vsel %vm1414_vm5, %v1394_v51, %v1020_v43  ;;  %v1339_v10 = vsel %vm6134_vm2, %v1311_v5, %v698_v42  ;;  %v339_v42 = vld [vmem:[%s4313_s29 + $0x48] sm:$0xff]  ;;  %v425_v43 = vld [vmem:[%s4313_s29 + $0x73] sm:$0xff] }
 0x107   : > { %921 = vrot.lane.b32.xlu1 %v450_v39, %s6129_s22  ;;  %615 = vrot.lane.b32.xlu0 %v378_v40, %s6109_s21  ;;  %v372_v5 = vld [vmem:[%s4313_s29 + $0x79] sm:$0xff] }
 0x109   : > { %v806_v48 = vpop.permute.xlu1 %805  ;;  %v1128_v49 = vpop.permute.xlu0 %1127 }
 0x10a   : > { %v1450_v55 = vsel %vm1442_vm6, %v1422_v52, %v1128_v49  ;;  %v1367_v15 = vsel %vm1358_vm3, %v1339_v10, %v806_v48  ;;  %v532_v52 = vld [vmem:[%s4313_s29 + $0x6f] sm:$0xff]  ;;  %v407_v10 = vld [vmem:[%s4313_s29 + $0xba] sm:$0xff] }
 0x10b   : > { %599 = vrot.lane.b32.xlu1 %v370_v45, %s6109_s21  ;;  %1045 = vrot.lane.b32.xlu0 %v485_v46, %s6117_s24 }
 0x10d   : > { %v4652_v56 = vpop.permute.xlu1 %607  ;;  %v1236_v57 = vpop.permute.xlu0 %1235 }
 0x10e   : > { %v1478_v58 = vsel %vm1470_vm7, %v1450_v55, %v1236_v57  ;;  %v1320_v41 = vsel %vm1302_vm1, %v347_v36, %v4652_v56 }
 0x10f   : > { %1029 = vrot.lane.b32.xlu1 %v477_v53, %s6117_s24  ;;  %723 = vrot.lane.b32.xlu0 %v405_v54, %s6115_s23  ;;  %v460_v53 = vld [vmem:[%s4313_s29 + $0xb4] sm:$0xff] }
 0x110   : > { %3924 = vmatmul.mubr.msk.f32.gmra.mxu0 %vm1510_vm8, %v1478_v58 }
 0x111   : > { %v4660_v61 = vpop.permute.xlu1 %591  ;;  %v914_v62 = vpop.permute.xlu0 %913  ;;  %3926 = vmatprep.mubr.msk.f32.mxu0 %vm4184_vm0, %v4181_v0 }
 0x112   : > { %v1395_v16 = vsel %vm6132_vm4, %v1367_v15, %v914_v62  ;;  %v1312_v48 = vsel %vm1302_vm1, %v339_v42, %v4660_v61  ;;  %v452_v62 = vld [vmem:[%s4313_s29 + $0x74] sm:$0xff] }
 0x113   : > { %707 = vrot.lane.b32.xlu1 %v397_v59, %s6115_s23  ;;  %1153 = vrot.lane.b32.xlu0 %v512_v60, %s6119_s25 }
 0x115   : > { %v1022_v3 = vpop.permute.xlu1 %1021  ;;  %v716_v4 = vpop.permute.xlu0 %715 }
 0x116   : > { %v1423_v17 = vsel %vm1414_vm5, %v1395_v16, %v1022_v3  ;;  %v1348_v45 = vsel %vm6134_vm2, %v1320_v41, %v716_v4 }
 0x117   : > { %1137 = vrot.lane.b32.xlu1 %v504_v63, %s6119_s25  ;;  %831 = vrot.lane.b32.xlu0 %v432_v1, %s6123_s17  ;;  %v380_v63 = vld [vmem:[%s4313_s29 + $0xb9] sm:$0xff] }
 0x119   : > { %v824_v8 = vpop.permute.xlu1 %823  ;;  %v4674_v9 = vpop.permute.xlu0 %699 }
 0x11a   : > { %v1376_v49 = vsel %vm1358_vm3, %v1348_v45, %v824_v8  ;;  %v1340_v54 = vsel %vm6134_vm2, %v1312_v48, %v4674_v9  ;;  %v479_v9 = vld [vmem:[%s4313_s29 + $0x75] sm:$0xff] }
 0x11b   : > { %815 = vrot.lane.b32.xlu1 %v424_v6, %s6123_s17  ;;  %1261 = vrot.lane.b32.xlu0 %v539_v7, %s6125_s26  ;;  %v487_v6 = vld [vmem:[%s4313_s29 + $0xb5] sm:$0xff] }
 0x11d   : > { %v808_v13 = vpop.permute.xlu1 %807  ;;  %v1130_v14 = vpop.permute.xlu0 %1129 }
 0x11e   : > { %v1451_v20 = vsel %vm1442_vm6, %v1423_v17, %v1130_v14  ;;  %v1368_v58 = vsel %vm1358_vm3, %v1340_v54, %v808_v13  ;;  %v399_v13 = vld [vmem:[%s4313_s29 + $0x7a] sm:$0xff]  ;;  %v408_v54 = vld [vmem:[%s4313_s29 + $0xc2] sm:$0xff] }
 0x11f   : > { %1245 = vrot.lane.b32.xlu1 %v531_v11, %s6125_s26  ;;  %939 = vrot.lane.b32.xlu0 %v459_v12, %s6129_s22  ;;  %v514_v14 = vld [vmem:[%s4313_s29 + $0xb6] sm:$0xff] }
 0x120   : > { %v506_v17 = vld [vmem:[%s4313_s29 + $0x76] sm:$0xff] }
 0x121   : > { %v1238_v21 = vpop.permute.xlu1 %1237  ;;  %v932_v22 = vpop.permute.xlu0 %931 }
 0x122   : > { %v1479_v23 = vsel %vm1470_vm7, %v1451_v20, %v1238_v21  ;;  %v1404_v50 = vsel %vm6132_vm4, %v1376_v49, %v932_v22  ;;  %v340_v22 = vld [vmem:[%s4313_s29 + $0x50] sm:$0xff]  ;;  %v373_v49 = vld [vmem:[%s4313_s29 + $0x81] sm:$0xff] }
 0x123   : > { %923 = vrot.lane.b32.xlu1 %v451_v18, %s6129_s22  ;;  %617 = vrot.lane.b32.xlu0 %v379_v19, %s6109_s21  ;;  %v434_v18 = vld [vmem:[%s4313_s29 + $0xbb] sm:$0xff]  ;;  %v348_v19 = vld [vmem:[%s4313_s29 + $0x90] sm:$0xff] }
 0x124   : > { %3927 = vmatmul.mubr.msk.f32.gmra.mxu0 %vm1510_vm8, %v1479_v23 }
 0x125   : > { %v916_v26 = vpop.permute.xlu1 %915  ;;  %v4695_v27 = vpop.permute.xlu0 %609  ;;  %3929 = vmatprep.mubr.msk.f32.mxu0 %vm4184_vm0, %v4181_v0 }
 0x126   : > { %v1396_v60 = vsel %vm6132_vm4, %v1368_v58, %v916_v26  ;;  %v1321_v23 = vsel %vm1302_vm1, %v348_v19, %v4695_v27  ;;  %v515_v58 = vld [vmem:[%s4313_s29 + $0xbe] sm:$0xff] }
 0x127   : > { %601 = vrot.lane.b32.xlu1 %v371_v24, %s6109_s21  ;;  %1047 = vrot.lane.b32.xlu0 %v486_v25, %s6117_s24  ;;  %v426_v24 = vld [vmem:[%s4313_s29 + $0x7b] sm:$0xff] }
 0x128   : > { %v541_v25 = vld [vmem:[%s4313_s29 + $0xb7] sm:$0xff] }
 0x129   : > { %v4703_v30 = vpop.permute.xlu1 %593  ;;  %v1040_v31 = vpop.permute.xlu0 %1039 }
 0x12a   : > { %v1432_v51 = vsel %vm1414_vm5, %v1404_v50, %v1040_v31  ;;  %v1313_v31 = vsel %vm1302_vm1, %v340_v22, %v4703_v30  ;;  %v488_v50 = vld [vmem:[%s4313_s29 + $0xbd] sm:$0xff] }
 0x12b   : > { %1031 = vrot.lane.b32.xlu1 %v478_v28, %s6117_s24  ;;  %725 = vrot.lane.b32.xlu0 %v406_v29, %s6115_s23  ;;  %v462_v22 = vld [vmem:[%s4313_s29 + $0xc4] sm:$0xff] }
 0x12d   : > { %v1024_v34 = vpop.permute.xlu1 %1023  ;;  %v4709_v35 = vpop.permute.xlu0 %717 }
 0x12e   : > { %v1424_v61 = vsel %vm1414_vm5, %v1396_v60, %v1024_v34  ;;  %v1349_v26 = vsel %vm6134_vm2, %v1321_v23, %v4709_v35  ;;  %v533_v34 = vld [vmem:[%s4313_s29 + $0x77] sm:$0xff] }
 0x12f   : > { %709 = vrot.lane.b32.xlu1 %v398_v32, %s6115_s23  ;;  %1155 = vrot.lane.b32.xlu0 %v513_v33, %s6119_s25  ;;  %v461_v35 = vld [vmem:[%s4313_s29 + $0xbc] sm:$0xff] }
 0x131   : > { %v4716_v39 = vpop.permute.xlu1 %701  ;;  %v1148_v40 = vpop.permute.xlu0 %1147 }
 0x132   : > { %v1460_v55 = vsel %vm1442_vm6, %v1432_v51, %v1148_v40  ;;  %v1341_v36 = vsel %vm6134_vm2, %v1313_v31, %v4716_v39  ;;  %v454_v31 = vld [vmem:[%s4313_s29 + $0x84] sm:$0xff] }
 0x133   : > { %1139 = vrot.lane.b32.xlu1 %v505_v37, %s6119_s25  ;;  %833 = vrot.lane.b32.xlu0 %v433_v38, %s6123_s17 }
 0x135   : > { %v1132_v46 = vpop.permute.xlu1 %1131  ;;  %v4726_v47 = vpop.permute.xlu0 %825 }
 0x136   : > { %v1452_v1 = vsel %vm1442_vm6, %v1424_v61, %v1132_v46  ;;  %v1377_v32 = vsel %vm1358_vm3, %v1349_v26, %v4726_v47  ;;  %v507_v61 = vld [vmem:[%s4313_s29 + $0x7e] sm:$0xff] }
 0x137   : > { %817 = vrot.lane.b32.xlu1 %v425_v43, %s6123_s17  ;;  %1263 = vrot.lane.b32.xlu0 %v540_v44, %s6125_s26  ;;  %v453_v43 = vld [vmem:[%s4313_s29 + $0x7c] sm:$0xff] }
 0x138   : > { %v381_v44 = vld [vmem:[%s4313_s29 + $0xc1] sm:$0xff] }
 0x139   : > { %v4740_v56 = vpop.permute.xlu1 %809  ;;  %v1256_v57 = vpop.permute.xlu0 %1255 }
 0x13a   : > { %v1488_v59 = vsel %vm1470_vm7, %v1460_v55, %v1256_v57  ;;  %v1369_v40 = vsel %vm1358_vm3, %v1341_v36, %v4740_v56  ;;  %v400_v57 = vld [vmem:[%s4313_s29 + $0x82] sm:$0xff]  ;;  %v409_v36 = vld [vmem:[%s4313_s29 + $0xca] sm:$0xff] }
 0x13b   : > { %1247 = vrot.lane.b32.xlu1 %v532_v52, %s6125_s26  ;;  %941 = vrot.lane.b32.xlu0 %v460_v53, %s6129_s22  ;;  %v480_v53 = vld [vmem:[%s4313_s29 + $0x7d] sm:$0xff] }
 0x13c   : > { %3954 = vmatmul.mubr.msk.f32.vlgmr.msra.gmra.mxu1 %vm1510_vm8, %v1488_v59 }
 0x13d   : > { %v1240_v2 = vpop.permute.xlu1 %1239  ;;  %v934_v3 = vpop.permute.xlu0 %933  ;;  %3956 = vmatprep.mubr.msk.f32.mxu1 %vm4184_vm0, %v4181_v0 }
 0x13e   : > { %v1480_v4 = vsel %vm1470_vm7, %v1452_v1, %v1240_v2  ;;  %v1405_v33 = vsel %vm6132_vm4, %v1377_v32, %v934_v3  ;;  %v4854_v3 = vld [vmem:[%s6156_s2] ss:$0 sm:$0xff]  ;;  %v382_v32 = vld [vmem:[%s4313_s29 + $0xc9] sm:$0xff] }
 0x13f   : > { %925 = vrot.lane.b32.xlu1 %v452_v62, %s6129_s22  ;;  %619 = vrot.lane.b32.xlu0 %v380_v63, %s6109_s21  ;;  %v435_v62 = vld [vmem:[%s4313_s29 + $0xc3] sm:$0xff]  ;;  %v349_v63 = vld [vmem:[%s4313_s29 + $0x98] sm:$0xff] }
 0x140   : > { %3930 = vmatmul.mubr.msk.f32.gmra.mxu0 %vm1510_vm8, %v1480_v4  ;;  %v341_v4 = vld [vmem:[%s4313_s29 + $0x58] sm:$0xff] }
 0x141   : > { %v918_v7 = vpop.permute.xlu1 %917  ;;  %v4760_v8 = vpop.permute.xlu0 %611  ;;  %3932 = vmatprep.mubr.msk.f32.mxu0 %vm4184_vm0, %v4181_v0 }
 0x142   : > { %v1397_v42 = vsel %vm6132_vm4, %v1369_v40, %v918_v7  ;;  %v427_v7 = vld [vmem:[%s4313_s29 + $0x83] sm:$0xff] }
 0x143   : > { %603 = vrot.lane.b32.xlu1 %v372_v5, %s6109_s21  ;;  %1049 = vrot.lane.b32.xlu0 %v487_v6, %s6117_s24  ;;  %v1322_v5 = vsel %vm1302_vm1, %v349_v63, %v4760_v8  ;;  %v383_v63 = vld [vmem:[%s4313_s29 + $0xd1] sm:$0x1] }
 0x145   : > { %v4768_v11 = vpop.permute.xlu1 %595  ;;  %v1042_v12 = vpop.permute.xlu0 %1041 }
 0x146   : > { %v1433_v27 = vsel %vm1414_vm5, %v1405_v33, %v1042_v12 }
 0x147   : > { %1033 = vrot.lane.b32.xlu1 %v479_v9, %s6117_s24  ;;  %727 = vrot.lane.b32.xlu0 %v407_v10, %s6115_s23  ;;  %v542_v9 = vld [vmem:[%s4313_s29 + $0xbf] sm:$0xff] }
 0x149   : > { %v1026_v15 = vpop.permute.xlu1 %1025  ;;  %v4774_v16 = vpop.permute.xlu0 %719 }
 0x14a   : > { %v1425_v39 = vsel %vm1414_vm5, %v1397_v42, %v1026_v15  ;;  %v1350_v10 = vsel %vm6134_vm2, %v1322_v5, %v4774_v16  ;;  %v1314_v15 = vsel %vm1302_vm1, %v341_v4, %v4768_v11  ;;  %v481_v42 = vld [vmem:[%s4313_s29 + $0x85] sm:$0xff] }
 0x14b   : > { %711 = vrot.lane.b32.xlu1 %v399_v13, %s6115_s23  ;;  %1157 = vrot.lane.b32.xlu0 %v514_v14, %s6119_s25 }
 0x14d   : > { %v4781_v20 = vpop.permute.xlu1 %703  ;;  %v1150_v21 = vpop.permute.xlu0 %1149 }
 0x14e   : > { %v1461_v30 = vsel %vm1442_vm6, %v1433_v27, %v1150_v21  ;;  %v534_v21 = vld [vmem:[%s4313_s29 + $0x7f] sm:$0xff]  ;;  %v1342_v11 = vsel %vm6134_vm2, %v1314_v15, %v4781_v20 }
 0x14f   : > { %1141 = vrot.lane.b32.xlu1 %v506_v17, %s6119_s25  ;;  %835 = vrot.lane.b32.xlu0 %v434_v18, %s6123_s17 }
 0x151   : > { %v1134_v28 = vpop.permute.xlu1 %1133  ;;  %v4792_v29 = vpop.permute.xlu0 %827 }
 0x152   : > { %v1453_v45 = vsel %vm1442_vm6, %v1425_v39, %v1134_v28  ;;  %v1378_v17 = vsel %vm1358_vm3, %v1350_v10, %v4792_v29 }
 0x153   : > { %819 = vrot.lane.b32.xlu1 %v426_v24, %s6123_s17  ;;  %1265 = vrot.lane.b32.xlu0 %v541_v25, %s6125_s26 }
 0x155   : > { %v4807_v37 = vpop.permute.xlu1 %811  ;;  %v1258_v38 = vpop.permute.xlu0 %1257 }
 0x156   : > { %v1489_v41 = vsel %vm1470_vm7, %v1461_v30, %v1258_v38  ;;  %v1370_v26 = vsel %vm1358_vm3, %v1342_v11, %v4807_v37  ;;  %v489_v30 = vld [vmem:[%s4313_s29 + $0xc5] sm:$0xff] }
 0x157   : > { %1249 = vrot.lane.b32.xlu1 %v533_v34, %s6125_s26  ;;  %943 = vrot.lane.b32.xlu0 %v461_v35, %s6129_s22 }
 0x158   : > { %3957 = vmatmul.mubr.msk.f32.gmra.mxu1 %vm1510_vm8, %v1489_v41  ;;  %v516_v41 = vld [vmem:[%s4313_s29 + $0xc6] sm:$0xff] }
 0x159   : > { %v1242_v46 = vpop.permute.xlu1 %1241  ;;  %v936_v47 = vpop.permute.xlu0 %935  ;;  %3959 = vmatprep.mubr.msk.f32.mxu1 %vm4184_vm0, %v4181_v0 }
 0x15a   : > { %v1481_v48 = vsel %vm1470_vm7, %v1453_v45, %v1242_v46  ;;  %v1406_v18 = vsel %vm6132_vm4, %v1378_v17, %v936_v47  ;;  %v508_v47 = vld [vmem:[%s4313_s29 + $0x86] sm:$0xff] }
 0x15b   : > { %927 = vrot.lane.b32.xlu1 %v453_v43, %s6129_s22  ;;  %621 = vrot.lane.b32.xlu0 %v381_v44, %s6109_s21 }
 0x15c   : > { %3933 = vmatmul.mubr.msk.f32.gmra.mxu0 %vm1510_vm8, %v1481_v48  ;;  %v436_v48 = vld [vmem:[%s4313_s29 + $0xcb] sm:$0xff] }
 0x15d   : > { %v920_v51 = vpop.permute.xlu1 %919  ;;  %v4828_v52 = vpop.permute.xlu0 %613  ;;  %3935 = vmatprep.mubr.msk.f32.mxu0 %vm4184_vm0, %v4181_v0 }
 0x15e   : > { %v1398_v29 = vsel %vm6132_vm4, %v1370_v26, %v920_v51  ;;  %v463_v51 = vld [vmem:[%s4313_s29 + $0xcc] sm:$0xff] }
 0x15f   : > { %605 = vrot.lane.b32.xlu1 %v373_v49, %s6109_s21  ;;  %1051 = vrot.lane.b32.xlu0 %v488_v50, %s6117_s24  ;;  %v544_v26 = vld [vmem:[%s4313_s29 + $0xcf] sm:$0xff] }
 0x161   : > { %v4836_v55 = vpop.permute.xlu1 %597  ;;  %v1044_v56 = vpop.permute.xlu0 %1043 }
 0x162   : > { %v1434_v16 = vsel %vm1414_vm5, %v1406_v18, %v1044_v56 }
 0x163   : > { %1035 = vrot.lane.b32.xlu1 %v480_v53, %s6117_s24  ;;  %729 = vrot.lane.b32.xlu0 %v408_v54, %s6115_s23  ;;  %v543_v53 = vld [vmem:[%s4313_s29 + $0xc7] sm:$0xff] }
 0x164   : > { %v350_v54 = vld [vmem:[%s4313_s29 + $0xa0] sm:$0xff] }
 0x165   : > { %v1028_v59 = vpop.permute.xlu1 %1027  ;;  %v4842_v60 = vpop.permute.xlu0 %721 }
 0x166   : > { %v1426_v20 = vsel %vm1414_vm5, %v1398_v29, %v1028_v59  ;;  %v1323_v59 = vsel %vm1302_vm1, %v350_v54, %v4828_v52 }
 0x167   : > { %713 = vrot.lane.b32.xlu1 %v400_v57, %s6115_s23  ;;  %1159 = vrot.lane.b32.xlu0 %v515_v58, %s6119_s25  ;;  %v342_v58 = vld [vmem:[%s4313_s29 + $0x60] sm:$0xff] }
 0x169   : > { %v4849_v1 = vpop.permute.xlu1 %705  ;;  %v1152_v2 = vpop.permute.xlu0 %1151 }
 0x16a   : > { %v1462_v23 = vsel %vm1442_vm6, %v1434_v16, %v1152_v2  ;;  %v1351_v2 = vsel %vm6134_vm2, %v1323_v59, %v4842_v60 }
 0x16b   : > { %1143 = vrot.lane.b32.xlu1 %v507_v61, %s6119_s25  ;;  %837 = vrot.lane.b32.xlu0 %v435_v62, %s6123_s17  ;;  %v535_v62 = vld [vmem:[%s4313_s29 + $0x87] sm:$0xff] }
 0x16c   : > { %v1658_v6 = vpop.f32.mrf.mxu0 }
 0x16d   : > { %v1659_v12 = vadd.f32 %v4854_v3, %v1658_v6  ;;  %v1136_v13 = vpop.permute.xlu1 %1135  ;;  %v4866_v14 = vpop.permute.xlu0 %829 }
 0x16e   : > { %v3904_v8 = vpop.f32.mrf.mxu0  ;;  %v1454_v33 = vsel %vm1442_vm6, %v1426_v20, %v1136_v13  ;;  %v490_v13 = vld [vmem:[%s4313_s29 + $0xcd] sm:$0xff] }
 0x16f   : > { %v1792_v19 = vmax.f32 %v1659_v12, 0.0  ;;  %821 = vrot.lane.b32.xlu1 %v427_v7, %s6123_s17  ;;  %1267 = vrot.lane.b32.xlu0 %v542_v9, %s6125_s26  ;;  %v1315_v7 = vsel %vm1302_vm1, %v342_v58, %v4836_v55  ;;  %v1379_v9 = vsel %vm1358_vm3, %v1351_v2, %v4866_v14  ;;  %v410_v8 = vld [vmem:[%s4313_s29 + $0xd2] sm:$0x1]  ;;  %v464_v20 = vld [vmem:[%s4313_s29 + $0xd4] sm:$0x1] }
 0x170   : > { %v1343_v15 = vsel %vm6134_vm2, %v1315_v7, %v4849_v1 }
 0x171   : > { %1819 = vst.msk [vmem:[#allocation2] sm:$0xff] %vm1302_vm1, %v1792_v19  ;;  %v4882_v24 = vpop.permute.xlu1 %813  ;;  %v1260_v25 = vpop.permute.xlu0 %1259 }
 0x172   : > { %v1490_v28 = vsel %vm1470_vm7, %v1462_v23, %v1260_v25  ;;  %v1371_v18 = vsel %vm1358_vm3, %v1343_v15, %v4882_v24  ;;  %v437_v24 = vld [vmem:[%s4313_s29 + $0xd3] sm:$0x1] }
 0x173   : > { %1251 = vrot.lane.b32.xlu1 %v534_v21, %s6125_s26  ;;  %945 = vrot.lane.b32.xlu0 %v462_v22, %s6129_s22  ;;  %v517_v21 = vld [vmem:[%s4313_s29 + $0xce] sm:$0xff] }
 0x174   : > { %3960 = vmatmul.mubr.msk.f32.gmra.mxu1 %vm1510_vm8, %v1490_v28 }
 0x175   : > { %v1244_v27 = vpop.permute.xlu1 %1243  ;;  %v938_v34 = vpop.permute.xlu0 %937  ;;  %3962 = vmatprep.mubr.msk.f32.mxu1 %vm4184_vm0, %v4181_v0 }
 0x176   : > { %v1482_v35 = vsel %vm1470_vm7, %v1454_v33, %v1244_v27  ;;  %v1407_v10 = vsel %vm6132_vm4, %v1379_v9, %v938_v34 }
 0x177   : > { %929 = vrot.lane.b32.xlu1 %v454_v31, %s6129_s22  ;;  %623 = vrot.lane.b32.xlu0 %v382_v32, %s6109_s21  ;;  %v491_v32 = vld [vmem:[%s4313_s29 + $0xd5] sm:$0x1] }
 0x178   : > { %3936 = vmatmul.mubr.msk.f32.gmra.mxu0 %vm1510_vm8, %v1482_v35  ;;  %v518_v35 = vld [vmem:[%s4313_s29 + $0xd6] sm:$0x1] }
 0x179   : > { %v922_v37 = vpop.permute.xlu1 %921  ;;  %v4903_v38 = vpop.permute.xlu0 %615  ;;  %3938 = vmatprep.mubr.msk.f32.mxu0 %vm4184_vm0, %v4181_v0 }
 0x17a   : > { %v1399_v16 = vsel %vm6132_vm4, %v1371_v18, %v922_v37  ;;  %v545_v37 = vld [vmem:[%s4313_s29 + $0xd7] sm:$0x1] }
 0x17b   : > { %731 = vrot.lane.b32.xlu1 %v409_v36, %s6115_s23  ;;  %1053 = vrot.lane.b32.xlu0 %v489_v30, %s6117_s24 }
 0x17c   : > { %v1663_v40 = vpop.f32.mrf.mxu0 }
 0x17d   : > { %v1664_v39 = vadd.f32 %v4854_v3, %v1663_v40  ;;  %v4912_v43 = vpop.permute.xlu1 %599  ;;  %v1046_v44 = vpop.permute.xlu0 %1045 }
 0x17e   : > { %v3907_v45 = vpop.f32.mrf.mxu0  ;;  %v1435_v60 = vsel %vm1414_vm5, %v1407_v10, %v1046_v44 }
 0x17f   : > { %v1793_v46 = vmax.f32 %v1664_v39, 0.0  ;;  %1161 = vrot.lane.b32.xlu1 %v516_v41, %s6119_s25  ;;  %1037 = vrot.lane.b32.xlu0 %v481_v42, %s6117_s24  ;;  %v351_v42 = vld [vmem:[%s4313_s29 + $0xa8] sm:$0xff] }
 0x180   : > { %v343_v45 = vld [vmem:[%s4313_s29 + $0x68] sm:$0xff] }
 0x181   : > { %1820 = vst.msk [vmem:[#allocation2 + $0x8] sm:$0xff] %vm1302_vm1, %v1793_v46  ;;  %v1030_v49 = vpop.permute.xlu1 %1029  ;;  %v4919_v50 = vpop.permute.xlu0 %723  ;;  %v1324_v46 = vsel %vm1302_vm1, %v351_v42, %v4903_v38  ;;  %v1316_v54 = vsel %vm1302_vm1, %v343_v45, %v4912_v43 }
 0x182   : > { %v1427_v1 = vsel %vm1414_vm5, %v1399_v16, %v1030_v49 }
 0x183   : > { %1145 = vrot.lane.b32.xlu1 %v508_v47, %s6119_s25  ;;  %839 = vrot.lane.b32.xlu0 %v436_v48, %s6123_s17  ;;  %v1352_v48 = vsel %vm6134_vm2, %v1324_v46, %v4919_v50 }
 0x185   : > { %v4926_v56 = vpop.permute.xlu1 %707  ;;  %v1154_v57 = vpop.permute.xlu0 %1153 }
 0x186   : > { %v1463_v55 = vsel %vm1442_vm6, %v1435_v60, %v1154_v57 }
 0x187   : > { %947 = vrot.lane.b32.xlu1 %v463_v51, %s6129_s22  ;;  %1269 = vrot.lane.b32.xlu0 %v543_v53, %s6125_s26 }
 0x188   : > { %v1668_v61 = vpop.f32.mrf.mxu0 }
 0x189   : > { %v1669_v4 = vadd.f32 %v4854_v3, %v1668_v61  ;;  %v1138_v5 = vpop.permute.xlu1 %1137  ;;  %v4938_v6 = vpop.permute.xlu0 %831 }
 0x18a   : > { %v3910_v52 = vpop.f32.mrf.mxu0  ;;  %v1455_v22 = vsel %vm1442_vm6, %v1427_v1, %v1138_v5  ;;  %v1380_v57 = vsel %vm1358_vm3, %v1352_v48, %v4938_v6  ;;  %v352_v1 = vld [vmem:[%s4313_s29 + $0xb0] sm:$0xff] }
 0x18b   : > { %v1794_v12 = vmax.f32 %v1669_v4, 0.0  ;;  %1253 = vrot.lane.b32.xlu0 %v535_v62, %s6125_s26  ;;  %625 = vrot.lane.b32.xlu1 %v383_v63, %s6109_s21  ;;  %v1344_v62 = vsel %vm6134_vm2, %v1316_v54, %v4926_v56 }
 0x18d   : > { %1821 = vst.msk [vmem:[#allocation2 + $0x10] sm:$0xff] %vm1302_vm1, %v1794_v12  ;;  %v4953_v14 = vpop.permute.xlu1 %815  ;;  %v1262_v17 = vpop.permute.xlu0 %1261 }
 0x18e   : > { %v1491_v19 = vsel %vm1470_vm7, %v1463_v55, %v1262_v17  ;;  %v1372_v43 = vsel %vm1358_vm3, %v1344_v62, %v4953_v14 }
 0x18f   : > { %1055 = vrot.lane.b32.xlu0 %v490_v13, %s6117_s24  ;;  %3963 = vmatmul.mubr.msk.f32.gmra.mxu1 %vm1510_vm8, %v1491_v19 }
 0x190   : > { %733 = vrot.lane.b32.xlu1 %v410_v8, %s6115_s23  ;;  %3965 = vmatprep.mubr.msk.f32.mxu1 %vm4184_vm0, %v4181_v0 }
 0x191   : > { %v1246_v11 = vpop.permute.xlu1 %1245  ;;  %v940_v23 = vpop.permute.xlu0 %939 }
 0x192   : > { %v1483_v25 = vsel %vm1470_vm7, %v1455_v22, %v1246_v11  ;;  %v1408_v59 = vsel %vm6132_vm4, %v1380_v57, %v940_v23  ;;  %v344_v11 = vld [vmem:[%s4313_s29 + $0x70] sm:$0xff] }
 0x193   : > { %1163 = vrot.lane.b32.xlu0 %v517_v21, %s6119_s25  ;;  %3939 = vmatmul.mubr.msk.f32.gmra.mxu0 %vm1510_vm8, %v1483_v25 }
 0x194   : > { %841 = vrot.lane.b32.xlu1 %v437_v24, %s6123_s17  ;;  %3941 = vmatprep.mubr.msk.f32.mxu0 %vm4184_vm0, %v4181_v0 }
 0x195   : > { %v924_v28 = vpop.permute.xlu1 %923  ;;  %v4976_v29 = vpop.permute.xlu0 %617 }
 0x196   : > { %v1400_v5 = vsel %vm6132_vm4, %v1372_v43, %v924_v28  ;;  %v1325_v23 = vsel %vm1302_vm1, %v352_v1, %v4976_v29  ;;  %v345_v43 = vld [vmem:[%s4313_s29 + $0x78] sm:$0xff] }
 0x197   : > { %1271 = vrot.lane.b32.xlu0 %v544_v26, %s6125_s26 }
 0x198   : > { %v1673_v31 = vpop.f32.mrf.mxu0  ;;  %949 = vrot.lane.b32.xlu1 %v464_v20, %s6129_s22 }
 0x199   : > { %v1674_v33 = vadd.f32 %v4854_v3, %v1673_v31  ;;  %v4983_v27 = vpop.permute.xlu1 %601  ;;  %v1048_v34 = vpop.permute.xlu0 %1047 }
 0x19a   : > { %v3913_v36 = vpop.f32.mrf.mxu0  ;;  %v1436_v38 = vsel %vm1414_vm5, %v1408_v59, %v1048_v34 }
 0x19b   : > { %v1795_v30 = vmax.f32 %v1674_v33, 0.0  ;;  %1057 = vrot.lane.b32.xlu0 %v491_v32, %s6117_s24  ;;  %v1317_v32 = vsel %vm1302_vm1, %v344_v11, %v4983_v27 }
 0x19c   : > { %1165 = vrot.lane.b32.xlu1 %v518_v35, %s6119_s25 }
 0x19d   : > { %1822 = vst.msk [vmem:[#allocation2 + $0x18] sm:$0xff] %vm1302_vm1, %v1795_v30  ;;  %v1032_v40 = vpop.permute.xlu1 %1031  ;;  %v726_v41 = vpop.permute.xlu0 %725 }
 0x19e   : > { %v1428_v6 = vsel %vm1414_vm5, %v1400_v5, %v1032_v40  ;;  %v1353_v26 = vsel %vm6134_vm2, %v1325_v23, %v726_v41 }
 0x19f   : > { %1273 = vrot.lane.b32.xlu0 %v545_v37, %s6125_s26 }
 0x1a1   : > { %v4992_v39 = vpop.permute.xlu1 %709  ;;  %v1156_v44 = vpop.permute.xlu0 %1155 }
 0x1a2   : > { %v1464_v50 = vsel %vm1442_vm6, %v1436_v38, %v1156_v44  ;;  %v1345_v30 = vsel %vm6134_vm2, %v1317_v32, %v4992_v39 }
 0x1a4   : > { %v1678_v47 = vpop.f32.mrf.mxu0 }
 0x1a5   : > { %v1679_v49 = vadd.f32 %v4854_v3, %v1678_v47  ;;  %v1140_v51 = vpop.permute.xlu1 %1139  ;;  %v834_v53 = vpop.permute.xlu0 %833 }
 0x1a6   : > { %v3916_v58 = vpop.f32.mrf.mxu0  ;;  %v1456_v56 = vsel %vm1442_vm6, %v1428_v6, %v1140_v51  ;;  %v1381_v33 = vsel %vm1358_vm3, %v1353_v26, %v834_v53 }
 0x1a7   : > { %v1796_v61 = vmax.f32 %v1679_v49, 0.0 }
 0x1a9   : > { %1823 = vst.msk [vmem:[#allocation2 + $0x20] sm:$0xff] %vm1302_vm1, %v1796_v61  ;;  %v818_v63 = vpop.permute.xlu1 %817  ;;  %v1264_v2 = vpop.permute.xlu0 %1263 }
 0x1aa   : > { %v1492_v4 = vsel %vm1470_vm7, %v1464_v50, %v1264_v2  ;;  %v1373_v42 = vsel %vm1358_vm3, %v1345_v30, %v818_v63  ;;  %v353_v50 = vld [vmem:[%s4313_s29 + $0xb8] sm:$0xff] }
 0x1ab   : > { %3966 = vmatmul.mubr.msk.f32.gmra.mxu1 %vm1510_vm8, %v1492_v4 }
 0x1ac   : > { %3968 = vmatprep.mubr.msk.f32.mxu1 %vm4184_vm0, %v4181_v0 }
 0x1ad   : > { %v1248_v7 = vpop.permute.xlu1 %1247  ;;  %v942_v9 = vpop.permute.xlu0 %941 }
 0x1ae   : > { %v1484_v52 = vsel %vm1470_vm7, %v1456_v56, %v1248_v7  ;;  %v1409_v35 = vsel %vm6132_vm4, %v1381_v33, %v942_v9  ;;  %v354_v33 = vld [vmem:[%s4313_s29 + $0xc0] sm:$0xff] }
 0x1af   : > { %3942 = vmatmul.mubr.msk.f32.gmra.mxu0 %vm1510_vm8, %v1484_v52 }
 0x1b0   : > { %v2119_v10 = vld [vmem:[#allocation2 + $0x11] ss:$3 sm:$0xff]  ;;  %3944 = vmatprep.mubr.msk.f32.mxu0 %vm4184_vm0, %v4181_v0  ;;  %v2135_v15 = vld [vmem:[#allocation2 + $0x12] ss:$3 sm:$0xff] }
 0x1b1   : > { %2781 = vrot.lane.b32.xlu1 %v2119_v10, %s6109_s21  ;;  %v926_v12 = vpop.permute.xlu1 %925  ;;  %v5024_v60 = vpop.permute.xlu0 %619 }
 0x1b2   : > { %v1401_v44 = vsel %vm6132_vm4, %v1373_v42, %v926_v12  ;;  %v1326_v4 = vsel %vm1302_vm1, %v353_v50, %v5024_v60 }
 0x1b4   : > { %v1683_v13 = vpop.f32.mrf.mxu0 }
 0x1b5   : > { %v1684_v55 = vadd.f32 %v4854_v3, %v1683_v13  ;;  %2813 = vrot.lane.b32.xlu1 %v2135_v15, %s6115_s23  ;;  %v5028_v14 = vpop.permute.xlu1 %603  ;;  %v1050_v17 = vpop.permute.xlu0 %1049 }
 0x1b6   : > { %v3919_v8 = vpop.f32.mrf.mxu0  ;;  %v1437_v29 = vsel %vm1414_vm5, %v1409_v35, %v1050_v17  ;;  %v1318_v9 = vsel %vm1302_vm1, %v345_v43, %v5028_v14  ;;  %v356_v43 = vld [vmem:[%s4313_s29 + $0xd0] sm:$0x1] }
 0x1b7   : > { %v1797_v18 = vmax.f32 %v1684_v55, 0.0 }
 0x1b9   : > { %1824 = vst.msk [vmem:[#allocation2 + $0x28] sm:$0xff] %vm1302_vm1, %v1797_v18  ;;  %v1034_v19 = vpop.permute.xlu1 %1033  ;;  %v728_v16 = vpop.permute.xlu0 %727 }
 0x1ba   : > { %v1429_v45 = vsel %vm1414_vm5, %v1401_v44, %v1034_v19  ;;  %v1354_v6 = vsel %vm6134_vm2, %v1326_v4, %v728_v16 }
 0x1bd   : > { %v712_v21 = vpop.permute.xlu1 %711  ;;  %v1158_v22 = vpop.permute.xlu0 %1157 }
 0x1be   : > { %v1465_v37 = vsel %vm1442_vm6, %v1437_v29, %v1158_v22  ;;  %v1346_v15 = vsel %vm6134_vm2, %v1318_v9, %v712_v21 }
 0x1c0   : > { %v1688_v24 = vpop.f32.mrf.mxu0  ;;  %v2151_v25 = vld [vmem:[#allocation2 + $0x13] ss:$3 sm:$0xff] }
 0x1c1   : > { %v1689_v28 = vadd.f32 %v4854_v3, %v1688_v24  ;;  %2845 = vrot.lane.b32.xlu1 %v2151_v25, %s6123_s17  ;;  %v1142_v20 = vpop.permute.xlu1 %1141  ;;  %v836_v31 = vpop.permute.xlu0 %835 }
 0x1c2   : > { %v3922_v34 = vpop.f32.mrf.mxu0  ;;  %v1457_v39 = vsel %vm1442_vm6, %v1429_v45, %v1142_v20  ;;  %v1382_v52 = vsel %vm1358_vm3, %v1354_v6, %v836_v31 }
 0x1c3   : > { %v1798_v36 = vmax.f32 %v1689_v28, 0.0 }
 0x1c5   : > { %1825 = vst.msk [vmem:[#allocation2 + $0x30] sm:$0xff] %vm1302_vm1, %v1798_v36  ;;  %v820_v40 = vpop.permute.xlu1 %819  ;;  %v1266_v41 = vpop.permute.xlu0 %1265  ;;  %v346_v36 = vld [vmem:[%s4313_s29 + $0x80] sm:$0xff] }
 0x1c6   : > { %v1493_v27 = vsel %vm1470_vm7, %v1465_v37, %v1266_v41  ;;  %v1374_v8 = vsel %vm1358_vm3, %v1346_v15, %v820_v40 }
 0x1c7   : > { %3969 = vmatmul.mubr.msk.f32.gmra.mxu1 %vm1510_vm8, %v1493_v27 }
 0x1c8   : > { %3971 = vmatprep.mubr.msk.f32.mxu1 %vm4184_vm0, %v4181_v0 }
 0x1c9   : > { %v1250_v46 = vpop.permute.xlu1 %1249  ;;  %v944_v47 = vpop.permute.xlu0 %943 }
 0x1ca   : > { %v1485_v48 = vsel %vm1470_vm7, %v1457_v39, %v1250_v46  ;;  %v1410_v10 = vsel %vm6132_vm4, %v1382_v52, %v944_v47 }
 0x1cb   : > { %3945 = vmatmul.mubr.msk.f32.gmra.mxu0 %vm1510_vm8, %v1485_v48 }
 0x1cc   : > { %3947 = vmatprep.mubr.msk.f32.mxu0 %vm4184_vm0, %v4181_v0 }
 0x1cd   : > { %v928_v49 = vpop.permute.xlu1 %927  ;;  %v622_v51 = vpop.permute.xlu0 %621 }
 0x1ce   : > { %v1402_v14 = vsel %vm6132_vm4, %v1374_v8, %v928_v49  ;;  %v1327_v29 = vsel %vm1302_vm1, %v354_v33, %v622_v51 }
 0x1d0   : > { %v1693_v53 = vpop.f32.mrf.mxu0 }
 0x1d1   : > { %v1694_v54 = vadd.f32 %v4854_v3, %v1693_v53  ;;  %v606_v57 = vpop.permute.xlu1 %605  ;;  %v1052_v58 = vpop.permute.xlu0 %1051 }
 0x1d2   : > { %v3925_v59 = vpop.f32.mrf.mxu0  ;;  %v1438_v12 = vsel %vm1414_vm5, %v1410_v10, %v1052_v58  ;;  %v1319_v41 = vsel %vm1302_vm1, %v346_v36, %v606_v57 }
 0x1d3   : > { %v1799_v61 = vmax.f32 %v1694_v54, 0.0 }
 0x1d5   : > { %1826 = vst.msk [vmem:[#allocation2 + $0x38] sm:$0xff] %vm1302_vm1, %v1799_v61  ;;  %v1036_v38 = vpop.permute.xlu1 %1035  ;;  %v730_v62 = vpop.permute.xlu0 %729 }
 0x1d6   : > { %v1430_v19 = vsel %vm1414_vm5, %v1402_v14, %v1036_v38  ;;  %v1355_v30 = vsel %vm6134_vm2, %v1327_v29, %v730_v62 }
 0x1d9   : > { %v714_v63 = vpop.permute.xlu1 %713  ;;  %v1160_v2 = vpop.permute.xlu0 %1159 }
 0x1da   : > { %v1466_v60 = vsel %vm1442_vm6, %v1438_v12, %v1160_v2  ;;  %v1347_v45 = vsel %vm6134_vm2, %v1319_v41, %v714_v63  ;;  %v355_v2 = vld [vmem:[%s4313_s29 + $0xc8] sm:$0xff]  ;;  %s6139_s29 = smov 40  }
 0x1dc   : > { %v2121_v5 = vld [vmem:[#allocation2 + $0x29] ss:$3 sm:$0xff]  ;;  %v2137_v13 = vld [vmem:[#allocation2 + $0x2a] ss:$3 sm:$0xff] }
 0x1dd   : > { %2783 = vrot.lane.b32.xlu0 %v2121_v5, %s6109_s21  ;;  %v1144_v56 = vpop.permute.xlu1 %1143  ;;  %v838_v7 = vpop.permute.xlu0 %837 }
 0x1de   : > { %v1458_v1 = vsel %vm1442_vm6, %v1430_v19, %v1144_v56  ;;  %v1383_v42 = vsel %vm1358_vm3, %v1355_v30, %v838_v7 }
 0x1e1   : > { %2815 = vrot.lane.b32.xlu0 %v2137_v13, %s6115_s23  ;;  %v822_v55 = vpop.permute.xlu1 %821  ;;  %v1268_v17 = vpop.permute.xlu0 %1267 }
 0x1e2   : > { %v1494_v18 = vsel %vm1470_vm7, %v1466_v60, %v1268_v17  ;;  %v1375_v48 = vsel %vm1358_vm3, %v1347_v45, %v822_v55 }
 0x1e3   : > { %3972 = vmatmul.mubr.msk.f32.gmra.mxu1 %vm1510_vm8, %v1494_v18 }
 0x1e4   : > { %v1698_v16 = vpop.f32.mrf.mxu0  ;;  %3974 = vmatprep.mubr.msk.f32.mxu1 %vm4184_vm0, %v4181_v0 }
 0x1e5   : > { %v1699_v21 = vadd.f32 %v4854_v3, %v1698_v16  ;;  %v1252_v22 = vpop.permute.xlu1 %1251  ;;  %v946_v11 = vpop.permute.xlu0 %945 }
 0x1e6   : > { %v1486_v23 = vsel %vm1470_vm7, %v1458_v1, %v1252_v22  ;;  %v3928_v24 = vpop.f32.mrf.mxu0  ;;  %v1411_v27 = vsel %vm6132_vm4, %v1383_v42, %v946_v11 }
 0x1e7   : > { %v1800_v25 = vmax.f32 %v1699_v21, 0.0  ;;  %3948 = vmatmul.mubr.msk.f32.gmra.mxu0 %vm1510_vm8, %v1486_v23 }
 0x1e8   : > { %3950 = vmatprep.mubr.msk.f32.mxu0 %vm4184_vm0, %v4181_v0 }
 0x1e9   : > { %1827 = vst.msk [vmem:[#allocation2 + $0x40] sm:$0xff] %vm1302_vm1, %v1800_v25  ;;  %v930_v26 = vpop.permute.xlu1 %929  ;;  %v624_v28 = vpop.permute.xlu0 %623 }
 0x1ea   : > { %v1403_v51 = vsel %vm6132_vm4, %v1375_v48, %v930_v26  ;;  %v1328_v9 = vsel %vm1302_vm1, %v355_v2, %v624_v28 }
 0x1ed   : > { %v732_v20 = vpop.permute.xlu1 %731  ;;  %v1054_v31 = vpop.permute.xlu0 %1053 }
 0x1ee   : > { %v1439_v44 = vsel %vm1414_vm5, %v1411_v27, %v1054_v31  ;;  %v1356_v10 = vsel %vm6134_vm2, %v1328_v9, %v732_v20 }
 0x1f0   : > { %v2153_v32 = vld [vmem:[#allocation2 + $0x2b] ss:$3 sm:$0xff] }
 0x1f1   : > { %2847 = vrot.lane.b32.xlu0 %v2153_v32, %s6123_s17  ;;  %v1162_v34 = vpop.permute.xlu1 %1161  ;;  %v1038_v35 = vpop.permute.xlu0 %1037 }
 0x1f2   : > { %v1467_v39 = vsel %vm1442_vm6, %v1439_v44, %v1162_v34  ;;  %v1431_v53 = vsel %vm1414_vm5, %v1403_v51, %v1038_v35 }
 0x1f5   : > { %v1146_v37 = vpop.permute.xlu1 %1145  ;;  %v840_v40 = vpop.permute.xlu0 %839 }
 0x1f6   : > { %v1459_v57 = vsel %vm1442_vm6, %v1431_v53, %v1146_v37  ;;  %v1384_v13 = vsel %vm1358_vm3, %v1356_v10, %v840_v40 }
 0x1f9   : > { %v948_v46 = vpop.permute.xlu1 %947  ;;  %v1270_v47 = vpop.permute.xlu0 %1269 }
 0x1fa   : > { %v1495_v49 = vsel %vm1470_vm7, %v1467_v39, %v1270_v47  ;;  %v1412_v60 = vsel %vm6132_vm4, %v1384_v13, %v948_v46 }
 0x1fb   : > { %3975 = vmatmul.mubr.msk.f32.gmra.mxu1 %vm1510_vm8, %v1495_v49 }
 0x1fc   : > { %v1743_v54 = vpop.f32.mrf.mxu1  ;;  %3977 = vmatprep.mubr.msk.f32.mxu1 %vm4184_vm0, %v4181_v0 }
 0x1fd   : > { %v1744_v58 = vadd.f32 %v4854_v3, %v1743_v54  ;;  %v1254_v59 = vpop.permute.xlu0 %1253  ;;  %v626_v61 = vpop.permute.xlu1 %625 }
 0x1fe   : > { %v1487_v38 = vsel %vm1470_vm7, %v1459_v57, %v1254_v59  ;;  %v3955_v62 = vpop.f32.mrf.mxu1  ;;  %v1329_v52 = vsel %vm1302_vm1, %v356_v43, %v626_v61 }
 0x1ff   : > { %v1809_v50 = vmax.f32 %v1744_v58, 0.0  ;;  %3951 = vmatmul.mubr.msk.f32.gmra.mxu0 %vm1510_vm8, %v1487_v38 }
 0x200   : > { %v1703_v63 = vpop.f32.mrf.mxu0 }
 0x201   : > { %1836 = vst.msk [vmem:[#allocation2 + $0x88] sm:$0xff] %vm1302_vm1, %v1809_v50  ;;  %v1704_v4 = vadd.f32 %v4854_v3, %v1703_v63  ;;  %v1056_v5 = vpop.permute.xlu0 %1055 }
 0x202   : > { %v3931_v6 = vpop.f32.mrf.mxu0  ;;  %v734_v56 = vpop.permute.xlu1 %733  ;;  %v1440_v17 = vsel %vm1414_vm5, %v1412_v60, %v1056_v5 }
 0x203   : > { %v1801_v7 = vmax.f32 %v1704_v4, 0.0  ;;  %v1357_v55 = vsel %vm6134_vm2, %v1329_v52, %v734_v56 }
 0x205   : > { %1828 = vst.msk [vmem:[#allocation2 + $0x48] sm:$0xff] %vm1302_vm1, %v1801_v7  ;;  %v1164_v12 = vpop.permute.xlu0 %1163 }
 0x206   : > { %v842_v15 = vpop.permute.xlu1 %841  ;;  %v1468_v8 = vsel %vm1442_vm6, %v1440_v17, %v1164_v12 }
 0x207   : > { %v1385_v14 = vsel %vm1358_vm3, %v1357_v55, %v842_v15 }
 0x209   : > { %v1272_v18 = vpop.permute.xlu0 %1271 }
 0x20a   : > { %v1496_v19 = vsel %vm1470_vm7, %v1468_v8, %v1272_v18  ;;  %v950_v16 = vpop.permute.xlu1 %949 }
 0x20b   : > { %3978 = vmatmul.mubr.msk.f32.gmra.mxu1 %vm1510_vm8, %v1496_v19  ;;  %v1413_v1 = vsel %vm6132_vm4, %v1385_v14, %v950_v16 }
 0x20c   : > { %3980 = vmatprep.mubr.msk.f32.mxu1 %vm4184_vm0, %v4181_v0  ;;  %vm2755_vm0 = vcmask 572416  }
 0x20d   : > { %v1058_v21 = vpop.permute.xlu0 %1057 }
 0x20e   : > { %v1441_v22 = vsel %vm1414_vm5, %v1413_v1, %v1058_v21  ;;  %v1166_v11 = vpop.permute.xlu1 %1165 }
 0x20f   : > { %v1469_v23 = vsel %vm1442_vm6, %v1441_v22, %v1166_v11 }
 0x211   : > { %v1274_v24 = vpop.permute.xlu0 %1273 }
 0x212   : > { %v1497_v25 = vsel %vm1470_vm7, %v1469_v23, %v1274_v24 }
 0x213   : > { %3981 = vmatmul.mubr.msk.f32.gmra.mxu1 %vm1510_vm8, %v1497_v25 }
 0x218   : > { %v1748_v26 = vpop.f32.mrf.mxu1 }
 0x219   : > { %v1749_v28 = vadd.f32 %v4854_v3, %v1748_v26 }
 0x21a   : > { %v3958_v20 = vpop.f32.mrf.mxu1 }
 0x21b   : > { %v1810_v31 = vmax.f32 %v1749_v28, 0.0 }
 0x21c   : > { %v1708_v32 = vpop.f32.mrf.mxu0 }
 0x21d   : > { %1837 = vst.msk [vmem:[#allocation2 + $0x90] sm:$0xff] %vm1302_vm1, %v1810_v31  ;;  %v1709_v0 = vadd.f32 %v4854_v3, %v1708_v32 }
 0x21e   : > { %v3934_v33 = vpop.f32.mrf.mxu0 }
 0x21f   : > { %v1802_v34 = vmax.f32 %v1709_v0, 0.0 }
 0x221   : > { %1829 = vst.msk [vmem:[#allocation2 + $0x50] sm:$0xff] %vm1302_vm1, %v1802_v34 }
 0x228   : > { %v2123_v35 = vld [vmem:[#allocation2 + $0x41] ss:$3 sm:$0xff]  ;;  %v2139_v36 = vld [vmem:[#allocation2 + $0x42] ss:$3 sm:$0xff] }
 0x229   : > { %2785 = vrot.lane.b32.xlu1 %v2123_v35, %s6109_s21 }
 0x22d   : > { %2817 = vrot.lane.b32.xlu1 %v2139_v36, %s6115_s23 }
 0x234   : > { %v1753_v29 = vpop.f32.mrf.mxu1 }
 0x235   : > { %v1754_v30 = vadd.f32 %v4854_v3, %v1753_v29 }
 0x236   : > { %v3961_v37 = vpop.f32.mrf.mxu1 }
 0x237   : > { %v1811_v40 = vmax.f32 %v1754_v30, 0.0 }
 0x238   : > { %v1713_v41 = vpop.f32.mrf.mxu0 }
 0x239   : > { %1838 = vst.msk [vmem:[#allocation2 + $0x98] sm:$0xff] %vm1302_vm1, %v1811_v40  ;;  %v1714_v42 = vadd.f32 %v4854_v3, %v1713_v41 }
 0x23a   : > { %v3937_v27 = vpop.f32.mrf.mxu0 }
 0x23b   : > { %v1803_v44 = vmax.f32 %v1714_v42, 0.0 }
 0x23d   : > { %1830 = vst.msk [vmem:[#allocation2 + $0x58] sm:$0xff] %vm1302_vm1, %v1803_v44 }
 0x240   : > { %v2129_v13 = vld [vmem:[#allocation2 + $0x89] ss:$3 sm:$0xff]  ;;  %v2145_v15 = vld [vmem:[#allocation2 + $0x8a] ss:$3 sm:$0xff] }
 0x244   : > { %v2155_v45 = vld [vmem:[#allocation2 + $0x43] ss:$3 sm:$0xff] }
 0x245   : > { %2849 = vrot.lane.b32.xlu1 %v2155_v45, %s6123_s17  ;;  %v1865_v45 = vld [vmem:[#allocation2 + $0x19] ss:$3 sm:$0xff] }
 0x24f   : > { %v1758_v39 = vpop.f32.mrf.mxu1 }
 0x250   : > { %v1759_v46 = vadd.f32 %v4854_v3, %v1758_v39  ;;  %v1863_v39 = vld [vmem:[#allocation2 + $0x1] ss:$3 sm:$0xff] }
 0x251   : > { %v3964_v47 = vpop.f32.mrf.mxu1 }
 0x252   : > { %v1812_v48 = vmax.f32 %v1759_v46, 0.0  ;;  %v1881_v46 = vld [vmem:[#allocation2 + $0x1a] ss:$3 sm:$0xff]  ;;  %v1879_v47 = vld [vmem:[#allocation2 + $0x2] ss:$3 sm:$0xff] }
 0x253   : > { %v1718_v49 = vpop.f32.mrf.mxu0 }
 0x254   : > { %1839 = vst.msk [vmem:[#allocation2 + $0xa0] sm:$0xff] %vm1302_vm1, %v1812_v48  ;;  %v1719_v51 = vadd.f32 %v4854_v3, %v1718_v49  ;;  %v1897_v48 = vld [vmem:[#allocation2 + $0x1b] ss:$3 sm:$0xff]  ;;  %v1895_v49 = vld [vmem:[#allocation2 + $0x3] ss:$3 sm:$0xff] }
 0x255   : > { %v3940_v53 = vpop.f32.mrf.mxu0 }
 0x256   : > { %v1804_v54 = vmax.f32 %v1719_v51, 0.0  ;;  %v1867_v51 = vld [vmem:[#allocation2 + $0x31] ss:$3 sm:$0xff]  ;;  %v1911_v53 = vld [vmem:[#allocation2 + $0x4] ss:$3 sm:$0xff] }
 0x258   : > { %1831 = vst.msk [vmem:[#allocation2 + $0x60] sm:$0xff] %vm1302_vm1, %v1804_v54  ;;  %v1927_v54 = vld [vmem:[#allocation2 + $0x5] ss:$3 sm:$0xff] }
 0x25b   : > { %v2161_v55 = vld [vmem:[#allocation2 + $0x8b] ss:$3 sm:$0xff] }
 0x26b   : > { %v1763_v57 = vpop.f32.mrf.mxu1 }
 0x26c   : > { %v1764_v58 = vadd.f32 %v4854_v3, %v1763_v57  ;;  %v1913_v57 = vld [vmem:[#allocation2 + $0x1c] ss:$3 sm:$0xff] }
 0x26d   : > { %v3967_v59 = vpop.f32.mrf.mxu1 }
 0x26e   : > { %v1813_v61 = vmax.f32 %v1764_v58, 0.0  ;;  %v1883_v58 = vld [vmem:[#allocation2 + $0x32] ss:$3 sm:$0xff] }
 0x26f   : > { %v1723_v38 = vpop.f32.mrf.mxu0  ;;  %v1869_v59 = vld [vmem:[#allocation2 + $0x49] ss:$3 sm:$0xff] }
 0x270   : > { %1840 = vst.msk [vmem:[#allocation2 + $0xa8] sm:$0xff] %vm1302_vm1, %v1813_v61  ;;  %v1724_v62 = vadd.f32 %v4854_v3, %v1723_v38  ;;  %v1943_v61 = vld [vmem:[#allocation2 + $0x6] ss:$3 sm:$0xff] }
 0x271   : > { %v3943_v50 = vpop.f32.mrf.mxu0  ;;  %v1929_v38 = vld [vmem:[#allocation2 + $0x1d] ss:$3 sm:$0xff] }
 0x272   : > { %v1805_v63 = vmax.f32 %v1724_v62, 0.0  ;;  %v1899_v62 = vld [vmem:[#allocation2 + $0x33] ss:$3 sm:$0xff] }
 0x273   : > { %v1885_v50 = vld [vmem:[#allocation2 + $0x4a] ss:$3 sm:$0xff] }
 0x274   : > { %1832 = vst.msk [vmem:[#allocation2 + $0x68] sm:$0xff] %vm1302_vm1, %v1805_v63  ;;  %v1959_v63 = vld [vmem:[#allocation2 + $0x7] ss:$3 sm:$0xff] }
 0x27b   : > { %v2125_v2 = vld [vmem:[#allocation2 + $0x59] ss:$3 sm:$0xff]  ;;  %v2141_v43 = vld [vmem:[#allocation2 + $0x5a] ss:$3 sm:$0xff] }
 0x27c   : > { %2787 = vrot.lane.b32.xlu0 %v2125_v2, %s6109_s21  ;;  %v1945_v2 = vld [vmem:[#allocation2 + $0x1e] ss:$3 sm:$0xff] }
 0x280   : > { %2819 = vrot.lane.b32.xlu0 %v2141_v43, %s6115_s23  ;;  %v1915_v43 = vld [vmem:[#allocation2 + $0x34] ss:$3 sm:$0xff] }
 0x287   : > { %v1768_v4 = vpop.f32.mrf.mxu1 }
 0x288   : > { %v1769_v5 = vadd.f32 %v4854_v3, %v1768_v4  ;;  %v1901_v4 = vld [vmem:[#allocation2 + $0x4b] ss:$3 sm:$0xff] }
 0x289   : > { %v3970_v6 = vpop.f32.mrf.mxu1 }
 0x28a   : > { %v1814_v56 = vmax.f32 %v1769_v5, 0.0  ;;  %v1975_v5 = vld [vmem:[#allocation2 + $0x8] ss:$3 sm:$0xff] }
 0x28b   : > { %v1728_v7 = vpop.f32.mrf.mxu0  ;;  %v1961_v6 = vld [vmem:[#allocation2 + $0x1f] ss:$3 sm:$0xff] }
 0x28c   : > { %1841 = vst.msk [vmem:[#allocation2 + $0xb0] sm:$0xff] %vm1302_vm1, %v1814_v56  ;;  %v1729_v9 = vadd.f32 %v4854_v3, %v1728_v7  ;;  %v1917_v56 = vld [vmem:[#allocation2 + $0x4c] ss:$3 sm:$0xff] }
 0x28d   : > { %v3946_v52 = vpop.f32.mrf.mxu0 }
 0x28e   : > { %v1806_v10 = vmax.f32 %v1729_v9, 0.0  ;;  %v1977_v9 = vld [vmem:[#allocation2 + $0x20] ss:$3 sm:$0xff] }
 0x28f   : > { %v1931_v52 = vld [vmem:[#allocation2 + $0x35] ss:$3 sm:$0xff] }
 0x290   : > { %1833 = vst.msk [vmem:[#allocation2 + $0x70] sm:$0xff] %vm1302_vm1, %v1806_v10  ;;  %v1991_v10 = vld [vmem:[#allocation2 + $0x9] ss:$3 sm:$0xff] }
 0x293   : > { %v2131_v41 = vld [vmem:[#allocation2 + $0xa1] ss:$3 sm:$0xff]  ;;  %v2147_v27 = vld [vmem:[#allocation2 + $0xa2] ss:$3 sm:$0xff] }
 0x297   : > { %v2157_v12 = vld [vmem:[#allocation2 + $0x5b] ss:$3 sm:$0xff] }
 0x298   : > { %2851 = vrot.lane.b32.xlu0 %v2157_v12, %s6123_s17  ;;  %v1871_v7 = vld [vmem:[#allocation2 + $0x61] ss:$3 sm:$0xff] }
 0x29c   : > { %2791 = vrot.lane.b32.xlu0 %v2129_v13, %s6109_s21  ;;  %v1887_v13 = vld [vmem:[#allocation2 + $0x62] ss:$3 sm:$0xff] }
 0x2a0   : > { %2823 = vrot.lane.b32.xlu0 %v2145_v15, %s6115_s23  ;;  %v1933_v15 = vld [vmem:[#allocation2 + $0x4d] ss:$3 sm:$0xff] }
 0x2a3   : > { %v1773_v60 = vpop.f32.mrf.mxu1 }
 0x2a4   : > { %v1774_v17 = vadd.f32 %v4854_v3, %v1773_v60  ;;  %2855 = vrot.lane.b32.xlu0 %v2161_v55, %s6123_s17  ;;  %v5211_v60 = vpop.permute.xlu0 %2783  ;;  %v1947_v55 = vld [vmem:[#allocation2 + $0x36] ss:$3 sm:$0xff] }
 0x2a5   : > { %v3973_v8 = vpop.f32.mrf.mxu1 }
 0x2a6   : > { %v1815_v18 = vmax.f32 %v1774_v17, 0.0  ;;  %v1993_v17 = vld [vmem:[#allocation2 + $0x21] ss:$3 sm:$0xff]  ;;  %v5217_v8 = vpop.permute.xlu1 %2781 }
 0x2a7   : > { %v1733_v14 = vpop.f32.mrf.mxu0 }
 0x2a8   : > { %1842 = vst.msk [vmem:[#allocation2 + $0xb8] sm:$0xff] %vm1302_vm1, %v1815_v18  ;;  %v1734_v19 = vadd.f32 %v4854_v3, %v1733_v14  ;;  %v5219_v18 = vpop.permute.xlu0 %2815  ;;  %v2007_v14 = vld [vmem:[#allocation2 + $0xa] ss:$3 sm:$0xff] }
 0x2a9   : > { %v3949_v16 = vpop.f32.mrf.mxu0 }
 0x2aa   : > { %v1807_v1 = vmax.f32 %v1734_v19, 0.0 }
 0x2ac   : > { %1834 = vst.msk [vmem:[#allocation2 + $0x78] sm:$0xff] %vm1302_vm1, %v1807_v1  ;;  %v5223_v16 = vpop.permute.xlu0 %2847 }
 0x2b3   : > { %v1903_v1 = vld [vmem:[#allocation2 + $0x63] ss:$3 sm:$0xff] }
 0x2bb   : > { %v1778_v21 = vpop.f32.mrf.mxu1 }
 0x2bc   : > { %v1779_v22 = vadd.f32 %v4854_v3, %v1778_v21  ;;  %v1949_v21 = vld [vmem:[#allocation2 + $0x4e] ss:$3 sm:$0xff] }
 0x2bd   : > { %v3976_v11 = vpop.f32.mrf.mxu1 }
 0x2be   : > { %v1816_v23 = vmax.f32 %v1779_v22, 0.0  ;;  %v5225_v22 = vpop.permute.xlu1 %2813 }
 0x2bf   : > { %v1738_v24 = vpop.f32.mrf.mxu0 }
 0x2c0   : > { %1843 = vst.msk [vmem:[#allocation2 + $0xc0] sm:$0xff] %vm1302_vm1, %v1816_v23  ;;  %v1739_v25 = vadd.f32 %v4854_v3, %v1738_v24  ;;  %v1963_v23 = vld [vmem:[#allocation2 + $0x37] ss:$3 sm:$0xff] }
 0x2c1   : > { %v3952_v26 = vpop.f32.mrf.mxu0  ;;  %v2009_v24 = vld [vmem:[#allocation2 + $0x22] ss:$3 sm:$0xff] }
 0x2c2   : > { %v1808_v28 = vmax.f32 %v1739_v25, 0.0  ;;  %v5231_v25 = vpop.permute.xlu1 %2845  ;;  %v2023_v26 = vld [vmem:[#allocation2 + $0xb] ss:$3 sm:$0xff] }
 0x2c4   : > { %1835 = vst.msk [vmem:[#allocation2 + $0x80] sm:$0xff] %vm1302_vm1, %v1808_v28 }
 0x2cb   : > { %v1783_v20 = vpop.f32.mrf.mxu1  ;;  %v2127_v31 = vld [vmem:[#allocation2 + $0x71] ss:$3 sm:$0xff]  ;;  %v2143_v34 = vld [vmem:[#allocation2 + $0x72] ss:$3 sm:$0xff]  ;;  %v2159_v36 = vld [vmem:[#allocation2 + $0x73] ss:$3 sm:$0xff] }
 0x2cc   : > { %v1784_v32 = vadd.f32 %v4854_v3, %v1783_v20  ;;  %2789 = vrot.lane.b32.xlu1 %v2127_v31, %s6109_s21  ;;  %v1873_v12 = vld [vmem:[#allocation2 + $0x79] ss:$3 sm:$0xff]  ;;  %v1889_v19 = vld [vmem:[#allocation2 + $0x7a] ss:$3 sm:$0xff]  ;;  %v1905_v28 = vld [vmem:[#allocation2 + $0x7b] ss:$3 sm:$0xff]  ;;  %v5235_v20 = vpop.permute.xlu1 %2785 }
 0x2cd   : > { %v3979_v0 = vpop.f32.mrf.mxu1 }
 0x2ce   : > { %v1817_v33 = vmax.f32 %v1784_v32, 0.0  ;;  %v1919_v32 = vld [vmem:[#allocation2 + $0x64] ss:$3 sm:$0xff] }
 0x2cf   : > { %v1965_v0 = vld [vmem:[#allocation2 + $0x4f] ss:$3 sm:$0xff] }
 0x2d0   : > { %1844 = vst.msk [vmem:[#allocation2 + $0xc8] sm:$0xff] %vm1302_vm1, %v1817_v33  ;;  %2821 = vrot.lane.b32.xlu1 %v2143_v34, %s6115_s23  ;;  %v5245_v34 = vpop.permute.xlu1 %2817 }
 0x2d3   : > { %v1788_v35 = vpop.f32.mrf.mxu1 }
 0x2d4   : > { %v1789_v29 = vadd.f32 %v4854_v3, %v1788_v35  ;;  %2853 = vrot.lane.b32.xlu1 %v2159_v36, %s6123_s17  ;;  %v2163_v3 = vld [vmem:[#allocation2 + $0xa3] ss:$3 sm:$0xff] }
 0x2d5   : > { %v3982_v30 = vpop.f32.mrf.mxu1  ;;  %v1979_v35 = vld [vmem:[#allocation2 + $0x38] ss:$3 sm:$0xff] }
 0x2d6   : > { %v1818_v37 = vmax.f32 %v1789_v29, 0.0  ;;  %v2025_v36 = vld [vmem:[#allocation2 + $0x23] ss:$3 sm:$0xff]  ;;  %v5249_v29 = vpop.permute.xlu1 %2849 }
 0x2d7   : > { %v2133_v40 = vld [vmem:[#allocation2 + $0xb9] ss:$3 sm:$0xff]  ;;  %v2149_v42 = vld [vmem:[#allocation2 + $0xba] ss:$3 sm:$0xff] }
 0x2d8   : > { %1846 = vst.msk [vmem:[#allocation2 + $0xd0] sm:$0x1] %vm1845_vm9, %v1818_v37  ;;  %2795 = vrot.lane.b32.xlu0 %v2133_v40, %s6109_s21  ;;  %2793 = vrot.lane.b32.xlu1 %v2131_v41, %s6109_s21  ;;  %v2039_v37 = vld [vmem:[#allocation2 + $0xc] ss:$3 sm:$0xff]  ;;  %v1875_v40 = vld [vmem:[#allocation2 + $0x91] ss:$3 sm:$0xff] }
 0x2d9   : > { %vm2764_vm9 = vcmask 613376  }
 0x2dc   : > { %2827 = vrot.lane.b32.xlu0 %v2149_v42, %s6115_s23  ;;  %2825 = vrot.lane.b32.xlu1 %v2147_v27, %s6115_s23  ;;  %v1921_v42 = vld [vmem:[#allocation2 + $0x7c] ss:$3 sm:$0xff] }
 0x2dd   : > { %v1935_v27 = vld [vmem:[#allocation2 + $0x65] ss:$3 sm:$0xff] }
 0x2df   : > { %v2165_v44 = vld [vmem:[#allocation2 + $0xbb] ss:$3 sm:$0xff] }
 0x2e0   : > { %2859 = vrot.lane.b32.xlu0 %v2165_v44, %s6123_s17  ;;  %2857 = vrot.lane.b32.xlu1 %v2163_v3, %s6123_s17 }
 0x2e4   : > { %2176 = vrot.lane.b32.xlu0 %v1865_v45, %s6109_s21  ;;  %2174 = vrot.lane.b32.xlu1 %v1863_v39, %s6109_s21  ;;  %v1981_v45 = vld [vmem:[#allocation2 + $0x50] ss:$3 sm:$0xff] }
 0x2e5   : > { %v1995_v39 = vld [vmem:[#allocation2 + $0x39] ss:$3 sm:$0xff] }
 0x2e8   : > { %2208 = vrot.lane.b32.xlu0 %v1881_v46, %s6115_s23  ;;  %2206 = vrot.lane.b32.xlu1 %v1879_v47, %s6115_s23 }
 0x2ec   : > { %2240 = vrot.lane.b32.xlu0 %v1897_v48, %s6123_s17  ;;  %2238 = vrot.lane.b32.xlu1 %v1895_v49, %s6123_s17  ;;  %v2041_v48 = vld [vmem:[#allocation2 + $0x24] ss:$3 sm:$0xff] }
 0x2ed   : > { %v2055_v49 = vld [vmem:[#allocation2 + $0xd] ss:$3 sm:$0xff] }
 0x2ee   : > { %v5229_v11 = vpop.permute.xlu0 %2787 }
 0x2f0   : > { %2178 = vrot.lane.b32.xlu0 %v1867_v51, %s6109_s21  ;;  %2270 = vrot.lane.b32.xlu1 %v1911_v53, %s6129_s22 }
 0x2f2   : > { %v5237_v31 = vpop.permute.xlu0 %2819 }
 0x2f4   : > { %2302 = vrot.lane.b32.xlu0 %v1927_v54, %s6117_s24  ;;  %2272 = vrot.lane.b32.xlu1 %v1913_v57, %s6129_s22  ;;  %v1877_v54 = vld [vmem:[#allocation2 + $0xa9] ss:$3 sm:$0xff] }
 0x2f5   : > { %v1891_v57 = vld [vmem:[#allocation2 + $0x92] ss:$3 sm:$0xff] }
 0x2f8   : > { %2210 = vrot.lane.b32.xlu0 %v1883_v58, %s6115_s23  ;;  %2180 = vrot.lane.b32.xlu1 %v1869_v59, %s6109_s21 }
 0x2fc   : > { %2334 = vrot.lane.b32.xlu0 %v1943_v61, %s6119_s25  ;;  %2304 = vrot.lane.b32.xlu1 %v1929_v38, %s6117_s24  ;;  %v1937_v61 = vld [vmem:[#allocation2 + $0x7d] ss:$3 sm:$0xff] }
 0x2fd   : > { %v1951_v38 = vld [vmem:[#allocation2 + $0x66] ss:$3 sm:$0xff] }
 0x300   : > { %2242 = vrot.lane.b32.xlu0 %v1899_v62, %s6123_s17  ;;  %2212 = vrot.lane.b32.xlu1 %v1885_v50, %s6115_s23 }
 0x304   : > { %2366 = vrot.lane.b32.xlu0 %v1959_v63, %s6125_s26  ;;  %2336 = vrot.lane.b32.xlu1 %v1945_v2, %s6119_s25  ;;  %v1997_v63 = vld [vmem:[#allocation2 + $0x51] ss:$3 sm:$0xff] }
 0x305   : > { %v2011_v2 = vld [vmem:[#allocation2 + $0x3a] ss:$3 sm:$0xff] }
 0x308   : > { %2274 = vrot.lane.b32.xlu0 %v1915_v43, %s6129_s22  ;;  %2244 = vrot.lane.b32.xlu1 %v1901_v4, %s6123_s17 }
 0x30a   : > { %v5241_v33 = vpop.permute.xlu0 %2851 }
 0x30c   : > { %2398 = vrot.lane.b32.xlu0 %v1975_v5, %s6139_s29  ;;  %2368 = vrot.lane.b32.xlu1 %v1961_v6, %s6125_s26  ;;  %v2057_v5 = vld [vmem:[#allocation2 + $0x25] ss:$3 sm:$0xff] }
 0x30d   : > { %v2071_v6 = vld [vmem:[#allocation2 + $0xe] ss:$3 sm:$0xff] }
 0x30e   : > { %v5251_v30 = vpop.permute.xlu0 %2791 }
 0x310   : > { %2276 = vrot.lane.b32.xlu0 %v1917_v56, %s6129_s22  ;;  %2182 = vrot.lane.b32.xlu1 %v1871_v7, %s6109_s21 }
 0x312   : > { %v5257_v44 = vpop.permute.xlu0 %2823 }
 0x314   : > { %2400 = vrot.lane.b32.xlu0 %v1977_v9, %s6139_s29  ;;  %2306 = vrot.lane.b32.xlu1 %v1931_v52, %s6117_s24  ;;  %v1893_v9 = vld [vmem:[#allocation2 + $0xaa] ss:$3 sm:$0xff] }
 0x315   : > { %v1907_v52 = vld [vmem:[#allocation2 + $0x93] ss:$3 sm:$0xff] }
 0x316   : > { %v5265_v46 = vpop.permute.xlu0 %2855 }
 0x318   : > { %2430 = vrot.lane.b32.xlu1 %v1991_v10, %s6113_s14  ;;  %2184 = vrot.lane.b32.xlu0 %v1873_v12, %s6109_s21 }
 0x31c   : > { %2214 = vrot.lane.b32.xlu1 %v1887_v13, %s6115_s23  ;;  %2308 = vrot.lane.b32.xlu0 %v1933_v15, %s6117_s24  ;;  %v1953_v13 = vld [vmem:[#allocation2 + $0x7e] ss:$3 sm:$0xff] }
 0x31d   : > { %v1967_v15 = vld [vmem:[#allocation2 + $0x67] ss:$3 sm:$0xff] }
 0x320   : > { %2338 = vrot.lane.b32.xlu1 %v1947_v55, %s6119_s25  ;;  %2432 = vrot.lane.b32.xlu0 %v1993_v17, %s6113_s14  ;;  %v2946_v55 = vld [vmem:[%s6157_s3 + $0x60] sm:$0xf] }
 0x321   : > { %3983 = vmatprep.subr.msk.mxu1 %vm2979_vm10, %v2946_v55 }
 0x322   : > { %3984 = vmatpush3.msk.msra.mxu1 %vm2979_vm10, %v2946_v55  ;;  %vm2925_vm10 = vcmask 654336  }
 0x324   : > { %2462 = vrot.lane.b32.xlu1 %v2007_v14, %s6137_s16  ;;  %2216 = vrot.lane.b32.xlu0 %v1889_v19, %s6115_s23  ;;  %v2013_v19 = vld [vmem:[#allocation2 + $0x52] ss:$3 sm:$0xff] }
 0x328   : > { %2246 = vrot.lane.b32.xlu1 %v1903_v1, %s6123_s17  ;;  %2340 = vrot.lane.b32.xlu0 %v1949_v21, %s6119_s25  ;;  %v2027_v1 = vld [vmem:[#allocation2 + $0x3b] ss:$3 sm:$0xff] }
 0x329   : > { %v2945_v21 = vld [vmem:[%s6157_s3 + $0x58] sm:$0xff] }
 0x32a   : > { %3985 = vmatprep.subr.mxu1 %v2945_v21 }
 0x32b   : > { %3986 = vmatpush3.msra.mxu1 %v2945_v21  ;;  %v1925_v21 = vld [vmem:[#allocation2 + $0xac] ss:$3 sm:$0xff] }
 0x32c   : > { %2370 = vrot.lane.b32.xlu1 %v1963_v23, %s6125_s26  ;;  %2464 = vrot.lane.b32.xlu0 %v2009_v24, %s6137_s16  ;;  %v2944_v23 = vld [vmem:[%s6157_s3 + $0x50] sm:$0xff] }
 0x32d   : > { %3987 = vmatprep.subr.mxu1 %v2944_v23 }
 0x32e   : > { %3988 = vmatpush3.msra.mxu1 %v2944_v23  ;;  %v1939_v23 = vld [vmem:[#allocation2 + $0x95] ss:$3 sm:$0xff] }
 0x330   : > { %2494 = vrot.lane.b32.xlu1 %v2023_v26, %s6107_s27  ;;  %2248 = vrot.lane.b32.xlu0 %v1905_v28, %s6123_s17  ;;  %v2073_v28 = vld [vmem:[#allocation2 + $0x26] ss:$3 sm:$0xff] }
 0x334   : > { %2278 = vrot.lane.b32.xlu1 %v1919_v32, %s6129_s22  ;;  %2372 = vrot.lane.b32.xlu0 %v1965_v0, %s6125_s26  ;;  %v2087_v32 = vld [vmem:[#allocation2 + $0xf] ss:$3 sm:$0xff] }
 0x335   : > { %v2943_v0 = vld [vmem:[%s6157_s3 + $0x48] sm:$0xff] }
 0x336   : > { %3989 = vmatprep.subr.mxu1 %v2943_v0 }
 0x337   : > { %3990 = vmatpush3.msra.mxu1 %v2943_v0 }
 0x338   : > { %2402 = vrot.lane.b32.xlu1 %v1979_v35, %s6139_s29  ;;  %2496 = vrot.lane.b32.xlu0 %v2025_v36, %s6107_s27  ;;  %s6111_s27 = smov 65  }
 0x33c   : > { %2526 = vrot.lane.b32.xlu1 %v2039_v37, %s6121_s28  ;;  %2186 = vrot.lane.b32.xlu0 %v1875_v40, %s6109_s21  ;;  %v2942_v37 = vld [vmem:[%s6157_s3 + $0x40] sm:$0xff] }
 0x33d   : > { %v1909_v40 = vld [vmem:[#allocation2 + $0xab] ss:$3 sm:$0xff]  ;;  %3991 = vmatprep.subr.mxu1 %v2942_v37 }
 0x33e   : > { %v5255_v41 = vpop.permute.xlu1 %2789  ;;  %3992 = vmatpush3.msra.mxu1 %v2942_v37  ;;  %v1985_v37 = vld [vmem:[#allocation2 + $0x80] ss:$3 sm:$0xff] }
 0x340   : > { %2280 = vrot.lane.b32.xlu1 %v1921_v42, %s6129_s22  ;;  %2310 = vrot.lane.b32.xlu0 %v1935_v27, %s6117_s24  ;;  %v1923_v42 = vld [vmem:[#allocation2 + $0x94] ss:$3 sm:$0xff] }
 0x341   : > { %v2941_v27 = vld [vmem:[%s6157_s3 + $0x38] sm:$0xff] }
 0x342   : > { %v5261_v3 = vpop.permute.xlu1 %2821  ;;  %3993 = vmatprep.subr.mxu1 %v2941_v27 }
 0x343   : > { %3994 = vmatpush3.msra.mxu1 %v2941_v27 }
 0x344   : > { %2404 = vrot.lane.b32.xlu1 %v1981_v45, %s6139_s29  ;;  %2434 = vrot.lane.b32.xlu0 %v1995_v39, %s6113_s14 }
 0x346   : > { %v5267_v47 = vpop.permute.xlu1 %2853 }
 0x348   : > { %2528 = vrot.lane.b32.xlu1 %v2041_v48, %s6121_s28  ;;  %2558 = vrot.lane.b32.xlu0 %v2055_v49, %s6111_s27  ;;  %v1969_v48 = vld [vmem:[#allocation2 + $0x7f] ss:$3 sm:$0xff]  ;;  %s6159_s28 = smov 60  }
 0x349   : > { %v1983_v49 = vld [vmem:[#allocation2 + $0x68] ss:$3 sm:$0xff] }
 0x34a   : > { %v5271_v51 = vpop.permute.xlu0 %2795  ;;  %v5273_v53 = vpop.permute.xlu1 %2793 }
 0x34c   : > { %2188 = vrot.lane.b32.xlu1 %v1877_v54, %s6109_s21  ;;  %2218 = vrot.lane.b32.xlu0 %v1891_v57, %s6115_s23  ;;  %s6135_s21 = smov 70   ;;  %v2940_v54 = vld [vmem:[%s6157_s3 + $0x30] sm:$0xff] }
 0x34d   : > { %3995 = vmatprep.subr.mxu1 %v2940_v54 }
 0x34e   : > { %v5277_v58 = vpop.permute.xlu0 %2827  ;;  %v5279_v59 = vpop.permute.xlu1 %2825  ;;  %3996 = vmatpush3.msra.mxu1 %v2940_v54  ;;  %v2059_v54 = vld [vmem:[#allocation2 + $0x3d] ss:$3 sm:$0xff] }
 0x350   : > { %2312 = vrot.lane.b32.xlu1 %v1937_v61, %s6117_s24  ;;  %2342 = vrot.lane.b32.xlu0 %v1951_v38, %s6119_s25  ;;  %s6127_s24 = smov 75   ;;  %v2939_v38 = vld [vmem:[%s6157_s3 + $0x28] sm:$0xff] }
 0x351   : > { %3997 = vmatprep.subr.mxu1 %v2939_v38 }
 0x352   : > { %v5283_v62 = vpop.permute.xlu0 %2859  ;;  %v5285_v50 = vpop.permute.xlu1 %2857  ;;  %3998 = vmatpush3.msra.mxu1 %v2939_v38  ;;  %v2105_v38 = vld [vmem:[#allocation2 + $0x28] ss:$3 sm:$0xff] }
 0x354   : > { %2436 = vrot.lane.b32.xlu1 %v1997_v63, %s6113_s14  ;;  %2466 = vrot.lane.b32.xlu0 %v2011_v2, %s6137_s16  ;;  %v2029_v63 = vld [vmem:[#allocation2 + $0x53] ss:$3 sm:$0xff]  ;;  %s6170_s14 = smov 75  }
 0x355   : > { %v2043_v2 = vld [vmem:[#allocation2 + $0x3c] ss:$3 sm:$0xff] }
 0x356   : > { %v5289_v43 = vpop.permute.xlu0 %2176  ;;  %v5291_v4 = vpop.permute.xlu1 %2174 }
 0x358   : > { %2560 = vrot.lane.b32.xlu1 %v2057_v5, %s6111_s27  ;;  %2590 = vrot.lane.b32.xlu0 %v2071_v6, %s6135_s21  ;;  %v2103_v5 = vld [vmem:[#allocation2 + $0x10] ss:$3 sm:$0xff]  ;;  %s6160_s27 = smov 25  }
 0x359   : > { %v2938_v6 = vld [vmem:[%s6157_s3 + $0x20] sm:$0xff] }
 0x35a   : > { %v5295_v56 = vpop.permute.xlu0 %2208  ;;  %v5297_v7 = vpop.permute.xlu1 %2206  ;;  %3999 = vmatprep.subr.mxu1 %v2938_v6 }
 0x35b   : > { %4000 = vmatpush3.msra.mxu1 %v2938_v6 }
 0x35c   : > { %2220 = vrot.lane.b32.xlu1 %v1893_v9, %s6115_s23  ;;  %2250 = vrot.lane.b32.xlu0 %v1907_v52, %s6123_s17  ;;  %v2869_v9 = vsel %vm1302_vm1, %v2103_v5, %v5217_v8  ;;  %s4198_s23 = smov 80  }
 0x35d   : > { %v2877_v52 = vsel %vm6134_vm2, %v2869_v9, %v5225_v22 }
 0x35e   : > { %v5301_v10 = vpop.permute.xlu0 %2240  ;;  %v5303_v12 = vpop.permute.xlu1 %2238  ;;  %v2885_v55 = vsel %vm1358_vm3, %v2877_v52, %v5231_v25  ;;  %v2936_v25 = vld [vmem:[%s6157_s3 + $0x10] sm:$0xff] }
 0x35f   : > { %v1941_v52 = vld [vmem:[#allocation2 + $0xad] ss:$3 sm:$0xff] }
 0x360   : > { %2344 = vrot.lane.b32.xlu1 %v1953_v13, %s6119_s25  ;;  %2374 = vrot.lane.b32.xlu0 %v1967_v15, %s6125_s26  ;;  %s6158_s25 = smov 55  }
 0x362   : > { %v5310_v17 = vpop.permute.xlu0 %2178  ;;  %v5312_v14 = vpop.permute.xlu1 %2270 }
 0x364   : > { %2468 = vrot.lane.b32.xlu1 %v2013_v19, %s6137_s16  ;;  %2498 = vrot.lane.b32.xlu0 %v2027_v1, %s6158_s25  ;;  %v2089_v19 = vld [vmem:[#allocation2 + $0x27] ss:$3 sm:$0xff] }
 0x365   : > { %v2937_v1 = vld [vmem:[%s6157_s3 + $0x18] sm:$0xff] }
 0x366   : > { %v5322_v24 = vpop.permute.xlu0 %2302  ;;  %v5324_v26 = vpop.permute.xlu1 %2272  ;;  %4001 = vmatprep.subr.mxu1 %v2937_v1 }
 0x367   : > { %4002 = vmatpush3.msra.mxu1 %v2937_v1  ;;  %v2001_v1 = vld [vmem:[#allocation2 + $0x81] ss:$3 sm:$0xff] }
 0x368   : > { %2592 = vrot.lane.b32.xlu1 %v2073_v28, %s6135_s21  ;;  %2622 = vrot.lane.b32.xlu0 %v2087_v32, %s6127_s24  ;;  %v2935_v28 = vld [vmem:[%s6157_s3 + $0x8] sm:$0xff] }
 0x369   : > { %4003 = vmatprep.subr.mxu1 %v2936_v25 }
 0x36a   : > { %v5331_v35 = vpop.permute.xlu0 %2210  ;;  %v5333_v36 = vpop.permute.xlu1 %2180  ;;  %4004 = vmatpush3.msra.mxu1 %v2936_v25 }
 0x36b   : > { %4005 = vmatprep.subr.mxu1 %v2935_v28 }
 0x36c   : > { %2252 = vrot.lane.b32.xlu1 %v1909_v40, %s6123_s17  ;;  %2282 = vrot.lane.b32.xlu0 %v1923_v42, %s6129_s22  ;;  %v1999_v40 = vld [vmem:[#allocation2 + $0x69] ss:$3 sm:$0xff]  ;;  %v2934_v42 = vld [vmem:[%s6157_s3] sm:$0xff]  ;;  %s6165_s17 = smov 30   ;;  %s6231_s3 = smov 40  }
 0x36d   : > { %4006 = vmatpush3.msra.mxu1 %v2935_v28 }
 0x36e   : > { %v5343_v45 = vpop.permute.xlu0 %2334  ;;  %v5345_v39 = vpop.permute.xlu1 %2304  ;;  %4007 = vmatprep.subr.mxu1 %v2934_v42 }
 0x36f   : > { %4008 = vmatpush3.msra.mxu1 %v2934_v42 }
 0x370   : > { %2376 = vrot.lane.b32.xlu1 %v1969_v48, %s6125_s26  ;;  %2406 = vrot.lane.b32.xlu0 %v1983_v49, %s6139_s29  ;;  %v2045_v49 = vld [vmem:[#allocation2 + $0x54] ss:$3 sm:$0xff]  ;;  %s6168_s26 = smov 35  }
 0x372   : > { %v5352_v57 = vpop.permute.xlu0 %2242  ;;  %v5354_v61 = vpop.permute.xlu1 %2212 }
 0x374   : > { %2500 = vrot.lane.b32.xlu1 %v2029_v63, %s6158_s25  ;;  %2530 = vrot.lane.b32.xlu0 %v2043_v2, %s6159_s28  ;;  %v2870_v63 = vsel %vm1302_vm1, %v2105_v38, %v5211_v60  ;;  %v1955_v60 = vld [vmem:[#allocation2 + $0x96] ss:$3 sm:$0xff] }
 0x375   : > { %v2878_v2 = vsel %vm6134_vm2, %v2870_v63, %v5219_v18  ;;  %v2017_v38 = vld [vmem:[#allocation2 + $0x82] ss:$3 sm:$0xff] }
 0x376   : > { %v5368_v13 = vpop.permute.xlu0 %2366  ;;  %v5370_v15 = vpop.permute.xlu1 %2336  ;;  %v2886_v9 = vsel %vm1358_vm3, %v2878_v2, %v5223_v16  ;;  %v2015_v16 = vld [vmem:[#allocation2 + $0x6a] ss:$3 sm:$0xff] }
 0x378   : > { %2624 = vrot.lane.b32.xlu1 %v2089_v19, %s6127_s24  ;;  %2901 = vrot.lane.b32.xlu0 %v2885_v55, %s4198_s23  ;;  %s6163_s24 = smov 65  }
 0x37a   : > { %v5379_v8 = vpop.permute.xlu0 %2274  ;;  %v5381_v22 = vpop.permute.xlu1 %2244 }
 0x37c   : > { %2284 = vrot.lane.b32.xlu1 %v1925_v21, %s6129_s22  ;;  %2314 = vrot.lane.b32.xlu0 %v1939_v23, %s6160_s27  ;;  %s6161_s22 = smov 45   ;;  %v2061_v21 = vld [vmem:[#allocation2 + $0x55] ss:$3 sm:$0xff] }
 0x37e   : > { %v5391_v32 = vpop.permute.xlu0 %2398  ;;  %v5393_v0 = vpop.permute.xlu1 %2368 }
 0x380   : > { %2408 = vrot.lane.b32.xlu1 %v1985_v37, %s6139_s29  ;;  %2438 = vrot.lane.b32.xlu0 %v1999_v40, %s6161_s22  ;;  %v2075_v37 = vld [vmem:[#allocation2 + $0x3e] ss:$3 sm:$0xff]  ;;  %v1957_v40 = vld [vmem:[#allocation2 + $0xae] ss:$3 sm:$0xff] }
 0x382   : > { %v5400_v27 = vpop.permute.xlu0 %2276  ;;  %v5402_v48 = vpop.permute.xlu1 %2182 }
 0x383   : > { %6162 = vst [vmem:[#allocation10_spill] sm:$0xff] %v5402_v48  ;;  %v2095_v48 = vld [vmem:[#allocation2 + $0x6f] ss:$3 sm:$0xff] }
 0x384   : > { %2532 = vrot.lane.b32.xlu1 %v2045_v49, %s6159_s28  ;;  %2562 = vrot.lane.b32.xlu0 %v2059_v54, %s6163_s24  ;;  %v1971_v54 = vld [vmem:[#allocation2 + $0x97] ss:$3 sm:$0xff] }
 0x386   : > { %v5410_v5 = vpop.permute.xlu0 %2400  ;;  %v5412_v6 = vpop.permute.xlu1 %2306 }
 0x388   : > { %2903 = vrot.lane.b32.xlu1 %v2886_v9, %s4198_s23  ;;  %2316 = vrot.lane.b32.xlu0 %v1941_v52, %s6160_s27  ;;  %v2031_v9 = vld [vmem:[#allocation2 + $0x6b] ss:$3 sm:$0xff] }
 0x389   : > { %v2077_v52 = vld [vmem:[#allocation2 + $0x56] ss:$3 sm:$0xff] }
 0x38a   : > { %v5418_v55 = vpop.permute.xlu1 %2430  ;;  %v5420_v19 = vpop.permute.xlu0 %2184 }
 0x38b   : > { %6164 = vst [vmem:[#allocation11_spill] sm:$0xff] %v5420_v19  ;;  %v2093_v19 = vld [vmem:[#allocation2 + $0x57] ss:$3 sm:$0xff] }
 0x38c   : > { %2346 = vrot.lane.b32.xlu1 %v1955_v60, %s6165_s17  ;;  %2440 = vrot.lane.b32.xlu0 %v2001_v1, %s6161_s22 }
 0x38e   : > { %v5424_v18 = vpop.permute.xlu1 %2214  ;;  %v5426_v25 = vpop.permute.xlu0 %2308 }
 0x38f   : > { %6166 = vst [vmem:[#allocation12_spill] sm:$0xff] %v5424_v18  ;;  %v2109_v18 = vld [vmem:[#allocation2 + $0x58] ss:$3 sm:$0xff] }
 0x390   : > { %2470 = vrot.lane.b32.xlu1 %v2015_v16, %s6137_s16  ;;  %2564 = vrot.lane.b32.xlu0 %v2061_v21, %s6163_s24  ;;  %v2091_v16 = vld [vmem:[#allocation2 + $0x3f] ss:$3 sm:$0xff]  ;;  %v1973_v21 = vld [vmem:[#allocation2 + $0xaf] ss:$3 sm:$0xff] }
 0x392   : > { %v5430_v23 = vpop.permute.xlu1 %2338  ;;  %v5432_v28 = vpop.permute.xlu0 %2432 }
 0x394   : > { %2594 = vrot.lane.b32.xlu1 %v2075_v37, %s6135_s21  ;;  %2348 = vrot.lane.b32.xlu0 %v1957_v40, %s6165_s17 }
 0x396   : > { %v5436_v42 = vpop.permute.xlu1 %2462  ;;  %v5438_v49 = vpop.permute.xlu0 %2216 }
 0x397   : > { %6167 = vst [vmem:[#allocation13_spill] sm:$0xff] %v5438_v49  ;;  %v2047_v49 = vld [vmem:[#allocation2 + $0x6c] ss:$3 sm:$0xff] }
 0x398   : > { %2378 = vrot.lane.b32.xlu1 %v1971_v54, %s6168_s26  ;;  %2472 = vrot.lane.b32.xlu0 %v2017_v38, %s6137_s16  ;;  %v1987_v54 = vld [vmem:[#allocation2 + $0x98] ss:$3 sm:$0xff] }
 0x399   : > { %v2033_v38 = vld [vmem:[#allocation2 + $0x83] ss:$3 sm:$0xff] }
 0x39a   : > { %v5442_v63 = vpop.permute.xlu1 %2246  ;;  %v5444_v2 = vpop.permute.xlu0 %2340 }
 0x39b   : > { %6169 = vst [vmem:[#allocation14_spill] sm:$0xff] %v5442_v63  ;;  %v2107_v63 = vld [vmem:[#allocation2 + $0x40] ss:$3 sm:$0xff] }
 0x39c   : > { %2502 = vrot.lane.b32.xlu1 %v2031_v9, %s6158_s25  ;;  %2596 = vrot.lane.b32.xlu0 %v2077_v52, %s6135_s21 }
 0x39e   : > { %v5448_v60 = vpop.permute.xlu1 %2370  ;;  %v5450_v1 = vpop.permute.xlu0 %2464 }
 0x3a0   : > { %2626 = vrot.lane.b32.xlu1 %v2091_v16, %s6170_s14  ;;  %2380 = vrot.lane.b32.xlu0 %v1973_v21, %s6168_s26  ;;  %v2871_v16 = vsel %vm1302_vm1, %v2107_v63, %v5235_v20  ;;  %v2003_v20 = vld [vmem:[#allocation2 + $0x99] ss:$3 sm:$0xff] }
 0x3a1   : > { %v2879_v21 = vsel %vm6134_vm2, %v2871_v16, %v5245_v34  ;;  %v2049_v63 = vld [vmem:[#allocation2 + $0x84] ss:$3 sm:$0xff]  ;;  %v2872_v34 = vsel %vm1302_vm1, %v2109_v18, %v5229_v11  ;;  %v2005_v11 = vld [vmem:[#allocation2 + $0xb1] ss:$3 sm:$0xff] }
 0x3a2   : > { %v5454_v37 = vpop.permute.xlu1 %2494  ;;  %v5456_v40 = vpop.permute.xlu0 %2248  ;;  %v2019_v18 = vld [vmem:[#allocation2 + $0x9a] ss:$3 sm:$0xff] }
 0x3a3   : > { %6171 = vst [vmem:[#allocation15_spill] sm:$0xff] %v5456_v40  ;;  %v2887_v40 = vsel %vm1358_vm3, %v2879_v21, %v5249_v29  ;;  %v2880_v29 = vsel %vm6134_vm2, %v2872_v34, %v5237_v31  ;;  %v2063_v21 = vld [vmem:[#allocation2 + $0x6d] ss:$3 sm:$0xff] }
 0x3a4   : > { %2410 = vrot.lane.b32.xlu1 %v1987_v54, %s6139_s29  ;;  %2504 = vrot.lane.b32.xlu0 %v2033_v38, %s6158_s25  ;;  %v2888_v16 = vsel %vm1358_vm3, %v2880_v29, %v5241_v33  ;;  %v2065_v33 = vld [vmem:[#allocation2 + $0x85] ss:$3 sm:$0xff] }
 0x3a5   : > { %v2079_v29 = vld [vmem:[#allocation2 + $0x6e] ss:$3 sm:$0xff] }
 0x3a6   : > { %v5460_v9 = vpop.permute.xlu1 %2278  ;;  %v5462_v52 = vpop.permute.xlu0 %2372 }
 0x3a7   : > { %6172 = vst [vmem:[#allocation16_spill] sm:$0xff] %v5460_v9  ;;  %v1989_v9 = vld [vmem:[#allocation2 + $0xb0] ss:$3 sm:$0xff] }
 0x3a8   : > { %2534 = vrot.lane.b32.xlu1 %v2047_v49, %s6159_s28  ;;  %2628 = vrot.lane.b32.xlu0 %v2093_v19, %s6170_s14 }
 0x3aa   : > { %v5470_v54 = vpop.permute.xlu1 %2402  ;;  %v5472_v38 = vpop.permute.xlu0 %2496 }
 0x3ac   : > { %2905 = vrot.lane.b32.xlu1 %v2887_v40, %s4198_s23  ;;  %2412 = vrot.lane.b32.xlu0 %v1989_v9, %s6139_s29 }
 0x3ae   : > { %v5478_v49 = vpop.permute.xlu1 %2526  ;;  %v5480_v19 = vpop.permute.xlu0 %2186 }
 0x3af   : > { %6173 = vst [vmem:[#allocation17_spill] sm:$0xff] %v5480_v19  ;;  %v2021_v19 = vld [vmem:[#allocation2 + $0xb2] ss:$3 sm:$0xff] }
 0x3b0   : > { %2442 = vrot.lane.b32.xlu1 %v2003_v20, %s6161_s22  ;;  %2536 = vrot.lane.b32.xlu0 %v2049_v63, %s6159_s28 }
 0x3b2   : > { %v5488_v40 = vpop.permute.xlu1 %2280  ;;  %v5490_v9 = vpop.permute.xlu0 %2310 }
 0x3b3   : > { %6174 = vst [vmem:[#allocation18_spill] sm:$0xff] %v5488_v40  ;;  %6175 = vst [vmem:[#allocation19_spill] sm:$0xff] %v5490_v9  ;;  %v2035_v40 = vld [vmem:[#allocation2 + $0x9b] ss:$3 sm:$0xff] }
 0x3b4   : > { %2566 = vrot.lane.b32.xlu1 %v2063_v21, %s6163_s24  ;;  %2907 = vrot.lane.b32.xlu0 %v2888_v16, %s4198_s23  ;;  %v2081_v9 = vld [vmem:[#allocation2 + $0x86] ss:$3 sm:$0xff] }
 0x3b6   : > { %v5496_v20 = vpop.permute.xlu1 %2404  ;;  %v5498_v63 = vpop.permute.xlu0 %2434 }
 0x3b7   : > { %6176 = vst [vmem:[#allocation20_spill] sm:$0xff] %v5496_v20  ;;  %v2111_v20 = vld [vmem:[#allocation2 + $0x70] ss:$3 sm:$0xff] }
 0x3b8   : > { %2444 = vrot.lane.b32.xlu1 %v2005_v11, %s6161_s22  ;;  %2474 = vrot.lane.b32.xlu0 %v2019_v18, %s6137_s16 }
 0x3ba   : > { %v5502_v31 = vpop.permute.xlu1 %2528  ;;  %v5504_v34 = vpop.permute.xlu0 %2558 }
 0x3bc   : > { %2568 = vrot.lane.b32.xlu1 %v2065_v33, %s6163_s24  ;;  %2598 = vrot.lane.b32.xlu0 %v2079_v29, %s6135_s21 }
 0x3be   : > { %v5508_v16 = vpop.permute.xlu1 %2188  ;;  %v5510_v21 = vpop.permute.xlu0 %2218 }
 0x3bf   : > { %6177 = vst [vmem:[#allocation21_spill] sm:$0xff] %v5508_v16  ;;  %6178 = vst [vmem:[#allocation22_spill] sm:$0xff] %v5510_v21  ;;  %v2037_v21 = vld [vmem:[#allocation2 + $0xb3] ss:$3 sm:$0xff] }
 0x3c0   : > { %2476 = vrot.lane.b32.xlu1 %v2021_v19, %s6137_s16  ;;  %2506 = vrot.lane.b32.xlu0 %v2035_v40, %s6158_s25  ;;  %v2051_v16 = vld [vmem:[#allocation2 + $0x9c] ss:$3 sm:$0xff]  ;;  %v2873_v19 = vsel %vm1302_vm1, %v2111_v20, %v5255_v41  ;;  %v2053_v41 = vld [vmem:[#allocation2 + $0xb4] ss:$3 sm:$0xff]  ;;  %s6228_s16 = smov 20  }
 0x3c1   : > { %v2881_v40 = vsel %vm6134_vm2, %v2873_v19, %v5261_v3  ;;  %v2067_v20 = vld [vmem:[#allocation2 + $0x9d] ss:$3 sm:$0xff] }
 0x3c2   : > { %v5514_v11 = vpop.permute.xlu1 %2312  ;;  %v5516_v18 = vpop.permute.xlu0 %2342 }
 0x3c3   : > { %6179 = vst [vmem:[#allocation23_spill] sm:$0xff] %v5514_v11  ;;  %6180 = vst [vmem:[#allocation24_spill] sm:$0xff] %v5516_v18  ;;  %v2889_v11 = vsel %vm1358_vm3, %v2881_v40, %v5267_v47  ;;  %v2097_v18 = vld [vmem:[#allocation2 + $0x87] ss:$3 sm:$0xff] }
 0x3c4   : > { %2600 = vrot.lane.b32.xlu1 %v2081_v9, %s6135_s21  ;;  %2630 = vrot.lane.b32.xlu0 %v2095_v48, %s6170_s14  ;;  %v2069_v40 = vld [vmem:[#allocation2 + $0xb5] ss:$3 sm:$0xff] }
 0x3c6   : > { %v5520_v33 = vpop.permute.xlu1 %2436  ;;  %v5522_v29 = vpop.permute.xlu0 %2466 }
 0x3c7   : > { %6181 = vst [vmem:[#allocation25_spill] sm:$0xff] %v5520_v33  ;;  %v2113_v33 = vld [vmem:[#allocation2 + $0x88] ss:$3 sm:$0xff] }
 0x3c8   : > { %2508 = vrot.lane.b32.xlu1 %v2037_v21, %s6158_s25  ;;  %2538 = vrot.lane.b32.xlu0 %v2051_v16, %s6159_s28  ;;  %v2874_v3 = vsel %vm1302_vm1, %v2113_v33, %v5251_v30  ;;  %v2083_v30 = vld [vmem:[#allocation2 + $0x9e] ss:$3 sm:$0xff]  ;;  %v2085_v33 = vld [vmem:[#allocation2 + $0xb6] ss:$3 sm:$0xff] }
 0x3c9   : > { %v2882_v47 = vsel %vm6134_vm2, %v2874_v3, %v5257_v44 }
 0x3ca   : > { %v5530_v9 = vpop.permute.xlu1 %2560  ;;  %v5532_v48 = vpop.permute.xlu0 %2590  ;;  %v2890_v19 = vsel %vm1358_vm3, %v2882_v47, %v5265_v46  ;;  %v2099_v46 = vld [vmem:[#allocation2 + $0x9f] ss:$3 sm:$0xff]  ;;  %v2101_v47 = vld [vmem:[#allocation2 + $0xb7] ss:$3 sm:$0xff] }
 0x3cc   : > { %2632 = vrot.lane.b32.xlu1 %v2097_v18, %s6170_s14  ;;  %2909 = vrot.lane.b32.xlu0 %v2889_v11, %s4198_s23 }
 0x3ce   : > { %v5538_v21 = vpop.permute.xlu1 %2220  ;;  %v5540_v16 = vpop.permute.xlu0 %2250 }
 0x3cf   : > { %6182 = vst [vmem:[#allocation26_spill] sm:$0xff] %v5538_v21  ;;  %6183 = vst [vmem:[#allocation27_spill] sm:$0xff] %v5540_v16  ;;  %v1847_v16 = vld [vmem:[#allocation2] ss:$3 sm:$0xff]  ;;  %v2117_v21 = vld [vmem:[#allocation2 + $0xb8] ss:$3 sm:$0xff] }
 0x3d0   : > { %2540 = vrot.lane.b32.xlu1 %v2053_v41, %s6159_s28  ;;  %2570 = vrot.lane.b32.xlu0 %v2067_v20, %s6163_s24 }
 0x3d2   : > { %v5548_v18 = vpop.permute.xlu1 %2344  ;;  %v5550_v11 = vpop.permute.xlu0 %2374 }
 0x3d3   : > { %6184 = vst [vmem:[#allocation28_spill] sm:$0xff] %v5548_v18  ;;  %6185 = vst [vmem:[#allocation29_spill] sm:$0xff] %v5550_v11 }
 0x3d4   : > { %2911 = vrot.lane.b32.xlu1 %v2890_v19, %s4198_s23  ;;  %2572 = vrot.lane.b32.xlu0 %v2069_v40, %s6163_s24  ;;  %v2115_v19 = vld [vmem:[#allocation2 + $0xa0] ss:$3 sm:$0xff]  ;;  %v2646_v40 = vsel %vm1302_vm1, %v1847_v16, %v5291_v4 }
 0x3d5   : > { %v2654_v18 = vsel %vm6134_vm2, %v2646_v40, %v5297_v7 }
 0x3d6   : > { %v5556_v41 = vpop.permute.xlu1 %2468  ;;  %v5558_v20 = vpop.permute.xlu0 %2498  ;;  %v2662_v4 = vsel %vm1358_vm3, %v2654_v18, %v5303_v12 }
 0x3d7   : > { %6186 = vst [vmem:[#allocation30_spill] sm:$0xff] %v5556_v41  ;;  %v2670_v7 = vsel %vm6132_vm4, %v2662_v4, %v5312_v14 }
 0x3d8   : > { %2602 = vrot.lane.b32.xlu1 %v2083_v30, %s6135_s21  ;;  %2604 = vrot.lane.b32.xlu0 %v2085_v33, %s6135_s21  ;;  %v2876_v30 = vsel %vm1302_vm1, %v2117_v21, %v5271_v51  ;;  %v2875_v33 = vsel %vm1302_vm1, %v2115_v19, %v5273_v53  ;;  %s6225_s21 = smov 5  }
 0x3d9   : > { %v2884_v11 = vsel %vm6134_vm2, %v2876_v30, %v5277_v58  ;;  %v2883_v41 = vsel %vm6134_vm2, %v2875_v33, %v5279_v59  ;;  %v2678_v58 = vsel %vm1414_vm5, %v2670_v7, %v5322_v24 }
 0x3da   : > { %v5562_v44 = vpop.permute.xlu1 %2592  ;;  %v2623_v3 = vpop.permute.xlu0 %2622  ;;  %v2892_v51 = vsel %vm1358_vm3, %v2884_v11, %v5283_v62  ;;  %v2891_v53 = vsel %vm1358_vm3, %v2883_v41, %v5285_v50  ;;  %v2686_v59 = vsel %vm1442_vm6, %v2678_v58, %v5343_v45 }
 0x3db   : > { %v2694_v62 = vsel %vm1470_vm7, %v2686_v59, %v5368_v13 }
 0x3dc   : > { %2634 = vrot.lane.b32.xlu1 %v2099_v46, %s6170_s14  ;;  %2636 = vrot.lane.b32.xlu0 %v2101_v47, %s6170_s14  ;;  %v2702_v14 = vsel %vm1510_vm8, %v2694_v62, %v5391_v32  ;;  %v1849_v47 = vld [vmem:[#allocation2 + $0x18] ss:$3 sm:$0xff]  ;;  %s6227_s14 = smov 15  }
 0x3dd   : > { %v2711_v24 = vsel %vm2710_vm11, %v2702_v14, %v5418_v55  ;;  %v2647_v40 = vsel %vm1302_vm1, %v1849_v47, %v5289_v43 }
 0x3de   : > { %v5580_v16 = vpop.permute.xlu1 %2252  ;;  %v5582_v46 = vpop.permute.xlu0 %2282  ;;  %v2720_v45 = vsel %vm6131_vm12, %v2711_v24, %v5436_v42  ;;  %vm6133_vm12 = vcmask 818176  }
 0x3df   : > { %v2729_v13 = vsel %vm2728_vm13, %v2720_v45, %v5454_v37 }
 0x3e0   : > { %2913 = vrot.lane.b32.xlu1 %v2891_v53, %s4198_s23  ;;  %2915 = vrot.lane.b32.xlu0 %v2892_v51, %s4198_s23  ;;  %v2738_v32 = vsel %vm2737_vm14, %v2729_v13, %v5478_v49  ;;  %v2655_v49 = vsel %vm6134_vm2, %v2647_v40, %v5295_v56  ;;  %s6226_s23 = smov 10  }
 0x3e1   : > { %v2747_v55 = vsel %vm2746_vm15, %v2738_v32, %v5504_v34  ;;  %v2663_v34 = vsel %vm1358_vm3, %v2655_v49, %v5301_v10 }
 0x3e2   : > { %v5598_v12 = vpop.permute.xlu1 %2376  ;;  %v5600_v50 = vpop.permute.xlu0 %2406  ;;  %v2756_v42 = vsel %vm2755_vm0, %v2747_v55, %v5532_v48 }
 0x3e3   : > { %v2765_v11 = vsel %vm2764_vm9, %v2756_v42, %v2623_v3  ;;  %v2671_v3 = vsel %vm6132_vm4, %v2663_v34, %v5324_v26  ;;  %vm6187_vm4 = vcmask 408576   ;;  %v1851_v42 = vld [vmem:[#allocation2 + $0x30] ss:$3 sm:$0xff] }
 0x3e4   : > { %v2679_v33 = vsel %vm1414_vm5, %v2671_v3, %v5345_v39 }
 0x3e5   : > { %v2687_v43 = vsel %vm1442_vm6, %v2679_v33, %v5370_v15 }
 0x3e6   : > { %v5610_v21 = vpop.permute.xlu1 %2500  ;;  %v5612_v18 = vpop.permute.xlu0 %2530  ;;  %v2695_v4 = vsel %vm1470_vm7, %v2687_v43, %v5393_v0 }
 0x3e7   : > { %v2703_v10 = vsel %vm1510_vm8, %v2695_v4, %v5410_v5 }
 0x3e8   : > { %v2712_v53 = vsel %vm2710_vm11, %v2703_v10, %v5432_v28 }
 0x3e9   : > { %v2721_v26 = vsel %vm6187_vm4, %v2712_v53, %v5450_v1  ;;  %vm6188_vm4 = vcmask 162816  }
 0x3ea   : > { %v2625_v37 = vpop.permute.xlu1 %2624  ;;  %v2902_v41 = vpop.permute.xlu0 %2901  ;;  %v2730_v39 = vsel %vm2728_vm13, %v2721_v26, %v5472_v38 }
 0x3eb   : > { %v2926_v19 = vsel %vm2925_vm10, %v2765_v11, %v2902_v41  ;;  %v2739_v0 = vsel %vm2737_vm14, %v2730_v39, %v5502_v31  ;;  %v2648_v11 = vsel %vm1302_vm1, %v1851_v42, %v5310_v17 }
 0x3ec   : > { %4009 = vmatprep.mubr.msk.f32.mxu1 %vm6133_vm12, %v2926_v19  ;;  %v2748_v58 = vsel %vm2746_vm15, %v2739_v0, %v5530_v9  ;;  %v6191_v0 = vld [vmem:[#allocation20_spill] sm:$0xff] }
 0x3ed   : > { %v2757_v5 = vsel %vm2755_vm0, %v2748_v58, %v5562_v44  ;;  %v6192_v58 = vld [vmem:[#allocation25_spill] sm:$0xff] }
 0x3ee   : > { %v5629_v48 = vpop.permute.xlu1 %2284  ;;  %v5631_v30 = vpop.permute.xlu0 %2314  ;;  %v2766_v59 = vsel %vm2764_vm9, %v2757_v5, %v2625_v37  ;;  %v2656_v37 = vsel %vm6134_vm2, %v2648_v11, %v5331_v35 }
 0x3ef   : > { %v2664_v41 = vsel %vm1358_vm3, %v2656_v37, %v5352_v57  ;;  %v1853_v57 = vld [vmem:[#allocation2 + $0x48] ss:$3 sm:$0xff] }
 0x3f0   : > { %v2672_v40 = vsel %vm6188_vm4, %v2664_v41, %v5379_v8  ;;  %v2649_v8 = vsel %vm1302_vm1, %v1853_v57, %v5333_v36  ;;  %vm6189_vm4 = vcmask 408576   ;;  %v6196_v57 = vld [vmem:[#allocation12_spill] sm:$0xff] }
 0x3f1   : > { %v2680_v49 = vsel %vm1414_vm5, %v2672_v40, %v5412_v6 }
 0x3f2   : > { %v5641_v56 = vpop.permute.xlu1 %2408  ;;  %v5643_v51 = vpop.permute.xlu0 %2438  ;;  %v2688_v34 = vsel %vm1442_vm6, %v2680_v49, %v5430_v23  ;;  %v2657_v23 = vsel %vm6134_vm2, %v2649_v8, %v5354_v61 }
 0x3f3   : > { %v2696_v17 = vsel %vm1470_vm7, %v2688_v34, %v5448_v60  ;;  %v2665_v43 = vsel %vm1358_vm3, %v2657_v23, %v5381_v22 }
 0x3f4   : > { %v2704_v33 = vsel %vm1510_vm8, %v2696_v17, %v5470_v54  ;;  %v1855_v17 = vld [vmem:[#allocation2 + $0x60] ss:$3 sm:$0xff] }
 0x3f5   : > { %v2713_v6 = vsel %vm2710_vm11, %v2704_v33, %v5498_v63  ;;  %v6197_v33 = vld [vmem:[#allocation14_spill] sm:$0xff] }
 0x3f6   : > { %v2533_v15 = vpop.permute.xlu1 %2532  ;;  %v2563_v7 = vpop.permute.xlu0 %2562  ;;  %v2722_v60 = vsel %vm6189_vm4, %v2713_v6, %v5522_v29 }
 0x3f7   : > { %v2731_v4 = vsel %vm2728_vm13, %v2722_v60, %v5558_v20  ;;  %v6198_v60 = vld [vmem:[#allocation16_spill] sm:$0xff] }
 0x3f8   : > { %v2740_v63 = vsel %vm2737_vm14, %v2731_v4, %v5612_v18  ;;  %v6200_v4 = vld [vmem:[#allocation19_spill] sm:$0xff] }
 0x3f9   : > { %v2749_v53 = vsel %vm2746_vm15, %v2740_v63, %v2563_v7 }
 0x3fa   : > { %v2904_v28 = vpop.permute.xlu1 %2903  ;;  %v5660_v62 = vpop.permute.xlu0 %2316 }
 0x3fb   : > { %v2927_v1 = vsel %vm2925_vm10, %v2766_v59, %v2904_v28 }
 0x3fc   : > { %4010 = vmatmul.mubr.msk.f32.vlgmr.msra.gmra.mxu1 %vm6133_vm12, %v2927_v1  ;;  %vm6190_vm12 = vcmask 162816  }
 0x3fd   : > { %v2673_v36 = vsel %vm6190_vm12, %v2665_v43, %v5400_v27  ;;  %vm6193_vm12 = vcmask 818176  }
 0x3fe   : > { %v5664_v38 = vpop.permute.xlu1 %2346  ;;  %v5666_v14 = vpop.permute.xlu0 %2440  ;;  %v2681_v61 = vsel %vm1414_vm5, %v2673_v36, %v5426_v25  ;;  %v6201_v36 = vld [vmem:[#allocation24_spill] sm:$0xff] }
 0x3ff   : > { %v2689_v29 = vsel %vm1442_vm6, %v2681_v61, %v5444_v2  ;;  %v6194_v2 = vld [vmem:[#allocation30_spill] sm:$0xff]  ;;  %v6202_v61 = vld [vmem:[#allocation29_spill] sm:$0xff] }
 0x400   : > { %v2697_v20 = vsel %vm1470_vm7, %v2689_v29, %v5462_v52 }
 0x401   : > { %v2705_v18 = vsel %vm1510_vm8, %v2697_v20, %v6191_v0  ;;  %v1857_v20 = vld [vmem:[#allocation2 + $0x78] ss:$3 sm:$0xff] }
 0x402   : > { %v5668_v31 = vpop.permute.xlu1 %2470  ;;  %v2565_v24 = vpop.permute.xlu0 %2564  ;;  %v2714_v7 = vsel %vm2710_vm11, %v2705_v18, %v6192_v58 }
 0x403   : > { %v2723_v5 = vsel %vm6189_vm4, %v2714_v7, %v6194_v2  ;;  %vm6199_vm4 = vcmask 162816   ;;  %v6206_v2 = vld [vmem:[#allocation15_spill] sm:$0xff] }
 0x404   : > { %v2732_v52 = vsel %vm2728_vm13, %v2723_v5, %v5610_v21 }
 0x405   : > { %v2741_v1 = vsel %vm2737_vm14, %v2732_v52, %v2533_v15  ;;  %v6195_v15 = vld [vmem:[#allocation10_spill] sm:$0xff] }
 0x406   : > { %v2595_v9 = vpop.permute.xlu1 %2594  ;;  %v5670_v45 = vpop.permute.xlu0 %2348 }
 0x407   : > { %v2758_v22 = vsel %vm2755_vm0, %v2749_v53, %v2595_v9  ;;  %v2750_v9 = vsel %vm2746_vm15, %v2741_v1, %v2565_v24  ;;  %v2650_v24 = vsel %vm1302_vm1, %v1855_v17, %v6195_v15  ;;  %v6209_v17 = vld [vmem:[#allocation28_spill] sm:$0xff] }
 0x40a   : > { %v5672_v44 = vpop.permute.xlu1 %2378  ;;  %v5674_v13 = vpop.permute.xlu0 %2472 }
 0x40e   : > { %v5676_v32 = vpop.permute.xlu1 %2502  ;;  %v2597_v55 = vpop.permute.xlu0 %2596 }
 0x40f   : > { %v2759_v42 = vsel %vm2755_vm0, %v2750_v9, %v2597_v55  ;;  %v2658_v55 = vsel %vm6134_vm2, %v2650_v24, %v6196_v57  ;;  %v6207_v9 = vld [vmem:[#allocation18_spill] sm:$0xff] }
 0x410   : > { %v2666_v8 = vsel %vm1358_vm3, %v2658_v55, %v6197_v33 }
 0x411   : > { %v2674_v43 = vsel %vm6199_vm4, %v2666_v8, %v6198_v60 }
 0x412   : > { %v2627_v47 = vpop.permute.xlu1 %2626  ;;  %v5684_v19 = vpop.permute.xlu0 %2380 }
 0x413   : > { %v2767_v26 = vsel %vm2764_vm9, %v2758_v22, %v2627_v47 }
 0x416   : > { %v5694_v3 = vpop.permute.xlu1 %2410  ;;  %v5696_v35 = vpop.permute.xlu0 %2504 }
 0x41a   : > { %v2535_v10 = vpop.permute.xlu1 %2534  ;;  %v2629_v54 = vpop.permute.xlu0 %2628 }
 0x41b   : > { %v2768_v11 = vsel %vm2764_vm9, %v2759_v42, %v2629_v54  ;;  %v2682_v54 = vsel %vm1414_vm5, %v2674_v43, %v6200_v4  ;;  %v1859_v43 = vld [vmem:[#allocation2 + $0x90] ss:$3 sm:$0xff]  ;;  %v1861_v4 = vld [vmem:[#allocation2 + $0xa8] ss:$3 sm:$0xff] }
 0x41c   : > { %v2690_v63 = vsel %vm1442_vm6, %v2682_v54, %v6201_v36 }
 0x41d   : > { %v2698_v53 = vsel %vm1470_vm7, %v2690_v63, %v6202_v61  ;;  %v6213_v63 = vld [vmem:[#allocation21_spill] sm:$0xff] }
 0x41e   : > { %v2906_v39 = vpop.permute.xlu1 %2905  ;;  %v5725_v27 = vpop.permute.xlu0 %2412 }
 0x41f   : > { %v2928_v25 = vsel %vm2925_vm10, %v2767_v26, %v2906_v39  ;;  %v2706_v26 = vsel %vm1510_vm8, %v2698_v53, %v5600_v50  ;;  %v6203_v39 = vld [vmem:[#allocation11_spill] sm:$0xff]  ;;  %v6214_v53 = vld [vmem:[#allocation22_spill] sm:$0xff] }
 0x420   : > { %4012 = vmatprep.mubr.msk.f32.mxu1 %vm6193_vm12, %v2928_v25  ;;  %v2651_v0 = vsel %vm1302_vm1, %v1857_v20, %v6203_v39  ;;  %v2715_v18 = vsel %vm2710_vm11, %v2706_v26, %v5643_v51  ;;  %v6204_v25 = vld [vmem:[#allocation13_spill] sm:$0xff]  ;;  %v6208_v51 = vld [vmem:[#allocation23_spill] sm:$0xff] }
 0x421   : > { %v2659_v58 = vsel %vm6134_vm2, %v2651_v0, %v6204_v25  ;;  %v6216_v26 = vld [vmem:[#allocation27_spill] sm:$0xff] }
 0x422   : > { %v5737_v59 = vpop.permute.xlu1 %2442  ;;  %v2537_v28 = vpop.permute.xlu0 %2536  ;;  %v2667_v5 = vsel %vm1358_vm3, %v2659_v58, %v6206_v2 }
 0x423   : > { %v2675_v42 = vsel %vm6199_vm4, %v2667_v5, %v6207_v9  ;;  %vm6211_vm4 = vcmask 408576  }
 0x426   : > { %v2567_v37 = vpop.permute.xlu1 %2566  ;;  %v2908_v41 = vpop.permute.xlu0 %2907 }
 0x427   : > { %v2929_v47 = vsel %vm2925_vm10, %v2768_v11, %v2908_v41  ;;  %v2683_v41 = vsel %vm1414_vm5, %v2675_v42, %v6208_v51 }
 0x428   : > { %4013 = vmatmul.mubr.msk.f32.gmra.mxu1 %vm6193_vm12, %v2929_v47  ;;  %vm6205_vm12 = vcmask 408576  }
 0x429   : > { %v2724_v7 = vsel %vm6205_vm12, %v2715_v18, %v5668_v31  ;;  %v2691_v31 = vsel %vm1442_vm6, %v2683_v41, %v6209_v17  ;;  %vm6210_vm12 = vcmask 818176  }
 0x42a   : > { %v5745_v40 = vpop.permute.xlu1 %2444  ;;  %v5747_v21 = vpop.permute.xlu0 %2474  ;;  %v2733_v52 = vsel %vm2728_vm13, %v2724_v7, %v5676_v32  ;;  %v2699_v32 = vsel %vm1470_vm7, %v2691_v31, %v5598_v12 }
 0x42b   : > { %v2742_v11 = vsel %vm2737_vm14, %v2733_v52, %v2535_v10  ;;  %v2707_v10 = vsel %vm1510_vm8, %v2699_v32, %v5641_v56  ;;  %v6212_v56 = vld [vmem:[#allocation17_spill] sm:$0xff] }
 0x42c   : > { %v2751_v47 = vsel %vm2746_vm15, %v2742_v11, %v2567_v37  ;;  %v2716_v37 = vsel %vm2710_vm11, %v2707_v10, %v5666_v14  ;;  %v2652_v36 = vsel %vm1302_vm1, %v1859_v43, %v6212_v56  ;;  %v2653_v14 = vsel %vm1302_vm1, %v1861_v4, %v6213_v63 }
 0x42e   : > { %v2569_v49 = vpop.permute.xlu1 %2568  ;;  %v2599_v34 = vpop.permute.xlu0 %2598 }
 0x42f   : > { %v2760_v15 = vsel %vm2755_vm0, %v2751_v47, %v2599_v34  ;;  %v2725_v34 = vsel %vm6211_vm4, %v2716_v37, %v5674_v13  ;;  %v2660_v13 = vsel %vm6134_vm2, %v2652_v36, %v6214_v53 }
 0x430   : > { %v2734_v12 = vsel %vm2728_vm13, %v2725_v34, %v5696_v35  ;;  %v2668_v39 = vsel %vm1358_vm3, %v2660_v13, %v6216_v26 }
 0x431   : > { %v2743_v54 = vsel %vm2737_vm14, %v2734_v12, %v2537_v28 }
 0x432   : > { %v5755_v6 = vpop.permute.xlu1 %2476  ;;  %v5757_v23 = vpop.permute.xlu0 %2506  ;;  %v2752_v61 = vsel %vm2746_vm15, %v2743_v54, %v2569_v49 }
 0x436   : > { %v2601_v29 = vpop.permute.xlu1 %2600  ;;  %v2631_v22 = vpop.permute.xlu0 %2630 }
 0x437   : > { %v2769_v24 = vsel %vm2764_vm9, %v2760_v15, %v2631_v22  ;;  %v6215_v22 = vld [vmem:[#allocation26_spill] sm:$0xff]  ;;  %v2761_v20 = vsel %vm2755_vm0, %v2752_v61, %v2601_v29 }
 0x438   : > { %v2661_v35 = vsel %vm6134_vm2, %v2653_v14, %v6215_v22  ;;  %vm6219_vm2 = vcmask 818176   ;;  %v3802_v15 = vld [vmem:[%s6224_s4] ss:$0 sm:$0xff] }
 0x439   : > { %v2669_v28 = vsel %vm1358_vm3, %v2661_v35, %v5580_v16 }
 0x43a   : > { %v2509_v1 = vpop.permute.xlu1 %2508  ;;  %v2539_v50 = vpop.permute.xlu0 %2538 }
 0x43e   : > { %v2633_v57 = vpop.permute.xlu1 %2632  ;;  %v2910_v55 = vpop.permute.xlu0 %2909 }
 0x43f   : > { %v2930_v33 = vsel %vm2925_vm10, %v2769_v24, %v2910_v55  ;;  %v2770_v0 = vsel %vm2764_vm9, %v2761_v20, %v2633_v57 }
 0x440   : > { %4015 = vmatprep.mubr.msk.f32.mxu1 %vm6210_vm12, %v2930_v33  ;;  %vm6217_vm12 = vcmask 162816  }
 0x441   : > { %v2676_v49 = vsel %vm6217_vm12, %v2668_v39, %v5582_v46  ;;  %vm6218_vm4 = vmmov %vm6217_vm12 }
 0x442   : > { %v2541_v8 = vpop.permute.xlu1 %2540  ;;  %v2571_v60 = vpop.permute.xlu0 %2570  ;;  %v2677_v58 = vsel %vm6218_vm4, %v2669_v28, %v5629_v48  ;;  %v2684_v29 = vsel %vm1414_vm5, %v2676_v49, %v5631_v30  ;;  %vm6222_vm4 = vcmask 818176  }
 0x443   : > { %v2685_v2 = vsel %vm1414_vm5, %v2677_v58, %v5660_v62  ;;  %v2692_v16 = vsel %vm1442_vm6, %v2684_v29, %v5664_v38 }
 0x444   : > { %v2693_v5 = vsel %vm1442_vm6, %v2685_v2, %v5670_v45  ;;  %v2700_v46 = vsel %vm1470_vm7, %v2692_v16, %v5672_v44 }
 0x445   : > { %v2701_v48 = vsel %vm1470_vm7, %v2693_v5, %v5684_v19  ;;  %v2708_v30 = vsel %vm1510_vm8, %v2700_v46, %v5694_v3 }
 0x446   : > { %v2912_v18 = vpop.permute.xlu1 %2911  ;;  %v2573_v25 = vpop.permute.xlu0 %2572  ;;  %v2709_v62 = vsel %vm1510_vm8, %v2701_v48, %v5725_v27  ;;  %v2717_v38 = vsel %vm2710_vm11, %v2708_v30, %v5737_v59 }
 0x447   : > { %v2931_v7 = vsel %vm2925_vm10, %v2770_v0, %v2912_v18  ;;  %v2718_v45 = vsel %vm2710_vm11, %v2709_v62, %v5745_v40  ;;  %v3512_v62 = vld [vmem:[%s6102_s5 + $0x48] sm:$0x7] }
 0x448   : > { %4016 = vmatmul.mubr.msk.f32.gmra.mxu1 %vm6219_vm2, %v2931_v7  ;;  %vm6220_vm2 = vcmask 408576  }
 0x449   : > { %v2726_v44 = vsel %vm6220_vm2, %v2717_v38, %v5747_v21  ;;  %vm6221_vm12 = vmmov %vm6220_vm2  ;;  %v3511_v38 = vld [vmem:[%s6102_s5 + $0x40] sm:$0xff] }
 0x44a   : > { %v2603_v52 = vpop.permute.xlu1 %2602  ;;  %v2605_v9 = vpop.permute.xlu0 %2604  ;;  %v2727_v19 = vsel %vm6221_vm12, %v2718_v45, %v5755_v6  ;;  %v2735_v42 = vsel %vm2728_vm13, %v2726_v44, %v5757_v23  ;;  %vm6223_vm2 = vmmov %vm6222_vm4  ;;  %vm6232_vm12 = vcmask 80896  }
 0x44b   : > { %v2736_v3 = vsel %vm2728_vm13, %v2727_v19, %v2509_v1  ;;  %v2744_v27 = vsel %vm2737_vm14, %v2735_v42, %v2539_v50  ;;  %v3510_v19 = vld [vmem:[%s6102_s5 + $0x38] sm:$0xff] }
 0x44c   : > { %v2745_v59 = vsel %vm2737_vm14, %v2736_v3, %v2541_v8  ;;  %v2753_v41 = vsel %vm2746_vm15, %v2744_v27, %v2571_v60 }
 0x44d   : > { %v2754_v40 = vsel %vm2746_vm15, %v2745_v59, %v2573_v25  ;;  %v2762_v21 = vsel %vm2755_vm0, %v2753_v41, %v2603_v52  ;;  %v3507_v41 = vld [vmem:[%s6102_s5 + $0x20] sm:$0xff] }
 0x44e   : > { %v2635_v11 = vpop.permute.xlu1 %2634  ;;  %v2637_v51 = vpop.permute.xlu0 %2636  ;;  %v2763_v47 = vsel %vm2755_vm0, %v2754_v40, %v2605_v9 }
 0x44f   : > { %v2771_v6 = vsel %vm2764_vm9, %v2762_v21, %v2635_v11  ;;  %v2772_v23 = vsel %vm2764_vm9, %v2763_v47, %v2637_v51  ;;  %v3509_v11 = vld [vmem:[%s6102_s5 + $0x30] sm:$0xff]  ;;  %v3508_v51 = vld [vmem:[%s6102_s5 + $0x28] sm:$0xff]  ;;  %v3506_v47 = vld [vmem:[%s6102_s5 + $0x18] sm:$0xff] }
 0x452   : > { %v2914_v17 = vpop.permute.xlu1 %2913  ;;  %v2916_v1 = vpop.permute.xlu0 %2915 }
 0x453   : > { %v2932_v31 = vsel %vm2925_vm10, %v2771_v6, %v2914_v17  ;;  %v2933_v50 = vsel %vm2925_vm10, %v2772_v23, %v2916_v1  ;;  %vm3532_vm10 = vcmask 1042432   ;;  %v3505_v6 = vld [vmem:[%s6102_s5 + $0x10] sm:$0xff]  ;;  %v3504_v1 = vld [vmem:[%s6102_s5 + $0x8] sm:$0xff] }
 0x454   : > { %4018 = vmatprep.mubr.msk.f32.mxu1 %vm6222_vm4, %v2932_v31  ;;  %4021 = vmatprep.subr.msk.mxu1 %vm3532_vm10, %v3512_v62  ;;  %vm6233_vm4 = vcmask 162816  }
 0x455   : > { %4019 = vmatmul.mubr.msk.f32.gmra.mxu1 %vm6223_vm2, %v2933_v50  ;;  %vm6234_vm2 = vcmask 408576  }
 0x456   : > { %4022 = vmatpush3.msk.msra.mxu1 %vm3532_vm10, %v3512_v62  ;;  %vm6235_vm10 = vmmov %vm6232_vm12 }
 0x457   : > { %4023 = vmatprep.subr.mxu1 %v3511_v38 }
 0x458   : > { %4024 = vmatpush3.msra.mxu1 %v3511_v38 }
 0x459   : > { %4025 = vmatprep.subr.mxu1 %v3510_v19 }
 0x45a   : > { %4026 = vmatpush3.msra.mxu1 %v3510_v19 }
 0x45b   : > { %4027 = vmatprep.subr.mxu1 %v3509_v11 }
 0x45c   : > { %4028 = vmatpush3.msra.mxu1 %v3509_v11 }
 0x45d   : > { %4029 = vmatprep.subr.mxu1 %v3508_v51 }
 0x45e   : > { %4030 = vmatpush3.msra.mxu1 %v3508_v51 }
 0x45f   : > { %4031 = vmatprep.subr.mxu1 %v3507_v41 }
 0x460   : > { %4032 = vmatpush3.msra.mxu1 %v3507_v41 }
 0x461   : > { %4033 = vmatprep.subr.mxu1 %v3506_v47 }
 0x462   : > { %4034 = vmatpush3.msra.mxu1 %v3506_v47 }
 0x463   : > { %4035 = vmatprep.subr.mxu1 %v3505_v6 }
 0x464   : > { %4036 = vmatpush3.msra.mxu1 %v3505_v6 }
 0x465   : > { %4037 = vmatprep.subr.mxu1 %v3504_v1 }
 0x466   : > { %4038 = vmatpush3.msra.mxu1 %v3504_v1 }
 0x4bc   : > { %v4011_v32 = vpop.f32.mrf.mxu1 }
 0x4bd   : > { %v3055_v24 = vadd.f32 %v4011_v32, %v3802_v15 }
 0x4be   : > { %v3049_v57 = vpop.f32.mrf.mxu1 }
 0x4bf   : > { %v3089_v55 = vmax.f32 %v3055_v24, 0.0  ;;  %v3050_v10 = vadd.f32 %v3802_v15, %v3049_v57 }
 0x4c1   : > { %3097 = vst.msk [vmem:[#allocation3 + $0x8] sm:$0xff] %vm1302_vm1, %v3089_v55  ;;  %v3088_v33 = vmax.f32 %v3050_v10, 0.0 }
 0x4c3   : > { %3096 = vst.msk [vmem:[#allocation3] sm:$0xff] %vm1302_vm1, %v3088_v33 }
 0x4ca   : > { %v3112_v37 = vld [vmem:[#allocation3 + $0x1] ss:$2 sm:$0xff] }
 0x4cb   : > { %3227 = vrot.lane.b32.xlu1 %v3112_v37, %s6225_s21 }
 0x4e8   : > { %v4014_v34 = vpop.f32.mrf.mxu1 }
 0x4e9   : > { %v3065_v12 = vadd.f32 %v4014_v34, %v3802_v15 }
 0x4ea   : > { %v3059_v8 = vpop.f32.mrf.mxu1 }
 0x4eb   : > { %v3091_v60 = vmax.f32 %v3065_v12, 0.0  ;;  %v3060_v43 = vadd.f32 %v3802_v15, %v3059_v8 }
 0x4ed   : > { %3099 = vst.msk [vmem:[#allocation3 + $0x18] sm:$0xff] %vm1302_vm1, %v3091_v60  ;;  %v3090_v4 = vmax.f32 %v3060_v43, 0.0 }
 0x4ef   : > { %3098 = vst.msk [vmem:[#allocation3 + $0x10] sm:$0xff] %vm1302_vm1, %v3090_v4 }
 0x4f6   : > { %v3120_v54 = vld [vmem:[#allocation3 + $0x2] ss:$2 sm:$0xff]  ;;  %v3114_v56 = vld [vmem:[#allocation3 + $0x11] ss:$2 sm:$0xff] }
 0x4f7   : > { %3243 = vrot.lane.b32.xlu1 %v3120_v54, %s6226_s23  ;;  %3229 = vrot.lane.b32.xlu0 %v3114_v56, %s6225_s21  ;;  %v3128_v36 = vld [vmem:[#allocation3 + $0x3] ss:$2 sm:$0xff]  ;;  %v3136_v14 = vld [vmem:[#allocation3 + $0x4] ss:$2 sm:$0xff] }
 0x4f8   : > { %v3144_v63 = vld [vmem:[#allocation3 + $0x5] ss:$2 sm:$0xff]  ;;  %v3152_v61 = vld [vmem:[#allocation3 + $0x6] ss:$2 sm:$0xff] }
 0x4f9   : > { %v3160_v53 = vld [vmem:[#allocation3 + $0x7] ss:$2 sm:$0xff]  ;;  %v3168_v13 = vld [vmem:[#allocation3 + $0x8] ss:$2 sm:$0xff] }
 0x4fa   : > { %v3176_v26 = vld [vmem:[#allocation3 + $0x9] ss:$2 sm:$0xff]  ;;  %v3184_v18 = vld [vmem:[#allocation3 + $0xa] ss:$2 sm:$0xff] }
 0x4fb   : > { %3259 = vrot.lane.b32.xlu1 %v3128_v36, %s6227_s14  ;;  %3291 = vrot.lane.b32.xlu0 %v3144_v63, %s6160_s27  ;;  %v3192_v25 = vld [vmem:[#allocation3 + $0xb] ss:$2 sm:$0xff]  ;;  %v3200_v7 = vld [vmem:[#allocation3 + $0xc] ss:$2 sm:$0xff] }
 0x4fc   : > { %v3208_v48 = vld [vmem:[#allocation3 + $0xd] ss:$2 sm:$0xff]  ;;  %v3216_v9 = vld [vmem:[#allocation3 + $0xe] ss:$2 sm:$0xff] }
 0x4ff   : > { %3275 = vrot.lane.b32.xlu1 %v3136_v14, %s6228_s16  ;;  %3307 = vrot.lane.b32.xlu0 %v3152_v61, %s6165_s17 }
 0x503   : > { %3323 = vrot.lane.b32.xlu0 %v3160_v53, %s6168_s26 }
 0x507   : > { %3339 = vrot.lane.b32.xlu0 %v3168_v13, %s6139_s29  ;;  %s6230_s29 = smov 70  }
 0x508   : > { %v4017_v22 = vpop.f32.mrf.mxu1 }
 0x509   : > { %v3075_v35 = vadd.f32 %v4017_v22, %v3802_v15 }
 0x50a   : > { %v3069_v20 = vpop.f32.mrf.mxu1 }
 0x50b   : > { %v3093_v39 = vmax.f32 %v3075_v35, 0.0  ;;  %v3070_v28 = vadd.f32 %v3802_v15, %v3069_v20  ;;  %3355 = vrot.lane.b32.xlu0 %v3176_v26, %s6161_s22 }
 0x50d   : > { %3101 = vst.msk [vmem:[#allocation3 + $0x28] sm:$0xff] %vm1302_vm1, %v3093_v39  ;;  %v3092_v0 = vmax.f32 %v3070_v28, 0.0 }
 0x50f   : > { %3100 = vst.msk [vmem:[#allocation3 + $0x20] sm:$0xff] %vm1302_vm1, %v3092_v0  ;;  %3371 = vrot.lane.b32.xlu0 %v3184_v18, %s6229_s0 }
 0x513   : > { %3387 = vrot.lane.b32.xlu0 %v3192_v25, %s6158_s25 }
 0x515   : > { %v4020_v49 = vpop.f32.mrf.mxu1 }
 0x516   : > { %v3085_v58 = vadd.f32 %v4020_v49, %v3802_v15  ;;  %v3138_v29 = vld [vmem:[#allocation3 + $0x14] ss:$2 sm:$0xff]  ;;  %v3146_v52 = vld [vmem:[#allocation3 + $0x15] ss:$2 sm:$0xff] }
 0x517   : > { %3403 = vrot.lane.b32.xlu0 %v3200_v7, %s6159_s28  ;;  %v3079_v2 = vpop.f32.mrf.mxu1  ;;  %3277 = vrot.lane.b32.xlu1 %v3138_v29, %s6228_s16  ;;  %v3154_v30 = vld [vmem:[#allocation3 + $0x16] ss:$2 sm:$0xff]  ;;  %v3162_v45 = vld [vmem:[#allocation3 + $0x17] ss:$2 sm:$0xff] }
 0x518   : > { %v3095_v16 = vmax.f32 %v3085_v58, 0.0  ;;  %v3080_v5 = vadd.f32 %v3802_v15, %v3079_v2  ;;  %v3122_v44 = vld [vmem:[#allocation3 + $0x12] ss:$2 sm:$0xff]  ;;  %v3130_v3 = vld [vmem:[#allocation3 + $0x13] ss:$2 sm:$0xff]  ;;  %v3503_v15 = vld [vmem:[%s6102_s5] sm:$0xff] }
 0x519   : > { %v3170_v42 = vld [vmem:[#allocation3 + $0x18] ss:$2 sm:$0xff]  ;;  %v3178_v27 = vld [vmem:[#allocation3 + $0x19] ss:$2 sm:$0xff]  ;;  %4039 = vmatprep.subr.mxu1 %v3503_v15 }
 0x51a   : > { %3103 = vst.msk [vmem:[#allocation3 + $0x38] sm:$0xff] %vm1302_vm1, %v3095_v16  ;;  %v3094_v46 = vmax.f32 %v3080_v5, 0.0  ;;  %v3116_v59 = vld [vmem:[#allocation3 + $0x21] ss:$2 sm:$0xff]  ;;  %v3186_v40 = vld [vmem:[#allocation3 + $0x1a] ss:$2 sm:$0xff]  ;;  %4040 = vmatpush3.msra.mxu1 %v3503_v15 }
 0x51b   : > { %3419 = vrot.lane.b32.xlu0 %v3208_v48, %s6163_s24  ;;  %3293 = vrot.lane.b32.xlu1 %v3146_v52, %s6160_s27  ;;  %v3194_v23 = vld [vmem:[#allocation3 + $0x1b] ss:$2 sm:$0xff]  ;;  %v3202_v31 = vld [vmem:[#allocation3 + $0x1c] ss:$2 sm:$0xff] }
 0x51c   : > { %3102 = vst.msk [vmem:[#allocation3 + $0x30] sm:$0xff] %vm1302_vm1, %v3094_v46  ;;  %v3210_v32 = vld [vmem:[#allocation3 + $0x1d] ss:$2 sm:$0xff]  ;;  %v3218_v57 = vld [vmem:[#allocation3 + $0x1e] ss:$2 sm:$0xff] }
 0x51d   : > { %v3104_v16 = vld [vmem:[#allocation3] ss:$2 sm:$0xff] }
 0x51f   : > { %3435 = vrot.lane.b32.xlu0 %v3216_v9, %s6230_s29  ;;  %3309 = vrot.lane.b32.xlu1 %v3154_v30, %s6165_s17 }
 0x521   : > { %v3198_v21 = vld [vmem:[#allocation3 + $0x3b] ss:$2 sm:$0x1]  ;;  %v3206_v17 = vld [vmem:[#allocation3 + $0x3c] ss:$2 sm:$0x1] }
 0x522   : > { %v3214_v50 = vld [vmem:[#allocation3 + $0x3d] ss:$2 sm:$0x1]  ;;  %v3174_v10 = vld [vmem:[#allocation3 + $0x38] ss:$2 sm:$0x1] }
 0x523   : > { %3325 = vrot.lane.b32.xlu1 %v3162_v45, %s6168_s26  ;;  %3245 = vrot.lane.b32.xlu0 %v3122_v44, %s6226_s23  ;;  %v3124_v24 = vld [vmem:[#allocation3 + $0x22] ss:$2 sm:$0xff]  ;;  %v3132_v55 = vld [vmem:[#allocation3 + $0x23] ss:$2 sm:$0xff] }
 0x524   : > { %v3140_v33 = vld [vmem:[#allocation3 + $0x24] ss:$2 sm:$0xff]  ;;  %v3182_v37 = vld [vmem:[#allocation3 + $0x39] ss:$2 sm:$0x1] }
 0x525   : > { %v3148_v34 = vld [vmem:[#allocation3 + $0x25] ss:$2 sm:$0xff]  ;;  %v3190_v12 = vld [vmem:[#allocation3 + $0x3a] ss:$2 sm:$0x1] }
 0x526   : > { %v3156_v8 = vld [vmem:[#allocation3 + $0x26] ss:$2 sm:$0xff]  ;;  %v3118_v60 = vld [vmem:[#allocation3 + $0x31] ss:$2 sm:$0x1] }
 0x527   : > { %3341 = vrot.lane.b32.xlu1 %v3170_v42, %s6231_s3  ;;  %3261 = vrot.lane.b32.xlu0 %v3130_v3, %s6227_s14  ;;  %v3164_v43 = vld [vmem:[#allocation3 + $0x27] ss:$2 sm:$0xff]  ;;  %v3126_v4 = vld [vmem:[#allocation3 + $0x32] ss:$2 sm:$0x1] }
 0x528   : > { %v3172_v54 = vld [vmem:[#allocation3 + $0x28] ss:$2 sm:$0xff]  ;;  %v3134_v56 = vld [vmem:[#allocation3 + $0x33] ss:$2 sm:$0x1] }
 0x529   : > { %v3180_v36 = vld [vmem:[#allocation3 + $0x29] ss:$2 sm:$0xff]  ;;  %v3142_v63 = vld [vmem:[#allocation3 + $0x34] ss:$2 sm:$0x1] }
 0x52a   : > { %v3188_v14 = vld [vmem:[#allocation3 + $0x2a] ss:$2 sm:$0xff]  ;;  %v3150_v61 = vld [vmem:[#allocation3 + $0x35] ss:$2 sm:$0x1] }
 0x52b   : > { %3357 = vrot.lane.b32.xlu1 %v3178_v27, %s6161_s22  ;;  %3231 = vrot.lane.b32.xlu0 %v3116_v59, %s6225_s21  ;;  %v3196_v53 = vld [vmem:[#allocation3 + $0x2b] ss:$2 sm:$0xff]  ;;  %v3158_v13 = vld [vmem:[#allocation3 + $0x36] ss:$2 sm:$0x1] }
 0x52c   : > { %v3222_v22 = vld [vmem:[#allocation3 + $0x3e] ss:$2 sm:$0x1]  ;;  %v3166_v35 = vld [vmem:[#allocation3 + $0x37] ss:$2 sm:$0x1] }
 0x52d   : > { %v3204_v26 = vld [vmem:[#allocation3 + $0x2c] ss:$2 sm:$0xff]  ;;  %v3212_v28 = vld [vmem:[#allocation3 + $0x2d] ss:$2 sm:$0xff] }
 0x52e   : > { %v3220_v25 = vld [vmem:[#allocation3 + $0x2e] ss:$2 sm:$0xff] }
 0x52f   : > { %3373 = vrot.lane.b32.xlu1 %v3186_v40, %s6229_s0  ;;  %3393 = vrot.lane.b32.xlu0 %v3198_v21, %s6158_s25 }
 0x533   : > { %3389 = vrot.lane.b32.xlu1 %v3194_v23, %s6158_s25  ;;  %3409 = vrot.lane.b32.xlu0 %v3206_v17, %s6159_s28 }
 0x537   : > { %3405 = vrot.lane.b32.xlu1 %v3202_v31, %s6159_s28  ;;  %3425 = vrot.lane.b32.xlu0 %v3214_v50, %s6163_s24  ;;  %v3106_v31 = vld [vmem:[#allocation3 + $0x10] ss:$2 sm:$0xff] }
 0x53b   : > { %3421 = vrot.lane.b32.xlu1 %v3210_v32, %s6163_s24  ;;  %3247 = vrot.lane.b32.xlu0 %v3124_v24, %s6226_s23 }
 0x53d   : > { %v3228_v0 = vpop.permute.xlu1 %3227 }
 0x53e   : > { %v3447_v5 = vsel %vm1302_vm1, %v3104_v16, %v3228_v0 }
 0x53f   : > { %3437 = vrot.lane.b32.xlu1 %v3218_v57, %s6230_s29  ;;  %3263 = vrot.lane.b32.xlu0 %v3132_v55, %s6227_s14 }
 0x543   : > { %3345 = vrot.lane.b32.xlu1 %v3174_v10, %s6231_s3  ;;  %3279 = vrot.lane.b32.xlu0 %v3140_v33, %s6228_s16 }
 0x547   : > { %3361 = vrot.lane.b32.xlu1 %v3182_v37, %s6161_s22  ;;  %3295 = vrot.lane.b32.xlu0 %v3148_v34, %s6160_s27 }
 0x54b   : > { %3377 = vrot.lane.b32.xlu1 %v3190_v12, %s6229_s0  ;;  %3311 = vrot.lane.b32.xlu0 %v3156_v8, %s6165_s17 }
 0x54f   : > { %3233 = vrot.lane.b32.xlu1 %v3118_v60, %s6225_s21  ;;  %3327 = vrot.lane.b32.xlu0 %v3164_v43, %s6168_s26  ;;  %s3822_s21 = sshll.u32 %s4271_s13, 4 }
 0x553   : > { %3249 = vrot.lane.b32.xlu1 %v3126_v4, %s6226_s23  ;;  %3343 = vrot.lane.b32.xlu0 %v3172_v54, %s6231_s3 }
 0x557   : > { %3265 = vrot.lane.b32.xlu1 %v3134_v56, %s6227_s14  ;;  %3359 = vrot.lane.b32.xlu0 %v3180_v36, %s6161_s22 }
 0x55b   : > { %3281 = vrot.lane.b32.xlu1 %v3142_v63, %s6228_s16  ;;  %3375 = vrot.lane.b32.xlu0 %v3188_v14, %s6229_s0  ;;  %s323_s0 = sand.u32 1, %s4171_s10  }
 0x55c   : > { %s324_s22 = scalar_lea.vmem [#allocation4], %s323_s0 }
 0x55f   : > { %3297 = vrot.lane.b32.xlu1 %v3150_v61, %s6160_s27  ;;  %3391 = vrot.lane.b32.xlu0 %v3196_v53, %s6158_s25  ;;  %s3714_s25 = sshll.u32 %s324_s22, 4  ;;  %s3702_s27 = scalar_lea.sflag [#allocation5], %s323_s0  ;;  %s3715_s25 = int_to_ptr.vmem [resolvable:$true] %s3714_s25 }
 0x563   : > { %3313 = vrot.lane.b32.xlu1 %v3158_v13, %s6165_s17  ;;  %3441 = vrot.lane.b32.xlu0 %v3222_v22, %s6230_s29  ;;  %s4199_s17 = smov [#allocation4]  }
 0x567   : > { %3329 = vrot.lane.b32.xlu1 %v3166_v35, %s6168_s26  ;;  %s4123_s26 = sshll.u32 %s4199_s17, 4  ;;  %s4124_s26 = int_to_ptr.vmem [resolvable:$false] %s4123_s26 }
 0x568   : > { %s4125_s13 = scalar_lea.vmem %s4124_s26, 32  ;;  %p4126_p0 = scmp.lt.s32.totalorder %s3715_s25, %s4124_s26 }
 0x569   : > { %v3230_v20 = vpop.permute.xlu0 %3229  ;;  %v3244_v49 = vpop.permute.xlu1 %3243 }
 0x56a   : > { %v3451_v48 = vsel %vm6232_vm12, %v3447_v5, %v3244_v49  ;;  %v3448_v50 = vsel %vm1302_vm1, %v3106_v31, %v3230_v20  ;;  %vm6236_vm12 = vmmov %vm6233_vm4 }
 0x56b   : > { %3407 = vrot.lane.b32.xlu1 %v3204_v26, %s6159_s28  ;;  %s6062_s28 = scalar_lea.hbm %s6106_s9, %s3822_s21 }
 0x56d   : > { %v3292_v39 = vpop.permute.xlu0 %3291  ;;  %v3260_v7 = vpop.permute.xlu1 %3259 }
 0x56e   : > { %v3455_v52 = vsel %vm1358_vm3, %v3451_v48, %v3260_v7 }
 0x56f   : > { %3423 = vrot.lane.b32.xlu1 %v3212_v28, %s6163_s24  ;;  %s4119_s24 = scalar_lea.vmem %s3715_s25, 16 }
 0x570   : > { %p4120_p11 = scmp.ne.s32.totalorder %s3715_s25, %s4119_s24  ;;  %p4127_p1 = scmp.lt.s32.totalorder %s4125_s13, %s4119_s24 }
 0x571   : > { %v3308_v18 = vpop.permute.xlu0 %3307  ;;  %v3276_v46 = vpop.permute.xlu1 %3275 }
 0x572   : > { %v3459_v30 = vsel %vm6233_vm4, %v3455_v52, %v3276_v46  ;;  %vm6237_vm4 = vmmov %vm6234_vm2  ;;  %v3110_v52 = vld [vmem:[#allocation3 + $0x30] ss:$2 sm:$0x1]  ;;  %p4121_p12 = pnand %p4120_p11, %p4288_p5  ;;  %p4128_p2 = por %p4127_p1, %p4126_p0 }
 0x573   : > { %3439 = vrot.lane.b32.xlu1 %v3220_v25, %s6230_s29  ;;  %v3463_v62 = vsel %vm1414_vm5, %v3459_v30, %v3292_v39 }
 0x574   : > { %v3467_v45 = vsel %vm1442_vm6, %v3463_v62, %v3308_v18  ;;  %p4122_p13 = pneg %p4121_p12 }
 0x575   : > { %v3324_v58 = vpop.permute.xlu0 %3323 }
 0x576   : > { %v3471_v42 = vsel %vm1470_vm7, %v3467_v45, %v3324_v58  ;;  %p4129_p3 = pnand %p4128_p2, %p4122_p13 }
 0x579   : > { %v3340_v29 = vpop.permute.xlu0 %3339 }
 0x57a   : > { %v3475_v3 = vsel %vm1510_vm8, %v3471_v42, %v3340_v29 }
 0x57d   : > { %v3356_v2 = vpop.permute.xlu0 %3355 }
 0x57e   : > { %v3479_v11 = vsel %vm2710_vm11, %v3475_v3, %v3356_v2 }
 0x581   : > { %v3372_v9 = vpop.permute.xlu0 %3371 }
 0x582   : > { %v3483_v59 = vsel %vm6234_vm2, %v3479_v11, %v3372_v9  ;;  %vm6238_vm2 = vmmov %vm6235_vm10 }
 0x585   : > { %v3388_v38 = vpop.permute.xlu0 %3387 }
 0x586   : > { %v3487_v41 = vsel %vm2728_vm13, %v3483_v59, %v3388_v38 }
 0x589   : > { %v3404_v44 = vpop.permute.xlu0 %3403  ;;  %v3278_v19 = vpop.permute.xlu1 %3277 }
 0x58a   : > { %v3491_v40 = vsel %vm2737_vm14, %v3487_v41, %v3404_v44 }
 0x58d   : > { %v3420_v51 = vpop.permute.xlu0 %3419  ;;  %v3294_v27 = vpop.permute.xlu1 %3293 }
 0x58e   : > { %v3495_v21 = vsel %vm2746_vm15, %v3491_v40, %v3420_v51 }
 0x591   : > { %v3436_v47 = vpop.permute.xlu0 %3435  ;;  %v3310_v6 = vpop.permute.xlu1 %3309 }
 0x592   : > { %v3499_v23 = vsel %vm2755_vm0, %v3495_v21, %v3436_v47 }
 0x593   : > { %4041 = vmatprep.mubr.msk.f32.mxu1 %vm2764_vm9, %v3499_v23 }
 0x595   : > { %v3326_v17 = vpop.permute.xlu1 %3325  ;;  %v3246_v1 = vpop.permute.xlu0 %3245 }
 0x596   : > { %v3452_v15 = vsel %vm6235_vm10, %v3448_v50, %v3246_v1  ;;  %vm6239_vm10 = vmmov %vm6236_vm12 }
 0x599   : > { %v3342_v32 = vpop.permute.xlu1 %3341  ;;  %v3262_v24 = vpop.permute.xlu0 %3261 }
 0x59a   : > { %v3456_v57 = vsel %vm1358_vm3, %v3452_v15, %v3262_v24 }
 0x59b   : > { %v3460_v55 = vsel %vm6236_vm12, %v3456_v57, %v3278_v19  ;;  %v3108_v19 = vld [vmem:[#allocation3 + $0x20] ss:$2 sm:$0xff]  ;;  %vm6240_vm12 = vmmov %vm6238_vm2 }
 0x59c   : > { %v3464_v37 = vsel %vm1414_vm5, %v3460_v55, %v3294_v27 }
 0x59d   : > { %v3358_v10 = vpop.permute.xlu1 %3357  ;;  %v3232_v33 = vpop.permute.xlu0 %3231  ;;  %v3468_v8 = vsel %vm1442_vm6, %v3464_v37, %v3310_v6 }
 0x59e   : > { %v3472_v60 = vsel %vm1470_vm7, %v3468_v8, %v3326_v17  ;;  %v3449_v3 = vsel %vm1302_vm1, %v3108_v19, %v3232_v33 }
 0x59f   : > { %v3476_v54 = vsel %vm1510_vm8, %v3472_v60, %v3342_v32 }
 0x5a0   : > { %v3480_v63 = vsel %vm2710_vm11, %v3476_v54, %v3358_v10 }
 0x5a1   : > { %v3374_v34 = vpop.permute.xlu1 %3373  ;;  %v3394_v12 = vpop.permute.xlu0 %3393 }
 0x5a2   : > { %v3484_v53 = vsel %vm6237_vm4, %v3480_v63, %v3374_v34  ;;  %vm6241_vm4 = vmmov %vm6239_vm10 }
 0x5a5   : > { %v3390_v43 = vpop.permute.xlu1 %3389  ;;  %v3410_v4 = vpop.permute.xlu0 %3409 }
 0x5a6   : > { %v3488_v13 = vsel %vm2728_vm13, %v3484_v53, %v3390_v43 }
 0x5a9   : > { %v3406_v56 = vpop.permute.xlu1 %3405  ;;  %v3426_v36 = vpop.permute.xlu0 %3425 }
 0x5aa   : > { %v3492_v22 = vsel %vm2737_vm14, %v3488_v13, %v3406_v56 }
 0x5ad   : > { %v3422_v14 = vpop.permute.xlu1 %3421  ;;  %v3248_v61 = vpop.permute.xlu0 %3247 }
 0x5ae   : > { %v3496_v35 = vsel %vm2746_vm15, %v3492_v22, %v3422_v14  ;;  %v3453_v27 = vsel %vm6240_vm12, %v3449_v3, %v3248_v61  ;;  %v3819_v61 = vld [vmem:[%s6104_s7 + $0x28] sm:$0xff] }
 0x5b1   : > { %v3438_v20 = vpop.permute.xlu1 %3437  ;;  %v3264_v26 = vpop.permute.xlu0 %3263 }
 0x5b2   : > { %v3500_v39 = vsel %vm2755_vm0, %v3496_v35, %v3438_v20  ;;  %v3457_v40 = vsel %vm1358_vm3, %v3453_v27, %v3264_v26  ;;  %v3625_v35 = vld [vmem:[%s6104_s7] sm:$0xff] }
 0x5b3   : > { %4042 = vmatmul.mubr.msk.f32.vlgmr.msra.gmra.mxu1 %vm2764_vm9, %v3500_v39  ;;  %v3818_v20 = vld [vmem:[%s6104_s7 + $0x20] sm:$0xff] }
 0x5b5   : > { %v3346_v28 = vpop.permute.xlu1 %3345  ;;  %v3280_v0 = vpop.permute.xlu0 %3279 }
 0x5b6   : > { %v3461_v47 = vsel %vm6241_vm4, %v3457_v40, %v3280_v0 }
 0x5b9   : > { %v3362_v18 = vpop.permute.xlu1 %3361  ;;  %v3296_v25 = vpop.permute.xlu0 %3295 }
 0x5ba   : > { %v3465_v23 = vsel %vm1414_vm5, %v3461_v47, %v3296_v25 }
 0x5bd   : > { %v3378_v49 = vpop.permute.xlu1 %3377  ;;  %v3312_v7 = vpop.permute.xlu0 %3311 }
 0x5be   : > { %v3469_v31 = vsel %vm1442_vm6, %v3465_v23, %v3312_v7 }
 0x5c1   : > { %v3234_v58 = vpop.permute.xlu1 %3233  ;;  %v3328_v2 = vpop.permute.xlu0 %3327 }
 0x5c2   : > { %v3450_v9 = vsel %vm1302_vm1, %v3110_v52, %v3234_v58  ;;  %v3473_v15 = vsel %vm1470_vm7, %v3469_v31, %v3328_v2 }
 0x5c5   : > { %v3250_v29 = vpop.permute.xlu1 %3249  ;;  %v3344_v46 = vpop.permute.xlu0 %3343 }
 0x5c6   : > { %v3454_v62 = vsel %vm6238_vm2, %v3450_v9, %v3250_v29  ;;  %vm6242_vm2 = vcmask 408576   ;;  %v3477_v32 = vsel %vm1510_vm8, %v3473_v15, %v3344_v46  ;;  %v3627_v46 = vld [vmem:[%s6104_s7 + $0x10] sm:$0xff] }
 0x5c7   : > { %vm6243_vm1 = vmmov %vm6242_vm2 }
 0x5c9   : > { %v3266_v16 = vpop.permute.xlu1 %3265  ;;  %v3360_v30 = vpop.permute.xlu0 %3359 }
 0x5ca   : > { %v3458_v45 = vsel %vm1358_vm3, %v3454_v62, %v3266_v16  ;;  %v3481_v57 = vsel %vm2710_vm11, %v3477_v32, %v3360_v30  ;;  %vm3633_vm3 = vcmask 56320   ;;  %v3628_v30 = vld [vmem:[%s6104_s7 + $0x18] sm:$0x1] }
 0x5cb   : > { %v3821_v62 = vld [vmem:[%s6104_s7 + $0x38] sm:$0x1] }
 0x5cd   : > { %v3282_v5 = vpop.permute.xlu1 %3281  ;;  %v3376_v59 = vpop.permute.xlu0 %3375 }
 0x5ce   : > { %v3462_v44 = vsel %vm6239_vm10, %v3458_v45, %v3282_v5  ;;  %v3485_v33 = vsel %vm6243_vm1, %v3481_v57, %v3376_v59 }
 0x5d1   : > { %v3298_v48 = vpop.permute.xlu1 %3297  ;;  %v3392_v24 = vpop.permute.xlu0 %3391 }
 0x5d2   : > { %v3466_v42 = vsel %vm1414_vm5, %v3462_v44, %v3298_v48  ;;  %v3489_v37 = vsel %vm2728_vm13, %v3485_v33, %v3392_v24  ;;  %v3820_v48 = vld [vmem:[%s6104_s7 + $0x30] sm:$0xff]  ;;  %vm3643_vm5 = vcmask 49152  }
 0x5d5   : > { %v3314_v38 = vpop.permute.xlu1 %3313  ;;  %v3442_v43 = vpop.permute.xlu0 %3441 }
 0x5d6   : > { %v3470_v11 = vsel %vm1442_vm6, %v3466_v42, %v3314_v38  ;;  %vm3649_vm6 = vcmask 1040384  }
 0x5d9   : > { %v3330_v51 = vpop.permute.xlu1 %3329 }
 0x5da   : > { %v3474_v41 = vsel %vm1470_vm7, %v3470_v11, %v3330_v51  ;;  %vm3689_vm7 = vcmask 7168  }
 0x5db   : > { %v3478_v21 = vsel %vm1510_vm8, %v3474_v41, %v3346_v28  ;;  %vm3699_vm8 = vcmask 8192  }
 0x5dc   : > { %v3482_v6 = vsel %vm2710_vm11, %v3478_v21, %v3362_v18 }
 0x5dd   : > { %v3486_v17 = vsel %vm6242_vm2, %v3482_v6, %v3378_v49  ;;  %v3408_v1 = vpop.permute.xlu1 %3407 }
 0x5de   : > { %v3490_v50 = vsel %vm2728_vm13, %v3486_v17, %v3394_v12  ;;  %v3493_v34 = vsel %vm2737_vm14, %v3489_v37, %v3408_v1 }
 0x5df   : > { %v3494_v10 = vsel %vm2737_vm14, %v3490_v50, %v3410_v4  ;;  %v3812_v4 = vld [vmem:[%s6103_s6] ss:$0 sm:$0xff] }
 0x5e0   : > { %v3498_v8 = vsel %vm2746_vm15, %v3494_v10, %v3426_v36  ;;  %v3626_v36 = vld [vmem:[%s6104_s7 + $0x8] sm:$0xff] }
 0x5e1   : > { %v3424_v55 = vpop.permute.xlu1 %3423  ;;  %v3502_v56 = vsel %vm2755_vm0, %v3498_v8, %v3442_v43 }
 0x5e2   : > { %v3497_v12 = vsel %vm2746_vm15, %v3493_v34, %v3424_v55 }
 0x5e5   : > { %v3440_v60 = vpop.permute.xlu1 %3439 }
 0x5e6   : > { %v3501_v54 = vsel %vm2755_vm0, %v3497_v12, %v3440_v60 }
 0x5e7   : > { %4044 = vmatprep.mubr.msk.f32.mxu1 %vm2764_vm9, %v3501_v54 }
 0x5e8   : > { %4045 = vmatmul.mubr.msk.f32.gmra.mxu1 %vm2764_vm9, %v3502_v56 }
 0x673   : > { %v4043_v63 = vpop.f32.mrf.mxu1 }
 0x674   : > { %v3608_v14 = vadd.f32 %v4043_v63, %v3812_v4 }
 0x675   : > { %v3602_v53 = vpop.f32.mrf.mxu1 }
 0x676   : > { %v3622_v13 = vmax.f32 %v3608_v14, 0.0  ;;  %v3603_v22 = vadd.f32 %v3812_v4, %v3602_v53 }
 0x678   : > { %v3630_v26 = vmul.f32 %v3626_v36, %v3622_v13  ;;  %v3664_v39 = vmul.f32 %v3819_v61, %v3622_v13  ;;  %v3621_v28 = vmax.f32 %v3603_v22, 0.0 }
 0x67a   : > { %v3629_v0 = vmul.f32 %v3625_v35, %v3621_v28  ;;  %v3663_v18 = vmul.f32 %v3818_v20, %v3621_v28  ;;  %v3670_v25 = vsel %vm3633_vm3, %v3664_v39, 0.0  ;;  %v3637_v49 = vsel %vm3633_vm3, %v3630_v26, 0.0 }
 0x67b   : > { %3671 = vadd.xlane.f32.xlu1 %v3670_v25  ;;  %3638 = vadd.xlane.f32.xlu0 %v3637_v49 }
 0x67c   : > { %v3634_v58 = vsel %vm3633_vm3, %v3629_v0, 0.0  ;;  %v3667_v7 = vsel %vm3633_vm3, %v3663_v18, 0.0 }
 0x67f   : > { %3635 = vadd.xlane.f32.xlu1 %v3634_v58  ;;  %3668 = vadd.xlane.f32.xlu0 %v3667_v7 }
 0x6a8   : > { %v4046_v29 = vpop.f32.mrf.mxu1 }
 0x6a9   : > { %v3618_v2 = vadd.f32 %v4046_v29, %v3812_v4 }
 0x6aa   : > { %v3612_v16 = vpop.f32.mrf.mxu1 }
 0x6ab   : > { %v3613_v5 = vadd.f32 %v3812_v4, %v3612_v16  ;;  %v3624_v52 = vmax.f32 %v3618_v2, 0.0  ;;  %v3691_v4 = vld [vmem:[%s6105_s8] sm:$0x1] }
 0x6ad   : > { %v3623_v9 = vmax.f32 %v3613_v5, 0.0  ;;  %v3632_v44 = vmul.f32 %v3628_v30, %v3624_v52  ;;  %v3666_v19 = vmul.f32 %v3821_v62, %v3624_v52 }
 0x6af   : > { %v3631_v38 = vmul.f32 %v3627_v46, %v3623_v9  ;;  %v3665_v45 = vmul.f32 %v3820_v48, %v3623_v9  ;;  %v3676_v11 = vsel %vm3643_vm5, %v3666_v19, 0.0  ;;  %v3644_v51 = vsel %vm3643_vm5, %v3632_v44, 0.0 }
 0x6b1   : > { %v3673_v42 = vsel %vm3633_vm3, %v3665_v45, 0.0  ;;  %v3640_v3 = vsel %vm3633_vm3, %v3631_v38, 0.0 }
 0x6b2   : > { %3674 = vadd.xlane.f32.xlu1 %v3673_v42  ;;  %3641 = vadd.xlane.f32.xlu0 %v3640_v3 }
 0x6b6   : > { %3677 = vadd.xlane.f32.xlu1 %v3676_v11  ;;  %3645 = vadd.xlane.f32.xlu0 %v3644_v51 }
 0x704   : > { %v3672_v27 = vpop.xlane.xlu1 %3671  ;;  %v3639_v59 = vpop.xlane.xlu0 %3638 }
 0x708   : > { %v3636_v41 = vpop.xlane.xlu1 %3635  ;;  %v3669_v40 = vpop.xlane.xlu0 %3668 }
 0x709   : > { %v3647_v6 = vadd.f32 %v3639_v59, %v3636_v41  ;;  %v3679_v23 = vadd.f32 %v3672_v27, %v3669_v40 }
 0x73b   : > { %v3675_v21 = vpop.xlane.xlu1 %3674  ;;  %v3642_v47 = vpop.xlane.xlu0 %3641 }
 0x73c   : > { %v3680_v17 = vadd.f32 %v3679_v23, %v3675_v21  ;;  %v3648_v1 = vadd.f32 %v3647_v6, %v3642_v47 }
 0x73f   : > { %v3678_v31 = vpop.xlane.xlu1 %3677  ;;  %v3646_v50 = vpop.xlane.xlu0 %3645 }
 0x740   : > { %v3681_v15 = vsel %vm3649_vm6, %v3678_v31, 0.0  ;;  %v3650_v32 = vsel %vm3649_vm6, %v3646_v50, 0.0 }
 0x741   : > { %v3682_v24 = vadd.f32 %v3681_v15, %v3680_v17  ;;  %v3651_v57 = vadd.f32 %v3650_v32, %v3648_v1 }
 0x743   : > { %v3683_v55 = vrot.slane %v3682_v24, 4  ;;  %v3652_v10 = vrot.slane %v3651_v57, 4 }
 0x745   : > { %v3684_v33 = vadd.f32 %v3683_v55, %v3682_v24  ;;  %v3653_v37 = vadd.f32 %v3652_v10, %v3651_v57 }
 0x747   : > { %v3685_v34 = vrot.slane %v3684_v33, 2  ;;  %v3654_v8 = vrot.slane %v3653_v37, 2 }
 0x749   : > { %v3686_v12 = vadd.f32 %v3685_v34, %v3684_v33  ;;  %v3655_v60 = vadd.f32 %v3654_v8, %v3653_v37 }
 0x74b   : > { %v3687_v43 = vrot.slane %v3686_v12, 1  ;;  %v3656_v54 = vrot.slane %v3655_v60, 1 }
 0x74d   : > { %v3688_v56 = vadd.f32 %v3687_v43, %v3686_v12  ;;  %v3657_v63 = vadd.f32 %v3656_v54, %v3655_v60 }
 0x74f   : > { %v3690_v14 = vsel %vm3689_vm7, %v3657_v63, %v3688_v56 }
 0x750   : > { %v3692_v36 = vadd.f32 %v3691_v4, %v3690_v14 }
 0x752   : > { %v3693_v61 = vsub.f32 0.0, %v3692_v36 }
 0x754   : > { %v3694_v53 = vmul.f32 1.442695, %v3693_v61 }
 0x756   : > { %4115 = vpow2.f32 %v3694_v53 }
 0x763   : > { %v4116_v13 = vpop.eup %4115 }
 0x764   : > { %v3696_v22 = vadd.f32 1.0, %v4116_v13 }
 0x766   : > { %4117 = vrcp.f32 %v3696_v22 }
 0x773   : > { %v4118_v35 = vpop.eup %4117 }
 0x774   : > { %3700 = vst.msk [vmem:[%s324_s22] sm:$0x1] %vm3699_vm8, %v4118_v35 }
 0x775   : > { %4132 = shalt.err (!%p4129_p3)
}
 0x776   : > { %s4133_s23 = scalar_lea.hbm %s6062_s28, 16  ;;  %s4137_s15 = scalar_lea.hbm %s6106_s9, 32 }
 0x777   : > { %p4134_p4 = scmp.ne.s32.totalorder %s6062_s28, %s4133_s23  ;;  %p4138_p9 = scmp.lt.s32.totalorder %s6062_s28, %s6106_s9 }
 0x778   : > { %p4139_p10 = scmp.lt.s32.totalorder %s4137_s15, %s4133_s23 }
 0x779   : > { %p4135_p7 = pnand %p4134_p4, %p4288_p5 }
 0x77a   : > { %p4140_p11 = por %p4139_p10, %p4138_p9 }
 0x77b   : > { %p4136_p8 = pneg %p4135_p7 }
 0x77d   : > { %p4141_p12 = pnand %p4140_p11, %p4136_p8 }
 0x77f   : > { %4144 = shalt.err (!%p4141_p12)
}
 0x780   : > { %4058 = dma.vmem_to_hbm [thread:$0]  (%p4288_p5), %s3715_s25, 16, %s6062_s28, %s3702_s27  }
 0x781 PF: > { %p4064_p13 = scmp.ge.s32.totalorder %s4179_s12, 2  ;;  %s3726_s18 = sand.u32 1, %s4167_s30  }
 0x782   : > { %s3727_s1 = scalar_lea.sflag [#allocation5], %s3726_s18 }
 0x783   : > { %p4061_p0 = pnand %p4064_p13, %p4292_p6 }
 0x785   : > { %p4062_p1 = pneg %p4061_p0 }
 0x787   : > { %4162 = dma.done.wait (%p4062_p1), %s3727_s1, 16  }
 0x788   : > { %4164 = vsyncadd (%p4062_p1), %s3727_s1, 4294967280  ;;  %s6244_s12 = sld [smem:[#allocation8_spill]]  ;;  %s6247_s30 = smov %s4171_s10 }
 0x789   : > { %s6245_s2 = sld [smem:[#allocation7_spill]] }
 0x78a   : > { %s6246_s11 = sld [smem:[#allocation9_spill]] }
 0x78e   : > { %p19_p2 = scmp.ge.s32.totalorder %s6244_s12, 4  }
 0x78f   : > { %s6248_s10 = smov %s6245_s2 }
 0x790   :  { %21 = sbr.rel (!%p19_p2) target bundleno = 9 (0x9), region = 310 }
 0x795   :  { %3731 = vsyncpa [#allocation5], 1 }
 0x796   :  { %3733 = vsyncpa [#allocation5 + $0x1], 1 }

</bundles_post_ra>
